<compile_context>
chip_gen: v7x
topology: tpu7x:2x2x1
jax: 0.10.0
libtpu: 0.0.40
codegen_flags: <defaults>
</compile_context>

<pallas_src>
import jax
import jax.numpy as jnp
from jax import lax
from jax.experimental import pallas as pl
from jax.experimental.pallas import tpu as pltpu

C_HID = 32           # hidden conv channels: nn.Conv1d(2, 32, 3) -> nn.Conv1d(32, 1, 3)
P_PER_C = 10         # per-channel packed params: 6 folded conv1 taps, folded bias, 3 conv2 taps


def _round_up(x, m):
    return ((x + m - 1) // m) * m


def _score_tiles(n_entities, tn):
    """Resolve (tile_n, padded_N) consistently for table prep and the call."""
    tn = min(tn, _round_up(n_entities, 256))
    tn = _round_up(tn, 128)                 # lane-dense tiles
    n_pad = _round_up(n_entities, tn)
    return tn, n_pad


def _fused_kernel(e1_ref, rel_ref, params_ref, embt_ref, out_ref):
    """Fused conv stack + entity-tile scoring.

    e1_ref, rel_ref : (B, D) f32, constant index_map (fetched once).
    params_ref      : SMEM f32[C_HID*10 + 1]; per channel c at base = c*10:
                        [base+0 : base+6]  conv1 taps folded with BN scale
                        [base+6]           conv1 bias folded with BN scale/shift
                        [base+7 : base+10] conv2 taps w2[0, c, 0..2]
                        [C_HID*10]         conv2 bias
    embt_ref        : (D, tn) bf16 tile of the pre-transposed entity table.
    out_ref         : (B, tn) f32 scores for this entity tile.
    """
    e1 = e1_ref[...]
    rel = rel_ref[...]
    B, D = e1.shape

    # Hoisted edge masks (comparison emitted once, reused by every shift).
    d_idx = lax.broadcasted_iota(jnp.int32, (B, D), 1)
    left_edge = d_idx == 0          # d == 0   has no d-1 neighbour
    right_edge = d_idx == D - 1     # d == D-1 has no d+1 neighbour

    def shift_r(x):  # result[d] = x[d-1], zero at d == 0   (tap k = 0)
        return jnp.where(left_edge, 0.0, pltpu.roll(x, shift=1, axis=1))

    def shift_l(x):  # result[d] = x[d+1], zero at d == D-1 (tap k = 2)
        return jnp.where(right_edge, 0.0, pltpu.roll(x, shift=D - 1, axis=1))

    feats = (shift_r(e1), e1, shift_l(e1),
             shift_r(rel), rel, shift_l(rel))

    # conv2 is linear in its (shifted) inputs: accumulate per-tap channel sums
    # y_k = sum_c w2[c,k] * relu(conv1_c_folded) in the loop, apply the k-shifts
    # once afterwards.
    y0 = jnp.zeros((B, D), jnp.float32)
    y1 = jnp.zeros((B, D), jnp.float32)
    y2 = jnp.zeros((B, D), jnp.float32)
    for c in range(C_HID):
        base = c * P_PER_C
        # folded bias + first tap, then remaining taps (BN already folded in).
        acc = params_ref[base + 6] + params_ref[base + 0] * feats[0]
        for f in range(1, 6):
            acc = acc + params_ref[base + f] * feats[f]
        acc = jnp.maximum(acc, 0.0)                       # ReLU
        # Dropout(0.2): identity in eval mode.
        y0 = y0 + params_ref[base + 7] * acc              # conv2 tap k = 0
        y1 = y1 + params_ref[base + 8] * acc              # conv2 tap k = 1
        y2 = y2 + params_ref[base + 9] * acc              # conv2 tap k = 2

    xconv = params_ref[C_HID * P_PER_C] + shift_r(y0) + y1 + shift_l(y2)

    # Score this entity tile on the MXU: (B, D) @ (D, tn) with f32 accumulation.
    x_bf = xconv.astype(jnp.bfloat16)
    out_ref[...] = jnp.dot(x_bf, embt_ref[...],
                           preferred_element_type=jnp.float32)


def pack_params(params):
    """Fold BN running stats and the conv1 bias into the conv1 taps; flatten
    everything into one 1-D f32 array for SMEM (avoids 2-D SMEM padding)."""
    w1, b1, bn_scale, bn_shift, w2, b2 = params
    w1f = (w1 * bn_scale[:, None, None]).reshape(C_HID, 6)    # taps * scale
    b1f = (b1 * bn_scale + bn_shift)[:, None]                 # bias * scale + shift
    per_c = jnp.concatenate([w1f, b1f, w2[0]], axis=1)        # (C_HID, 10)
    return jnp.concatenate([per_c.reshape(-1),
                            b2.reshape(-1)]).astype(jnp.float32)   # (C_HID*10 + 1,)


def prepare_entity_table(embedding, *, tn=4096):
    """One-time prep of the resident score table: transpose to (D, N_pad),
    cast to bf16, zero-pad N to a multiple of tn. Keep the result resident
    across calls (do NOT rebuild it every forward)."""
    N, D = embedding.shape
    tn, n_pad = _score_tiles(N, tn)
    embt = embedding.T.astype(jnp.bfloat16)                   # (D, N)
    if n_pad > N:
        embt = jnp.pad(embt, ((0, 0), (0, n_pad - N)))
    return embt                                               # (D, N_pad)


def convtranse_static_forward(embedding, emb_rel, triplets, params, *,
                              tn=4096, emb_table=None):
    """Eval-mode forward of ConvTransE_static (q_type == 'conv')."""
    N, D = embedding.shape
    B = triplets.shape[0]
    tn, n_pad = _score_tiles(N, tn)
    b_pad = _round_up(B, 8)

    if emb_table is None:
        # Fallback; in production keep the prepared table resident.
        emb_table = prepare_entity_table(embedding, tn=tn)
    assert emb_table.shape == (D, n_pad) and emb_table.dtype == jnp.bfloat16

    # Glue: row gather + batch padding + parameter packing (plain JAX, tiny).
    e1 = embedding[triplets[:, 0]].astype(jnp.float32)        # (B, D)
    rel = emb_rel[triplets[:, 1]].astype(jnp.float32)         # (B, D)
    if b_pad > B:
        e1 = jnp.pad(e1, ((0, b_pad - B), (0, 0)))
        rel = jnp.pad(rel, ((0, b_pad - B), (0, 0)))
    packed = pack_params(params)

    out = pl.pallas_call(
        _fused_kernel,
        out_shape=jax.ShapeDtypeStruct((b_pad, n_pad), jnp.float32),
        grid=(n_pad // tn,),
        in_specs=[
            pl.BlockSpec((b_pad, D), lambda j: (0, 0)),               # e1 (fetched once)
            pl.BlockSpec((b_pad, D), lambda j: (0, 0)),               # rel (fetched once)
            pl.BlockSpec(memory_space=pltpu.MemorySpace.SMEM),        # packed params
            pl.BlockSpec((D, tn), lambda j: (0, j)),                  # entity-table tile
        ],
        out_specs=pl.BlockSpec((b_pad, tn), lambda j: (0, j)),
        compiler_params=pltpu.CompilerParams(
            dimension_semantics=("parallel",)),
    )(e1, rel, packed, emb_table)

    return out[:B, :N]


def ref_forward(embedding, emb_rel, triplets, params):
    """Pure-JAX reference mirroring the PyTorch forward (eval mode)."""
    w1, b1, bn_scale, bn_shift, w2, b2 = params
    e1 = embedding[triplets[:, 0]]
    rel = emb_rel[triplets[:, 1]]
    x = jnp.stack([e1, rel], axis=1)                                   # (B, 2, D)
    y = lax.conv_general_dilated(x, w1, (1,), ((1, 1),),
                                 dimension_numbers=('NCH', 'OIH', 'NCH'))
    y = y + b1[None, :, None]
    y = y * bn_scale[None, :, None] + bn_shift[None, :, None]
    y = jnp.maximum(y, 0.0)
    y = lax.conv_general_dilated(y, w2, (1,), ((1, 1),),
                                 dimension_numbers=('NCH', 'OIH', 'NCH'))
    y = y + b2[None, :, None]                                          # (B, 1, D)
    return y[:, 0, :] @ embedding.T                                    # (B, N)


if __name__ == "__main__":
    key = jax.random.PRNGKey(0)
    ks = jax.random.split(key, 16)

    # Small toy shapes; N deliberately NOT a multiple of the tile to exercise
    # the padded-table path. Production defaults: tn=4096 (>= 1 MiB/step).
    N, R, D, B = 1000, 16, 128, 8
    TN = 256   # small tile so the toy grid has several steps

    embedding = jax.random.normal(ks[0], (N, D), jnp.float32) * 0.1
    emb_rel = jax.random.normal(ks[1], (R, D), jnp.float32) * 0.1
    triplets = jnp.stack([
        jax.random.randint(ks[2], (B,), 0, N),
        jax.random.randint(ks[3], (B,), 0, R),
        jax.random.randint(ks[4], (B,), 0, N),
    ], axis=1)                            # (B, 3): [subject, relation, object]

    # deterministic synthetic parameters (shapes match the nn.Module __init__)
    w1 = jax.random.normal(ks[5], (C_HID, 2, 3), jnp.float32) * 0.2   # Conv1d(2,32,3)
    b1 = jax.random.normal(ks[6], (C_HID,), jnp.float32) * 0.05
    gamma = 1.0 + 0.1 * jax.random.normal(ks[7], (C_HID,), jnp.float32)
    beta = 0.05 * jax.random.normal(ks[8], (C_HID,), jnp.float32)
    run_mean = 0.05 * jax.random.normal(ks[9], (C_HID,), jnp.float32)
    run_var = jnp.abs(1.0 + 0.1 * jax.random.normal(ks[10], (C_HID,), jnp.float32))
    eps = 1e-5
    bn_scale = gamma / jnp.sqrt(run_var + eps)
    bn_shift = beta - run_mean * bn_scale
    w2 = jax.random.normal(ks[11], (1, C_HID, 3), jnp.float32) * 0.2  # Conv1d(32,1,3)
    b2 = 0.05 * jax.random.normal(ks[12], (1,), jnp.float32)

    params = (w1, b1, bn_scale, bn_shift, w2, b2)

    # Resident bf16 (D, N_pad) score table: prepared ONCE, reused every call.
    emb_table = prepare_entity_table(embedding, tn=TN)
    emb_table = jax.block_until_ready(emb_table)

    out = convtranse_static_forward(embedding, emb_rel, triplets, params,
                                    tn=TN, emb_table=emb_table)
    out = jax.block_until_ready(out)

    ref = ref_forward(embedding, emb_rel, triplets, params)
    assert out.shape == (B, N)
    # tolerance widened vs pure-f32 because the score matmul runs in bf16
    # (xconv and the entity table) with f32 accumulation on the MXU.
    if not jnp.allclose(out, ref, rtol=3e-2, atol=3e-2):
        raise AssertionError(
            f"mismatch vs reference: max abs err = {jnp.max(jnp.abs(out - ref))}")
    print("KERNEL_OK")
</pallas_src>

<mosaic_0001>
module attributes {stable_mosaic.version = 11 : i64} {
  func.func @_fused_kernel(%arg0: i32, %arg1: memref<8x128xf32, #tpu.memory_space<vmem>>, %arg2: memref<8x128xf32, #tpu.memory_space<vmem>>, %arg3: memref<321xf32, #tpu.memory_space<smem>>, %arg4: memref<128x256xbf16, #tpu.memory_space<vmem>>, %arg5: memref<8x256xf32, #tpu.memory_space<vmem>>) attributes {dimension_semantics = [#tpu.dimension_semantics<parallel>], iteration_bounds = array<i64: 4>, scalar_prefetch = 0 : i64, scratch_operands = 0 : i64, tpu.core_type = #tpu.core_type<tc>, window_params = [{pipeline_mode = #tpu.pipeline_mode<synchronous>, transform_indices = @transform_0, window_bounds = array<i64: 8, 128>}, {pipeline_mode = #tpu.pipeline_mode<synchronous>, transform_indices = @transform_1, window_bounds = array<i64: 8, 128>}, {transform_indices = @transform_2, window_bounds = array<i64: 321>}, {transform_indices = @transform_3, window_bounds = array<i64: 128, 256>}, {transform_indices = @transform_4, window_bounds = array<i64: 8, 256>}]} {
    %c0 = arith.constant 0 : index
    %c0_0 = arith.constant 0 : index
    %0 = vector.load %arg1[%c0, %c0_0] : memref<8x128xf32, #tpu.memory_space<vmem>>, vector<8x128xf32>
    %c0_1 = arith.constant 0 : index
    %c0_2 = arith.constant 0 : index
    %1 = vector.load %arg2[%c0_1, %c0_2] : memref<8x128xf32, #tpu.memory_space<vmem>>, vector<8x128xf32>
    %2 = tpu.iota {dimensions = array<i32: 1>} : vector<8x128xi32>
    %c0_i32 = arith.constant 0 : i32
    %3 = vector.broadcast %c0_i32 : i32 to vector<8x128xi32>
    %4 = arith.cmpi eq, %2, %3 : vector<8x128xi32>
    %c127_i32 = arith.constant 127 : i32
    %5 = vector.broadcast %c127_i32 : i32 to vector<8x128xi32>
    %6 = arith.cmpi eq, %2, %5 : vector<8x128xi32>
    %c1_i32 = arith.constant 1 : i32
    %7 = tpu.dynamic_rotate %0 by %c1_i32 dim 1 : vector<8x128xf32>, i32 -> vector<8x128xf32>
    %cst = arith.constant 0.000000e+00 : f32
    %8 = vector.broadcast %cst : f32 to vector<8x128xf32>
    %9 = arith.select %4, %8, %7 : vector<8x128xi1>, vector<8x128xf32>
    %c127_i32_3 = arith.constant 127 : i32
    %10 = tpu.dynamic_rotate %0 by %c127_i32_3 dim 1 : vector<8x128xf32>, i32 -> vector<8x128xf32>
    %cst_4 = arith.constant 0.000000e+00 : f32
    %11 = vector.broadcast %cst_4 : f32 to vector<8x128xf32>
    %12 = arith.select %6, %11, %10 : vector<8x128xi1>, vector<8x128xf32>
    %c1_i32_5 = arith.constant 1 : i32
    %13 = tpu.dynamic_rotate %1 by %c1_i32_5 dim 1 : vector<8x128xf32>, i32 -> vector<8x128xf32>
    %cst_6 = arith.constant 0.000000e+00 : f32
    %14 = vector.broadcast %cst_6 : f32 to vector<8x128xf32>
    %15 = arith.select %4, %14, %13 : vector<8x128xi1>, vector<8x128xf32>
    %c127_i32_7 = arith.constant 127 : i32
    %16 = tpu.dynamic_rotate %1 by %c127_i32_7 dim 1 : vector<8x128xf32>, i32 -> vector<8x128xf32>
    %cst_8 = arith.constant 0.000000e+00 : f32
    %17 = vector.broadcast %cst_8 : f32 to vector<8x128xf32>
    %18 = arith.select %6, %17, %16 : vector<8x128xi1>, vector<8x128xf32>
    %cst_9 = arith.constant 0.000000e+00 : f32
    %19 = vector.broadcast %cst_9 : f32 to vector<8x128xf32>
    %cst_10 = arith.constant 0.000000e+00 : f32
    %20 = vector.broadcast %cst_10 : f32 to vector<8x128xf32>
    %cst_11 = arith.constant 0.000000e+00 : f32
    %21 = vector.broadcast %cst_11 : f32 to vector<8x128xf32>
    %c6 = arith.constant 6 : index
    %22 = memref.load %arg3[%c6] : memref<321xf32, #tpu.memory_space<smem>>
    %c0_12 = arith.constant 0 : index
    %23 = memref.load %arg3[%c0_12] : memref<321xf32, #tpu.memory_space<smem>>
    %24 = vector.broadcast %23 : f32 to vector<8x128xf32>
    %25 = arith.mulf %24, %9 : vector<8x128xf32>
    %26 = vector.broadcast %22 : f32 to vector<8x128xf32>
    %27 = arith.addf %26, %25 : vector<8x128xf32>
    %c1 = arith.constant 1 : index
    %28 = memref.load %arg3[%c1] : memref<321xf32, #tpu.memory_space<smem>>
    %29 = vector.broadcast %28 : f32 to vector<8x128xf32>
    %30 = arith.mulf %29, %0 : vector<8x128xf32>
    %31 = arith.addf %27, %30 : vector<8x128xf32>
    %c2 = arith.constant 2 : index
    %32 = memref.load %arg3[%c2] : memref<321xf32, #tpu.memory_space<smem>>
    %33 = vector.broadcast %32 : f32 to vector<8x128xf32>
    %34 = arith.mulf %33, %12 : vector<8x128xf32>
    %35 = arith.addf %31, %34 : vector<8x128xf32>
    %c3 = arith.constant 3 : index
    %36 = memref.load %arg3[%c3] : memref<321xf32, #tpu.memory_space<smem>>
    %37 = vector.broadcast %36 : f32 to vector<8x128xf32>
    %38 = arith.mulf %37, %15 : vector<8x128xf32>
    %39 = arith.addf %35, %38 : vector<8x128xf32>
    %c4 = arith.constant 4 : index
    %40 = memref.load %arg3[%c4] : memref<321xf32, #tpu.memory_space<smem>>
    %41 = vector.broadcast %40 : f32 to vector<8x128xf32>
    %42 = arith.mulf %41, %1 : vector<8x128xf32>
    %43 = arith.addf %39, %42 : vector<8x128xf32>
    %c5 = arith.constant 5 : index
    %44 = memref.load %arg3[%c5] : memref<321xf32, #tpu.memory_space<smem>>
    %45 = vector.broadcast %44 : f32 to vector<8x128xf32>
    %46 = arith.mulf %45, %18 : vector<8x128xf32>
    %47 = arith.addf %43, %46 : vector<8x128xf32>
    %cst_13 = arith.constant 0.000000e+00 : f32
    %48 = vector.broadcast %cst_13 : f32 to vector<8x128xf32>
    %49 = arith.maximumf %47, %48 : vector<8x128xf32>
    %c7 = arith.constant 7 : index
    %50 = memref.load %arg3[%c7] : memref<321xf32, #tpu.memory_space<smem>>
    %51 = vector.broadcast %50 : f32 to vector<8x128xf32>
    %52 = arith.mulf %51, %49 : vector<8x128xf32>
    %53 = arith.addf %19, %52 : vector<8x128xf32>
    %c8 = arith.constant 8 : index
    %54 = memref.load %arg3[%c8] : memref<321xf32, #tpu.memory_space<smem>>
    %55 = vector.broadcast %54 : f32 to vector<8x128xf32>
    %56 = arith.mulf %55, %49 : vector<8x128xf32>
    %57 = arith.addf %20, %56 : vector<8x128xf32>
    %c9 = arith.constant 9 : index
    %58 = memref.load %arg3[%c9] : memref<321xf32, #tpu.memory_space<smem>>
    %59 = vector.broadcast %58 : f32 to vector<8x128xf32>
    %60 = arith.mulf %59, %49 : vector<8x128xf32>
    %61 = arith.addf %21, %60 : vector<8x128xf32>
    %c16 = arith.constant 16 : index
    %62 = memref.load %arg3[%c16] : memref<321xf32, #tpu.memory_space<smem>>
    %c10 = arith.constant 10 : index
    %63 = memref.load %arg3[%c10] : memref<321xf32, #tpu.memory_space<smem>>
    %64 = vector.broadcast %63 : f32 to vector<8x128xf32>
    %65 = arith.mulf %64, %9 : vector<8x128xf32>
    %66 = vector.broadcast %62 : f32 to vector<8x128xf32>
    %67 = arith.addf %66, %65 : vector<8x128xf32>
    %c11 = arith.constant 11 : index
    %68 = memref.load %arg3[%c11] : memref<321xf32, #tpu.memory_space<smem>>
    %69 = vector.broadcast %68 : f32 to vector<8x128xf32>
    %70 = arith.mulf %69, %0 : vector<8x128xf32>
    %71 = arith.addf %67, %70 : vector<8x128xf32>
    %c12 = arith.constant 12 : index
    %72 = memref.load %arg3[%c12] : memref<321xf32, #tpu.memory_space<smem>>
    %73 = vector.broadcast %72 : f32 to vector<8x128xf32>
    %74 = arith.mulf %73, %12 : vector<8x128xf32>
    %75 = arith.addf %71, %74 : vector<8x128xf32>
    %c13 = arith.constant 13 : index
    %76 = memref.load %arg3[%c13] : memref<321xf32, #tpu.memory_space<smem>>
    %77 = vector.broadcast %76 : f32 to vector<8x128xf32>
    %78 = arith.mulf %77, %15 : vector<8x128xf32>
    %79 = arith.addf %75, %78 : vector<8x128xf32>
    %c14 = arith.constant 14 : index
    %80 = memref.load %arg3[%c14] : memref<321xf32, #tpu.memory_space<smem>>
    %81 = vector.broadcast %80 : f32 to vector<8x128xf32>
    %82 = arith.mulf %81, %1 : vector<8x128xf32>
    %83 = arith.addf %79, %82 : vector<8x128xf32>
    %c15 = arith.constant 15 : index
    %84 = memref.load %arg3[%c15] : memref<321xf32, #tpu.memory_space<smem>>
    %85 = vector.broadcast %84 : f32 to vector<8x128xf32>
    %86 = arith.mulf %85, %18 : vector<8x128xf32>
    %87 = arith.addf %83, %86 : vector<8x128xf32>
    %cst_14 = arith.constant 0.000000e+00 : f32
    %88 = vector.broadcast %cst_14 : f32 to vector<8x128xf32>
    %89 = arith.maximumf %87, %88 : vector<8x128xf32>
    %c17 = arith.constant 17 : index
    %90 = memref.load %arg3[%c17] : memref<321xf32, #tpu.memory_space<smem>>
    %91 = vector.broadcast %90 : f32 to vector<8x128xf32>
    %92 = arith.mulf %91, %89 : vector<8x128xf32>
    %93 = arith.addf %53, %92 : vector<8x128xf32>
    %c18 = arith.constant 18 : index
    %94 = memref.load %arg3[%c18] : memref<321xf32, #tpu.memory_space<smem>>
    %95 = vector.broadcast %94 : f32 to vector<8x128xf32>
    %96 = arith.mulf %95, %89 : vector<8x128xf32>
    %97 = arith.addf %57, %96 : vector<8x128xf32>
    %c19 = arith.constant 19 : index
    %98 = memref.load %arg3[%c19] : memref<321xf32, #tpu.memory_space<smem>>
    %99 = vector.broadcast %98 : f32 to vector<8x128xf32>
    %100 = arith.mulf %99, %89 : vector<8x128xf32>
    %101 = arith.addf %61, %100 : vector<8x128xf32>
    %c26 = arith.constant 26 : index
    %102 = memref.load %arg3[%c26] : memref<321xf32, #tpu.memory_space<smem>>
    %c20 = arith.constant 20 : index
    %103 = memref.load %arg3[%c20] : memref<321xf32, #tpu.memory_space<smem>>
    %104 = vector.broadcast %103 : f32 to vector<8x128xf32>
    %105 = arith.mulf %104, %9 : vector<8x128xf32>
    %106 = vector.broadcast %102 : f32 to vector<8x128xf32>
    %107 = arith.addf %106, %105 : vector<8x128xf32>
    %c21 = arith.constant 21 : index
    %108 = memref.load %arg3[%c21] : memref<321xf32, #tpu.memory_space<smem>>
    %109 = vector.broadcast %108 : f32 to vector<8x128xf32>
    %110 = arith.mulf %109, %0 : vector<8x128xf32>
    %111 = arith.addf %107, %110 : vector<8x128xf32>
    %c22 = arith.constant 22 : index
    %112 = memref.load %arg3[%c22] : memref<321xf32, #tpu.memory_space<smem>>
    %113 = vector.broadcast %112 : f32 to vector<8x128xf32>
    %114 = arith.mulf %113, %12 : vector<8x128xf32>
    %115 = arith.addf %111, %114 : vector<8x128xf32>
    %c23 = arith.constant 23 : index
    %116 = memref.load %arg3[%c23] : memref<321xf32, #tpu.memory_space<smem>>
    %117 = vector.broadcast %116 : f32 to vector<8x128xf32>
    %118 = arith.mulf %117, %15 : vector<8x128xf32>
    %119 = arith.addf %115, %118 : vector<8x128xf32>
    %c24 = arith.constant 24 : index
    %120 = memref.load %arg3[%c24] : memref<321xf32, #tpu.memory_space<smem>>
    %121 = vector.broadcast %120 : f32 to vector<8x128xf32>
    %122 = arith.mulf %121, %1 : vector<8x128xf32>
    %123 = arith.addf %119, %122 : vector<8x128xf32>
    %c25 = arith.constant 25 : index
    %124 = memref.load %arg3[%c25] : memref<321xf32, #tpu.memory_space<smem>>
    %125 = vector.broadcast %124 : f32 to vector<8x128xf32>
    %126 = arith.mulf %125, %18 : vector<8x128xf32>
    %127 = arith.addf %123, %126 : vector<8x128xf32>
    %cst_15 = arith.constant 0.000000e+00 : f32
    %128 = vector.broadcast %cst_15 : f32 to vector<8x128xf32>
    %129 = arith.maximumf %127, %128 : vector<8x128xf32>
    %c27 = arith.constant 27 : index
    %130 = memref.load %arg3[%c27] : memref<321xf32, #tpu.memory_space<smem>>
    %131 = vector.broadcast %130 : f32 to vector<8x128xf32>
    %132 = arith.mulf %131, %129 : vector<8x128xf32>
    %133 = arith.addf %93, %132 : vector<8x128xf32>
    %c28 = arith.constant 28 : index
    %134 = memref.load %arg3[%c28] : memref<321xf32, #tpu.memory_space<smem>>
    %135 = vector.broadcast %134 : f32 to vector<8x128xf32>
    %136 = arith.mulf %135, %129 : vector<8x128xf32>
    %137 = arith.addf %97, %136 : vector<8x128xf32>
    %c29 = arith.constant 29 : index
    %138 = memref.load %arg3[%c29] : memref<321xf32, #tpu.memory_space<smem>>
    %139 = vector.broadcast %138 : f32 to vector<8x128xf32>
    %140 = arith.mulf %139, %129 : vector<8x128xf32>
    %141 = arith.addf %101, %140 : vector<8x128xf32>
    %c36 = arith.constant 36 : index
    %142 = memref.load %arg3[%c36] : memref<321xf32, #tpu.memory_space<smem>>
    %c30 = arith.constant 30 : index
    %143 = memref.load %arg3[%c30] : memref<321xf32, #tpu.memory_space<smem>>
    %144 = vector.broadcast %143 : f32 to vector<8x128xf32>
    %145 = arith.mulf %144, %9 : vector<8x128xf32>
    %146 = vector.broadcast %142 : f32 to vector<8x128xf32>
    %147 = arith.addf %146, %145 : vector<8x128xf32>
    %c31 = arith.constant 31 : index
    %148 = memref.load %arg3[%c31] : memref<321xf32, #tpu.memory_space<smem>>
    %149 = vector.broadcast %148 : f32 to vector<8x128xf32>
    %150 = arith.mulf %149, %0 : vector<8x128xf32>
    %151 = arith.addf %147, %150 : vector<8x128xf32>
    %c32 = arith.constant 32 : index
    %152 = memref.load %arg3[%c32] : memref<321xf32, #tpu.memory_space<smem>>
    %153 = vector.broadcast %152 : f32 to vector<8x128xf32>
    %154 = arith.mulf %153, %12 : vector<8x128xf32>
    %155 = arith.addf %151, %154 : vector<8x128xf32>
    %c33 = arith.constant 33 : index
    %156 = memref.load %arg3[%c33] : memref<321xf32, #tpu.memory_space<smem>>
    %157 = vector.broadcast %156 : f32 to vector<8x128xf32>
    %158 = arith.mulf %157, %15 : vector<8x128xf32>
    %159 = arith.addf %155, %158 : vector<8x128xf32>
    %c34 = arith.constant 34 : index
    %160 = memref.load %arg3[%c34] : memref<321xf32, #tpu.memory_space<smem>>
    %161 = vector.broadcast %160 : f32 to vector<8x128xf32>
    %162 = arith.mulf %161, %1 : vector<8x128xf32>
    %163 = arith.addf %159, %162 : vector<8x128xf32>
    %c35 = arith.constant 35 : index
    %164 = memref.load %arg3[%c35] : memref<321xf32, #tpu.memory_space<smem>>
    %165 = vector.broadcast %164 : f32 to vector<8x128xf32>
    %166 = arith.mulf %165, %18 : vector<8x128xf32>
    %167 = arith.addf %163, %166 : vector<8x128xf32>
    %cst_16 = arith.constant 0.000000e+00 : f32
    %168 = vector.broadcast %cst_16 : f32 to vector<8x128xf32>
    %169 = arith.maximumf %167, %168 : vector<8x128xf32>
    %c37 = arith.constant 37 : index
    %170 = memref.load %arg3[%c37] : memref<321xf32, #tpu.memory_space<smem>>
    %171 = vector.broadcast %170 : f32 to vector<8x128xf32>
    %172 = arith.mulf %171, %169 : vector<8x128xf32>
    %173 = arith.addf %133, %172 : vector<8x128xf32>
    %c38 = arith.constant 38 : index
    %174 = memref.load %arg3[%c38] : memref<321xf32, #tpu.memory_space<smem>>
    %175 = vector.broadcast %174 : f32 to vector<8x128xf32>
    %176 = arith.mulf %175, %169 : vector<8x128xf32>
    %177 = arith.addf %137, %176 : vector<8x128xf32>
    %c39 = arith.constant 39 : index
    %178 = memref.load %arg3[%c39] : memref<321xf32, #tpu.memory_space<smem>>
    %179 = vector.broadcast %178 : f32 to vector<8x128xf32>
    %180 = arith.mulf %179, %169 : vector<8x128xf32>
    %181 = arith.addf %141, %180 : vector<8x128xf32>
    %c46 = arith.constant 46 : index
    %182 = memref.load %arg3[%c46] : memref<321xf32, #tpu.memory_space<smem>>
    %c40 = arith.constant 40 : index
    %183 = memref.load %arg3[%c40] : memref<321xf32, #tpu.memory_space<smem>>
    %184 = vector.broadcast %183 : f32 to vector<8x128xf32>
    %185 = arith.mulf %184, %9 : vector<8x128xf32>
    %186 = vector.broadcast %182 : f32 to vector<8x128xf32>
    %187 = arith.addf %186, %185 : vector<8x128xf32>
    %c41 = arith.constant 41 : index
    %188 = memref.load %arg3[%c41] : memref<321xf32, #tpu.memory_space<smem>>
    %189 = vector.broadcast %188 : f32 to vector<8x128xf32>
    %190 = arith.mulf %189, %0 : vector<8x128xf32>
    %191 = arith.addf %187, %190 : vector<8x128xf32>
    %c42 = arith.constant 42 : index
    %192 = memref.load %arg3[%c42] : memref<321xf32, #tpu.memory_space<smem>>
    %193 = vector.broadcast %192 : f32 to vector<8x128xf32>
    %194 = arith.mulf %193, %12 : vector<8x128xf32>
    %195 = arith.addf %191, %194 : vector<8x128xf32>
    %c43 = arith.constant 43 : index
    %196 = memref.load %arg3[%c43] : memref<321xf32, #tpu.memory_space<smem>>
    %197 = vector.broadcast %196 : f32 to vector<8x128xf32>
    %198 = arith.mulf %197, %15 : vector<8x128xf32>
    %199 = arith.addf %195, %198 : vector<8x128xf32>
    %c44 = arith.constant 44 : index
    %200 = memref.load %arg3[%c44] : memref<321xf32, #tpu.memory_space<smem>>
    %201 = vector.broadcast %200 : f32 to vector<8x128xf32>
    %202 = arith.mulf %201, %1 : vector<8x128xf32>
    %203 = arith.addf %199, %202 : vector<8x128xf32>
    %c45 = arith.constant 45 : index
    %204 = memref.load %arg3[%c45] : memref<321xf32, #tpu.memory_space<smem>>
    %205 = vector.broadcast %204 : f32 to vector<8x128xf32>
    %206 = arith.mulf %205, %18 : vector<8x128xf32>
    %207 = arith.addf %203, %206 : vector<8x128xf32>
    %cst_17 = arith.constant 0.000000e+00 : f32
    %208 = vector.broadcast %cst_17 : f32 to vector<8x128xf32>
    %209 = arith.maximumf %207, %208 : vector<8x128xf32>
    %c47 = arith.constant 47 : index
    %210 = memref.load %arg3[%c47] : memref<321xf32, #tpu.memory_space<smem>>
    %211 = vector.broadcast %210 : f32 to vector<8x128xf32>
    %212 = arith.mulf %211, %209 : vector<8x128xf32>
    %213 = arith.addf %173, %212 : vector<8x128xf32>
    %c48 = arith.constant 48 : index
    %214 = memref.load %arg3[%c48] : memref<321xf32, #tpu.memory_space<smem>>
    %215 = vector.broadcast %214 : f32 to vector<8x128xf32>
    %216 = arith.mulf %215, %209 : vector<8x128xf32>
    %217 = arith.addf %177, %216 : vector<8x128xf32>
    %c49 = arith.constant 49 : index
    %218 = memref.load %arg3[%c49] : memref<321xf32, #tpu.memory_space<smem>>
    %219 = vector.broadcast %218 : f32 to vector<8x128xf32>
    %220 = arith.mulf %219, %209 : vector<8x128xf32>
    %221 = arith.addf %181, %220 : vector<8x128xf32>
    %c56 = arith.constant 56 : index
    %222 = memref.load %arg3[%c56] : memref<321xf32, #tpu.memory_space<smem>>
    %c50 = arith.constant 50 : index
    %223 = memref.load %arg3[%c50] : memref<321xf32, #tpu.memory_space<smem>>
    %224 = vector.broadcast %223 : f32 to vector<8x128xf32>
    %225 = arith.mulf %224, %9 : vector<8x128xf32>
    %226 = vector.broadcast %222 : f32 to vector<8x128xf32>
    %227 = arith.addf %226, %225 : vector<8x128xf32>
    %c51 = arith.constant 51 : index
    %228 = memref.load %arg3[%c51] : memref<321xf32, #tpu.memory_space<smem>>
    %229 = vector.broadcast %228 : f32 to vector<8x128xf32>
    %230 = arith.mulf %229, %0 : vector<8x128xf32>
    %231 = arith.addf %227, %230 : vector<8x128xf32>
    %c52 = arith.constant 52 : index
    %232 = memref.load %arg3[%c52] : memref<321xf32, #tpu.memory_space<smem>>
    %233 = vector.broadcast %232 : f32 to vector<8x128xf32>
    %234 = arith.mulf %233, %12 : vector<8x128xf32>
    %235 = arith.addf %231, %234 : vector<8x128xf32>
    %c53 = arith.constant 53 : index
    %236 = memref.load %arg3[%c53] : memref<321xf32, #tpu.memory_space<smem>>
    %237 = vector.broadcast %236 : f32 to vector<8x128xf32>
    %238 = arith.mulf %237, %15 : vector<8x128xf32>
    %239 = arith.addf %235, %238 : vector<8x128xf32>
    %c54 = arith.constant 54 : index
    %240 = memref.load %arg3[%c54] : memref<321xf32, #tpu.memory_space<smem>>
    %241 = vector.broadcast %240 : f32 to vector<8x128xf32>
    %242 = arith.mulf %241, %1 : vector<8x128xf32>
    %243 = arith.addf %239, %242 : vector<8x128xf32>
    %c55 = arith.constant 55 : index
    %244 = memref.load %arg3[%c55] : memref<321xf32, #tpu.memory_space<smem>>
    %245 = vector.broadcast %244 : f32 to vector<8x128xf32>
    %246 = arith.mulf %245, %18 : vector<8x128xf32>
    %247 = arith.addf %243, %246 : vector<8x128xf32>
    %cst_18 = arith.constant 0.000000e+00 : f32
    %248 = vector.broadcast %cst_18 : f32 to vector<8x128xf32>
    %249 = arith.maximumf %247, %248 : vector<8x128xf32>
    %c57 = arith.constant 57 : index
    %250 = memref.load %arg3[%c57] : memref<321xf32, #tpu.memory_space<smem>>
    %251 = vector.broadcast %250 : f32 to vector<8x128xf32>
    %252 = arith.mulf %251, %249 : vector<8x128xf32>
    %253 = arith.addf %213, %252 : vector<8x128xf32>
    %c58 = arith.constant 58 : index
    %254 = memref.load %arg3[%c58] : memref<321xf32, #tpu.memory_space<smem>>
    %255 = vector.broadcast %254 : f32 to vector<8x128xf32>
    %256 = arith.mulf %255, %249 : vector<8x128xf32>
    %257 = arith.addf %217, %256 : vector<8x128xf32>
    %c59 = arith.constant 59 : index
    %258 = memref.load %arg3[%c59] : memref<321xf32, #tpu.memory_space<smem>>
    %259 = vector.broadcast %258 : f32 to vector<8x128xf32>
    %260 = arith.mulf %259, %249 : vector<8x128xf32>
    %261 = arith.addf %221, %260 : vector<8x128xf32>
    %c66 = arith.constant 66 : index
    %262 = memref.load %arg3[%c66] : memref<321xf32, #tpu.memory_space<smem>>
    %c60 = arith.constant 60 : index
    %263 = memref.load %arg3[%c60] : memref<321xf32, #tpu.memory_space<smem>>
    %264 = vector.broadcast %263 : f32 to vector<8x128xf32>
    %265 = arith.mulf %264, %9 : vector<8x128xf32>
    %266 = vector.broadcast %262 : f32 to vector<8x128xf32>
    %267 = arith.addf %266, %265 : vector<8x128xf32>
    %c61 = arith.constant 61 : index
    %268 = memref.load %arg3[%c61] : memref<321xf32, #tpu.memory_space<smem>>
    %269 = vector.broadcast %268 : f32 to vector<8x128xf32>
    %270 = arith.mulf %269, %0 : vector<8x128xf32>
    %271 = arith.addf %267, %270 : vector<8x128xf32>
    %c62 = arith.constant 62 : index
    %272 = memref.load %arg3[%c62] : memref<321xf32, #tpu.memory_space<smem>>
    %273 = vector.broadcast %272 : f32 to vector<8x128xf32>
    %274 = arith.mulf %273, %12 : vector<8x128xf32>
    %275 = arith.addf %271, %274 : vector<8x128xf32>
    %c63 = arith.constant 63 : index
    %276 = memref.load %arg3[%c63] : memref<321xf32, #tpu.memory_space<smem>>
    %277 = vector.broadcast %276 : f32 to vector<8x128xf32>
    %278 = arith.mulf %277, %15 : vector<8x128xf32>
    %279 = arith.addf %275, %278 : vector<8x128xf32>
    %c64 = arith.constant 64 : index
    %280 = memref.load %arg3[%c64] : memref<321xf32, #tpu.memory_space<smem>>
    %281 = vector.broadcast %280 : f32 to vector<8x128xf32>
    %282 = arith.mulf %281, %1 : vector<8x128xf32>
    %283 = arith.addf %279, %282 : vector<8x128xf32>
    %c65 = arith.constant 65 : index
    %284 = memref.load %arg3[%c65] : memref<321xf32, #tpu.memory_space<smem>>
    %285 = vector.broadcast %284 : f32 to vector<8x128xf32>
    %286 = arith.mulf %285, %18 : vector<8x128xf32>
    %287 = arith.addf %283, %286 : vector<8x128xf32>
    %cst_19 = arith.constant 0.000000e+00 : f32
    %288 = vector.broadcast %cst_19 : f32 to vector<8x128xf32>
    %289 = arith.maximumf %287, %288 : vector<8x128xf32>
    %c67 = arith.constant 67 : index
    %290 = memref.load %arg3[%c67] : memref<321xf32, #tpu.memory_space<smem>>
    %291 = vector.broadcast %290 : f32 to vector<8x128xf32>
    %292 = arith.mulf %291, %289 : vector<8x128xf32>
    %293 = arith.addf %253, %292 : vector<8x128xf32>
    %c68 = arith.constant 68 : index
    %294 = memref.load %arg3[%c68] : memref<321xf32, #tpu.memory_space<smem>>
    %295 = vector.broadcast %294 : f32 to vector<8x128xf32>
    %296 = arith.mulf %295, %289 : vector<8x128xf32>
    %297 = arith.addf %257, %296 : vector<8x128xf32>
    %c69 = arith.constant 69 : index
    %298 = memref.load %arg3[%c69] : memref<321xf32, #tpu.memory_space<smem>>
    %299 = vector.broadcast %298 : f32 to vector<8x128xf32>
    %300 = arith.mulf %299, %289 : vector<8x128xf32>
    %301 = arith.addf %261, %300 : vector<8x128xf32>
    %c76 = arith.constant 76 : index
    %302 = memref.load %arg3[%c76] : memref<321xf32, #tpu.memory_space<smem>>
    %c70 = arith.constant 70 : index
    %303 = memref.load %arg3[%c70] : memref<321xf32, #tpu.memory_space<smem>>
    %304 = vector.broadcast %303 : f32 to vector<8x128xf32>
    %305 = arith.mulf %304, %9 : vector<8x128xf32>
    %306 = vector.broadcast %302 : f32 to vector<8x128xf32>
    %307 = arith.addf %306, %305 : vector<8x128xf32>
    %c71 = arith.constant 71 : index
    %308 = memref.load %arg3[%c71] : memref<321xf32, #tpu.memory_space<smem>>
    %309 = vector.broadcast %308 : f32 to vector<8x128xf32>
    %310 = arith.mulf %309, %0 : vector<8x128xf32>
    %311 = arith.addf %307, %310 : vector<8x128xf32>
    %c72 = arith.constant 72 : index
    %312 = memref.load %arg3[%c72] : memref<321xf32, #tpu.memory_space<smem>>
    %313 = vector.broadcast %312 : f32 to vector<8x128xf32>
    %314 = arith.mulf %313, %12 : vector<8x128xf32>
    %315 = arith.addf %311, %314 : vector<8x128xf32>
    %c73 = arith.constant 73 : index
    %316 = memref.load %arg3[%c73] : memref<321xf32, #tpu.memory_space<smem>>
    %317 = vector.broadcast %316 : f32 to vector<8x128xf32>
    %318 = arith.mulf %317, %15 : vector<8x128xf32>
    %319 = arith.addf %315, %318 : vector<8x128xf32>
    %c74 = arith.constant 74 : index
    %320 = memref.load %arg3[%c74] : memref<321xf32, #tpu.memory_space<smem>>
    %321 = vector.broadcast %320 : f32 to vector<8x128xf32>
    %322 = arith.mulf %321, %1 : vector<8x128xf32>
    %323 = arith.addf %319, %322 : vector<8x128xf32>
    %c75 = arith.constant 75 : index
    %324 = memref.load %arg3[%c75] : memref<321xf32, #tpu.memory_space<smem>>
    %325 = vector.broadcast %324 : f32 to vector<8x128xf32>
    %326 = arith.mulf %325, %18 : vector<8x128xf32>
    %327 = arith.addf %323, %326 : vector<8x128xf32>
    %cst_20 = arith.constant 0.000000e+00 : f32
    %328 = vector.broadcast %cst_20 : f32 to vector<8x128xf32>
    %329 = arith.maximumf %327, %328 : vector<8x128xf32>
    %c77 = arith.constant 77 : index
    %330 = memref.load %arg3[%c77] : memref<321xf32, #tpu.memory_space<smem>>
    %331 = vector.broadcast %330 : f32 to vector<8x128xf32>
    %332 = arith.mulf %331, %329 : vector<8x128xf32>
    %333 = arith.addf %293, %332 : vector<8x128xf32>
    %c78 = arith.constant 78 : index
    %334 = memref.load %arg3[%c78] : memref<321xf32, #tpu.memory_space<smem>>
    %335 = vector.broadcast %334 : f32 to vector<8x128xf32>
    %336 = arith.mulf %335, %329 : vector<8x128xf32>
    %337 = arith.addf %297, %336 : vector<8x128xf32>
    %c79 = arith.constant 79 : index
    %338 = memref.load %arg3[%c79] : memref<321xf32, #tpu.memory_space<smem>>
    %339 = vector.broadcast %338 : f32 to vector<8x128xf32>
    %340 = arith.mulf %339, %329 : vector<8x128xf32>
    %341 = arith.addf %301, %340 : vector<8x128xf32>
    %c86 = arith.constant 86 : index
    %342 = memref.load %arg3[%c86] : memref<321xf32, #tpu.memory_space<smem>>
    %c80 = arith.constant 80 : index
    %343 = memref.load %arg3[%c80] : memref<321xf32, #tpu.memory_space<smem>>
    %344 = vector.broadcast %343 : f32 to vector<8x128xf32>
    %345 = arith.mulf %344, %9 : vector<8x128xf32>
    %346 = vector.broadcast %342 : f32 to vector<8x128xf32>
    %347 = arith.addf %346, %345 : vector<8x128xf32>
    %c81 = arith.constant 81 : index
    %348 = memref.load %arg3[%c81] : memref<321xf32, #tpu.memory_space<smem>>
    %349 = vector.broadcast %348 : f32 to vector<8x128xf32>
    %350 = arith.mulf %349, %0 : vector<8x128xf32>
    %351 = arith.addf %347, %350 : vector<8x128xf32>
    %c82 = arith.constant 82 : index
    %352 = memref.load %arg3[%c82] : memref<321xf32, #tpu.memory_space<smem>>
    %353 = vector.broadcast %352 : f32 to vector<8x128xf32>
    %354 = arith.mulf %353, %12 : vector<8x128xf32>
    %355 = arith.addf %351, %354 : vector<8x128xf32>
    %c83 = arith.constant 83 : index
    %356 = memref.load %arg3[%c83] : memref<321xf32, #tpu.memory_space<smem>>
    %357 = vector.broadcast %356 : f32 to vector<8x128xf32>
    %358 = arith.mulf %357, %15 : vector<8x128xf32>
    %359 = arith.addf %355, %358 : vector<8x128xf32>
    %c84 = arith.constant 84 : index
    %360 = memref.load %arg3[%c84] : memref<321xf32, #tpu.memory_space<smem>>
    %361 = vector.broadcast %360 : f32 to vector<8x128xf32>
    %362 = arith.mulf %361, %1 : vector<8x128xf32>
    %363 = arith.addf %359, %362 : vector<8x128xf32>
    %c85 = arith.constant 85 : index
    %364 = memref.load %arg3[%c85] : memref<321xf32, #tpu.memory_space<smem>>
    %365 = vector.broadcast %364 : f32 to vector<8x128xf32>
    %366 = arith.mulf %365, %18 : vector<8x128xf32>
    %367 = arith.addf %363, %366 : vector<8x128xf32>
    %cst_21 = arith.constant 0.000000e+00 : f32
    %368 = vector.broadcast %cst_21 : f32 to vector<8x128xf32>
    %369 = arith.maximumf %367, %368 : vector<8x128xf32>
    %c87 = arith.constant 87 : index
    %370 = memref.load %arg3[%c87] : memref<321xf32, #tpu.memory_space<smem>>
    %371 = vector.broadcast %370 : f32 to vector<8x128xf32>
    %372 = arith.mulf %371, %369 : vector<8x128xf32>
    %373 = arith.addf %333, %372 : vector<8x128xf32>
    %c88 = arith.constant 88 : index
    %374 = memref.load %arg3[%c88] : memref<321xf32, #tpu.memory_space<smem>>
    %375 = vector.broadcast %374 : f32 to vector<8x128xf32>
    %376 = arith.mulf %375, %369 : vector<8x128xf32>
    %377 = arith.addf %337, %376 : vector<8x128xf32>
    %c89 = arith.constant 89 : index
    %378 = memref.load %arg3[%c89] : memref<321xf32, #tpu.memory_space<smem>>
    %379 = vector.broadcast %378 : f32 to vector<8x128xf32>
    %380 = arith.mulf %379, %369 : vector<8x128xf32>
    %381 = arith.addf %341, %380 : vector<8x128xf32>
    %c96 = arith.constant 96 : index
    %382 = memref.load %arg3[%c96] : memref<321xf32, #tpu.memory_space<smem>>
    %c90 = arith.constant 90 : index
    %383 = memref.load %arg3[%c90] : memref<321xf32, #tpu.memory_space<smem>>
    %384 = vector.broadcast %383 : f32 to vector<8x128xf32>
    %385 = arith.mulf %384, %9 : vector<8x128xf32>
    %386 = vector.broadcast %382 : f32 to vector<8x128xf32>
    %387 = arith.addf %386, %385 : vector<8x128xf32>
    %c91 = arith.constant 91 : index
    %388 = memref.load %arg3[%c91] : memref<321xf32, #tpu.memory_space<smem>>
    %389 = vector.broadcast %388 : f32 to vector<8x128xf32>
    %390 = arith.mulf %389, %0 : vector<8x128xf32>
    %391 = arith.addf %387, %390 : vector<8x128xf32>
    %c92 = arith.constant 92 : index
    %392 = memref.load %arg3[%c92] : memref<321xf32, #tpu.memory_space<smem>>
    %393 = vector.broadcast %392 : f32 to vector<8x128xf32>
    %394 = arith.mulf %393, %12 : vector<8x128xf32>
    %395 = arith.addf %391, %394 : vector<8x128xf32>
    %c93 = arith.constant 93 : index
    %396 = memref.load %arg3[%c93] : memref<321xf32, #tpu.memory_space<smem>>
    %397 = vector.broadcast %396 : f32 to vector<8x128xf32>
    %398 = arith.mulf %397, %15 : vector<8x128xf32>
    %399 = arith.addf %395, %398 : vector<8x128xf32>
    %c94 = arith.constant 94 : index
    %400 = memref.load %arg3[%c94] : memref<321xf32, #tpu.memory_space<smem>>
    %401 = vector.broadcast %400 : f32 to vector<8x128xf32>
    %402 = arith.mulf %401, %1 : vector<8x128xf32>
    %403 = arith.addf %399, %402 : vector<8x128xf32>
    %c95 = arith.constant 95 : index
    %404 = memref.load %arg3[%c95] : memref<321xf32, #tpu.memory_space<smem>>
    %405 = vector.broadcast %404 : f32 to vector<8x128xf32>
    %406 = arith.mulf %405, %18 : vector<8x128xf32>
    %407 = arith.addf %403, %406 : vector<8x128xf32>
    %cst_22 = arith.constant 0.000000e+00 : f32
    %408 = vector.broadcast %cst_22 : f32 to vector<8x128xf32>
    %409 = arith.maximumf %407, %408 : vector<8x128xf32>
    %c97 = arith.constant 97 : index
    %410 = memref.load %arg3[%c97] : memref<321xf32, #tpu.memory_space<smem>>
    %411 = vector.broadcast %410 : f32 to vector<8x128xf32>
    %412 = arith.mulf %411, %409 : vector<8x128xf32>
    %413 = arith.addf %373, %412 : vector<8x128xf32>
    %c98 = arith.constant 98 : index
    %414 = memref.load %arg3[%c98] : memref<321xf32, #tpu.memory_space<smem>>
    %415 = vector.broadcast %414 : f32 to vector<8x128xf32>
    %416 = arith.mulf %415, %409 : vector<8x128xf32>
    %417 = arith.addf %377, %416 : vector<8x128xf32>
    %c99 = arith.constant 99 : index
    %418 = memref.load %arg3[%c99] : memref<321xf32, #tpu.memory_space<smem>>
    %419 = vector.broadcast %418 : f32 to vector<8x128xf32>
    %420 = arith.mulf %419, %409 : vector<8x128xf32>
    %421 = arith.addf %381, %420 : vector<8x128xf32>
    %c106 = arith.constant 106 : index
    %422 = memref.load %arg3[%c106] : memref<321xf32, #tpu.memory_space<smem>>
    %c100 = arith.constant 100 : index
    %423 = memref.load %arg3[%c100] : memref<321xf32, #tpu.memory_space<smem>>
    %424 = vector.broadcast %423 : f32 to vector<8x128xf32>
    %425 = arith.mulf %424, %9 : vector<8x128xf32>
    %426 = vector.broadcast %422 : f32 to vector<8x128xf32>
    %427 = arith.addf %426, %425 : vector<8x128xf32>
    %c101 = arith.constant 101 : index
    %428 = memref.load %arg3[%c101] : memref<321xf32, #tpu.memory_space<smem>>
    %429 = vector.broadcast %428 : f32 to vector<8x128xf32>
    %430 = arith.mulf %429, %0 : vector<8x128xf32>
    %431 = arith.addf %427, %430 : vector<8x128xf32>
    %c102 = arith.constant 102 : index
    %432 = memref.load %arg3[%c102] : memref<321xf32, #tpu.memory_space<smem>>
    %433 = vector.broadcast %432 : f32 to vector<8x128xf32>
    %434 = arith.mulf %433, %12 : vector<8x128xf32>
    %435 = arith.addf %431, %434 : vector<8x128xf32>
    %c103 = arith.constant 103 : index
    %436 = memref.load %arg3[%c103] : memref<321xf32, #tpu.memory_space<smem>>
    %437 = vector.broadcast %436 : f32 to vector<8x128xf32>
    %438 = arith.mulf %437, %15 : vector<8x128xf32>
    %439 = arith.addf %435, %438 : vector<8x128xf32>
    %c104 = arith.constant 104 : index
    %440 = memref.load %arg3[%c104] : memref<321xf32, #tpu.memory_space<smem>>
    %441 = vector.broadcast %440 : f32 to vector<8x128xf32>
    %442 = arith.mulf %441, %1 : vector<8x128xf32>
    %443 = arith.addf %439, %442 : vector<8x128xf32>
    %c105 = arith.constant 105 : index
    %444 = memref.load %arg3[%c105] : memref<321xf32, #tpu.memory_space<smem>>
    %445 = vector.broadcast %444 : f32 to vector<8x128xf32>
    %446 = arith.mulf %445, %18 : vector<8x128xf32>
    %447 = arith.addf %443, %446 : vector<8x128xf32>
    %cst_23 = arith.constant 0.000000e+00 : f32
    %448 = vector.broadcast %cst_23 : f32 to vector<8x128xf32>
    %449 = arith.maximumf %447, %448 : vector<8x128xf32>
    %c107 = arith.constant 107 : index
    %450 = memref.load %arg3[%c107] : memref<321xf32, #tpu.memory_space<smem>>
    %451 = vector.broadcast %450 : f32 to vector<8x128xf32>
    %452 = arith.mulf %451, %449 : vector<8x128xf32>
    %453 = arith.addf %413, %452 : vector<8x128xf32>
    %c108 = arith.constant 108 : index
    %454 = memref.load %arg3[%c108] : memref<321xf32, #tpu.memory_space<smem>>
    %455 = vector.broadcast %454 : f32 to vector<8x128xf32>
    %456 = arith.mulf %455, %449 : vector<8x128xf32>
    %457 = arith.addf %417, %456 : vector<8x128xf32>
    %c109 = arith.constant 109 : index
    %458 = memref.load %arg3[%c109] : memref<321xf32, #tpu.memory_space<smem>>
    %459 = vector.broadcast %458 : f32 to vector<8x128xf32>
    %460 = arith.mulf %459, %449 : vector<8x128xf32>
    %461 = arith.addf %421, %460 : vector<8x128xf32>
    %c116 = arith.constant 116 : index
    %462 = memref.load %arg3[%c116] : memref<321xf32, #tpu.memory_space<smem>>
    %c110 = arith.constant 110 : index
    %463 = memref.load %arg3[%c110] : memref<321xf32, #tpu.memory_space<smem>>
    %464 = vector.broadcast %463 : f32 to vector<8x128xf32>
    %465 = arith.mulf %464, %9 : vector<8x128xf32>
    %466 = vector.broadcast %462 : f32 to vector<8x128xf32>
    %467 = arith.addf %466, %465 : vector<8x128xf32>
    %c111 = arith.constant 111 : index
    %468 = memref.load %arg3[%c111] : memref<321xf32, #tpu.memory_space<smem>>
    %469 = vector.broadcast %468 : f32 to vector<8x128xf32>
    %470 = arith.mulf %469, %0 : vector<8x128xf32>
    %471 = arith.addf %467, %470 : vector<8x128xf32>
    %c112 = arith.constant 112 : index
    %472 = memref.load %arg3[%c112] : memref<321xf32, #tpu.memory_space<smem>>
    %473 = vector.broadcast %472 : f32 to vector<8x128xf32>
    %474 = arith.mulf %473, %12 : vector<8x128xf32>
    %475 = arith.addf %471, %474 : vector<8x128xf32>
    %c113 = arith.constant 113 : index
    %476 = memref.load %arg3[%c113] : memref<321xf32, #tpu.memory_space<smem>>
    %477 = vector.broadcast %476 : f32 to vector<8x128xf32>
    %478 = arith.mulf %477, %15 : vector<8x128xf32>
    %479 = arith.addf %475, %478 : vector<8x128xf32>
    %c114 = arith.constant 114 : index
    %480 = memref.load %arg3[%c114] : memref<321xf32, #tpu.memory_space<smem>>
    %481 = vector.broadcast %480 : f32 to vector<8x128xf32>
    %482 = arith.mulf %481, %1 : vector<8x128xf32>
    %483 = arith.addf %479, %482 : vector<8x128xf32>
    %c115 = arith.constant 115 : index
    %484 = memref.load %arg3[%c115] : memref<321xf32, #tpu.memory_space<smem>>
    %485 = vector.broadcast %484 : f32 to vector<8x128xf32>
    %486 = arith.mulf %485, %18 : vector<8x128xf32>
    %487 = arith.addf %483, %486 : vector<8x128xf32>
    %cst_24 = arith.constant 0.000000e+00 : f32
    %488 = vector.broadcast %cst_24 : f32 to vector<8x128xf32>
    %489 = arith.maximumf %487, %488 : vector<8x128xf32>
    %c117 = arith.constant 117 : index
    %490 = memref.load %arg3[%c117] : memref<321xf32, #tpu.memory_space<smem>>
    %491 = vector.broadcast %490 : f32 to vector<8x128xf32>
    %492 = arith.mulf %491, %489 : vector<8x128xf32>
    %493 = arith.addf %453, %492 : vector<8x128xf32>
    %c118 = arith.constant 118 : index
    %494 = memref.load %arg3[%c118] : memref<321xf32, #tpu.memory_space<smem>>
    %495 = vector.broadcast %494 : f32 to vector<8x128xf32>
    %496 = arith.mulf %495, %489 : vector<8x128xf32>
    %497 = arith.addf %457, %496 : vector<8x128xf32>
    %c119 = arith.constant 119 : index
    %498 = memref.load %arg3[%c119] : memref<321xf32, #tpu.memory_space<smem>>
    %499 = vector.broadcast %498 : f32 to vector<8x128xf32>
    %500 = arith.mulf %499, %489 : vector<8x128xf32>
    %501 = arith.addf %461, %500 : vector<8x128xf32>
    %c126 = arith.constant 126 : index
    %502 = memref.load %arg3[%c126] : memref<321xf32, #tpu.memory_space<smem>>
    %c120 = arith.constant 120 : index
    %503 = memref.load %arg3[%c120] : memref<321xf32, #tpu.memory_space<smem>>
    %504 = vector.broadcast %503 : f32 to vector<8x128xf32>
    %505 = arith.mulf %504, %9 : vector<8x128xf32>
    %506 = vector.broadcast %502 : f32 to vector<8x128xf32>
    %507 = arith.addf %506, %505 : vector<8x128xf32>
    %c121 = arith.constant 121 : index
    %508 = memref.load %arg3[%c121] : memref<321xf32, #tpu.memory_space<smem>>
    %509 = vector.broadcast %508 : f32 to vector<8x128xf32>
    %510 = arith.mulf %509, %0 : vector<8x128xf32>
    %511 = arith.addf %507, %510 : vector<8x128xf32>
    %c122 = arith.constant 122 : index
    %512 = memref.load %arg3[%c122] : memref<321xf32, #tpu.memory_space<smem>>
    %513 = vector.broadcast %512 : f32 to vector<8x128xf32>
    %514 = arith.mulf %513, %12 : vector<8x128xf32>
    %515 = arith.addf %511, %514 : vector<8x128xf32>
    %c123 = arith.constant 123 : index
    %516 = memref.load %arg3[%c123] : memref<321xf32, #tpu.memory_space<smem>>
    %517 = vector.broadcast %516 : f32 to vector<8x128xf32>
    %518 = arith.mulf %517, %15 : vector<8x128xf32>
    %519 = arith.addf %515, %518 : vector<8x128xf32>
    %c124 = arith.constant 124 : index
    %520 = memref.load %arg3[%c124] : memref<321xf32, #tpu.memory_space<smem>>
    %521 = vector.broadcast %520 : f32 to vector<8x128xf32>
    %522 = arith.mulf %521, %1 : vector<8x128xf32>
    %523 = arith.addf %519, %522 : vector<8x128xf32>
    %c125 = arith.constant 125 : index
    %524 = memref.load %arg3[%c125] : memref<321xf32, #tpu.memory_space<smem>>
    %525 = vector.broadcast %524 : f32 to vector<8x128xf32>
    %526 = arith.mulf %525, %18 : vector<8x128xf32>
    %527 = arith.addf %523, %526 : vector<8x128xf32>
    %cst_25 = arith.constant 0.000000e+00 : f32
    %528 = vector.broadcast %cst_25 : f32 to vector<8x128xf32>
    %529 = arith.maximumf %527, %528 : vector<8x128xf32>
    %c127 = arith.constant 127 : index
    %530 = memref.load %arg3[%c127] : memref<321xf32, #tpu.memory_space<smem>>
    %531 = vector.broadcast %530 : f32 to vector<8x128xf32>
    %532 = arith.mulf %531, %529 : vector<8x128xf32>
    %533 = arith.addf %493, %532 : vector<8x128xf32>
    %c128 = arith.constant 128 : index
    %534 = memref.load %arg3[%c128] : memref<321xf32, #tpu.memory_space<smem>>
    %535 = vector.broadcast %534 : f32 to vector<8x128xf32>
    %536 = arith.mulf %535, %529 : vector<8x128xf32>
    %537 = arith.addf %497, %536 : vector<8x128xf32>
    %c129 = arith.constant 129 : index
    %538 = memref.load %arg3[%c129] : memref<321xf32, #tpu.memory_space<smem>>
    %539 = vector.broadcast %538 : f32 to vector<8x128xf32>
    %540 = arith.mulf %539, %529 : vector<8x128xf32>
    %541 = arith.addf %501, %540 : vector<8x128xf32>
    %c136 = arith.constant 136 : index
    %542 = memref.load %arg3[%c136] : memref<321xf32, #tpu.memory_space<smem>>
    %c130 = arith.constant 130 : index
    %543 = memref.load %arg3[%c130] : memref<321xf32, #tpu.memory_space<smem>>
    %544 = vector.broadcast %543 : f32 to vector<8x128xf32>
    %545 = arith.mulf %544, %9 : vector<8x128xf32>
    %546 = vector.broadcast %542 : f32 to vector<8x128xf32>
    %547 = arith.addf %546, %545 : vector<8x128xf32>
    %c131 = arith.constant 131 : index
    %548 = memref.load %arg3[%c131] : memref<321xf32, #tpu.memory_space<smem>>
    %549 = vector.broadcast %548 : f32 to vector<8x128xf32>
    %550 = arith.mulf %549, %0 : vector<8x128xf32>
    %551 = arith.addf %547, %550 : vector<8x128xf32>
    %c132 = arith.constant 132 : index
    %552 = memref.load %arg3[%c132] : memref<321xf32, #tpu.memory_space<smem>>
    %553 = vector.broadcast %552 : f32 to vector<8x128xf32>
    %554 = arith.mulf %553, %12 : vector<8x128xf32>
    %555 = arith.addf %551, %554 : vector<8x128xf32>
    %c133 = arith.constant 133 : index
    %556 = memref.load %arg3[%c133] : memref<321xf32, #tpu.memory_space<smem>>
    %557 = vector.broadcast %556 : f32 to vector<8x128xf32>
    %558 = arith.mulf %557, %15 : vector<8x128xf32>
    %559 = arith.addf %555, %558 : vector<8x128xf32>
    %c134 = arith.constant 134 : index
    %560 = memref.load %arg3[%c134] : memref<321xf32, #tpu.memory_space<smem>>
    %561 = vector.broadcast %560 : f32 to vector<8x128xf32>
    %562 = arith.mulf %561, %1 : vector<8x128xf32>
    %563 = arith.addf %559, %562 : vector<8x128xf32>
    %c135 = arith.constant 135 : index
    %564 = memref.load %arg3[%c135] : memref<321xf32, #tpu.memory_space<smem>>
    %565 = vector.broadcast %564 : f32 to vector<8x128xf32>
    %566 = arith.mulf %565, %18 : vector<8x128xf32>
    %567 = arith.addf %563, %566 : vector<8x128xf32>
    %cst_26 = arith.constant 0.000000e+00 : f32
    %568 = vector.broadcast %cst_26 : f32 to vector<8x128xf32>
    %569 = arith.maximumf %567, %568 : vector<8x128xf32>
    %c137 = arith.constant 137 : index
    %570 = memref.load %arg3[%c137] : memref<321xf32, #tpu.memory_space<smem>>
    %571 = vector.broadcast %570 : f32 to vector<8x128xf32>
    %572 = arith.mulf %571, %569 : vector<8x128xf32>
    %573 = arith.addf %533, %572 : vector<8x128xf32>
    %c138 = arith.constant 138 : index
    %574 = memref.load %arg3[%c138] : memref<321xf32, #tpu.memory_space<smem>>
    %575 = vector.broadcast %574 : f32 to vector<8x128xf32>
    %576 = arith.mulf %575, %569 : vector<8x128xf32>
    %577 = arith.addf %537, %576 : vector<8x128xf32>
    %c139 = arith.constant 139 : index
    %578 = memref.load %arg3[%c139] : memref<321xf32, #tpu.memory_space<smem>>
    %579 = vector.broadcast %578 : f32 to vector<8x128xf32>
    %580 = arith.mulf %579, %569 : vector<8x128xf32>
    %581 = arith.addf %541, %580 : vector<8x128xf32>
    %c146 = arith.constant 146 : index
    %582 = memref.load %arg3[%c146] : memref<321xf32, #tpu.memory_space<smem>>
    %c140 = arith.constant 140 : index
    %583 = memref.load %arg3[%c140] : memref<321xf32, #tpu.memory_space<smem>>
    %584 = vector.broadcast %583 : f32 to vector<8x128xf32>
    %585 = arith.mulf %584, %9 : vector<8x128xf32>
    %586 = vector.broadcast %582 : f32 to vector<8x128xf32>
    %587 = arith.addf %586, %585 : vector<8x128xf32>
    %c141 = arith.constant 141 : index
    %588 = memref.load %arg3[%c141] : memref<321xf32, #tpu.memory_space<smem>>
    %589 = vector.broadcast %588 : f32 to vector<8x128xf32>
    %590 = arith.mulf %589, %0 : vector<8x128xf32>
    %591 = arith.addf %587, %590 : vector<8x128xf32>
    %c142 = arith.constant 142 : index
    %592 = memref.load %arg3[%c142] : memref<321xf32, #tpu.memory_space<smem>>
    %593 = vector.broadcast %592 : f32 to vector<8x128xf32>
    %594 = arith.mulf %593, %12 : vector<8x128xf32>
    %595 = arith.addf %591, %594 : vector<8x128xf32>
    %c143 = arith.constant 143 : index
    %596 = memref.load %arg3[%c143] : memref<321xf32, #tpu.memory_space<smem>>
    %597 = vector.broadcast %596 : f32 to vector<8x128xf32>
    %598 = arith.mulf %597, %15 : vector<8x128xf32>
    %599 = arith.addf %595, %598 : vector<8x128xf32>
    %c144 = arith.constant 144 : index
    %600 = memref.load %arg3[%c144] : memref<321xf32, #tpu.memory_space<smem>>
    %601 = vector.broadcast %600 : f32 to vector<8x128xf32>
    %602 = arith.mulf %601, %1 : vector<8x128xf32>
    %603 = arith.addf %599, %602 : vector<8x128xf32>
    %c145 = arith.constant 145 : index
    %604 = memref.load %arg3[%c145] : memref<321xf32, #tpu.memory_space<smem>>
    %605 = vector.broadcast %604 : f32 to vector<8x128xf32>
    %606 = arith.mulf %605, %18 : vector<8x128xf32>
    %607 = arith.addf %603, %606 : vector<8x128xf32>
    %cst_27 = arith.constant 0.000000e+00 : f32
    %608 = vector.broadcast %cst_27 : f32 to vector<8x128xf32>
    %609 = arith.maximumf %607, %608 : vector<8x128xf32>
    %c147 = arith.constant 147 : index
    %610 = memref.load %arg3[%c147] : memref<321xf32, #tpu.memory_space<smem>>
    %611 = vector.broadcast %610 : f32 to vector<8x128xf32>
    %612 = arith.mulf %611, %609 : vector<8x128xf32>
    %613 = arith.addf %573, %612 : vector<8x128xf32>
    %c148 = arith.constant 148 : index
    %614 = memref.load %arg3[%c148] : memref<321xf32, #tpu.memory_space<smem>>
    %615 = vector.broadcast %614 : f32 to vector<8x128xf32>
    %616 = arith.mulf %615, %609 : vector<8x128xf32>
    %617 = arith.addf %577, %616 : vector<8x128xf32>
    %c149 = arith.constant 149 : index
    %618 = memref.load %arg3[%c149] : memref<321xf32, #tpu.memory_space<smem>>
    %619 = vector.broadcast %618 : f32 to vector<8x128xf32>
    %620 = arith.mulf %619, %609 : vector<8x128xf32>
    %621 = arith.addf %581, %620 : vector<8x128xf32>
    %c156 = arith.constant 156 : index
    %622 = memref.load %arg3[%c156] : memref<321xf32, #tpu.memory_space<smem>>
    %c150 = arith.constant 150 : index
    %623 = memref.load %arg3[%c150] : memref<321xf32, #tpu.memory_space<smem>>
    %624 = vector.broadcast %623 : f32 to vector<8x128xf32>
    %625 = arith.mulf %624, %9 : vector<8x128xf32>
    %626 = vector.broadcast %622 : f32 to vector<8x128xf32>
    %627 = arith.addf %626, %625 : vector<8x128xf32>
    %c151 = arith.constant 151 : index
    %628 = memref.load %arg3[%c151] : memref<321xf32, #tpu.memory_space<smem>>
    %629 = vector.broadcast %628 : f32 to vector<8x128xf32>
    %630 = arith.mulf %629, %0 : vector<8x128xf32>
    %631 = arith.addf %627, %630 : vector<8x128xf32>
    %c152 = arith.constant 152 : index
    %632 = memref.load %arg3[%c152] : memref<321xf32, #tpu.memory_space<smem>>
    %633 = vector.broadcast %632 : f32 to vector<8x128xf32>
    %634 = arith.mulf %633, %12 : vector<8x128xf32>
    %635 = arith.addf %631, %634 : vector<8x128xf32>
    %c153 = arith.constant 153 : index
    %636 = memref.load %arg3[%c153] : memref<321xf32, #tpu.memory_space<smem>>
    %637 = vector.broadcast %636 : f32 to vector<8x128xf32>
    %638 = arith.mulf %637, %15 : vector<8x128xf32>
    %639 = arith.addf %635, %638 : vector<8x128xf32>
    %c154 = arith.constant 154 : index
    %640 = memref.load %arg3[%c154] : memref<321xf32, #tpu.memory_space<smem>>
    %641 = vector.broadcast %640 : f32 to vector<8x128xf32>
    %642 = arith.mulf %641, %1 : vector<8x128xf32>
    %643 = arith.addf %639, %642 : vector<8x128xf32>
    %c155 = arith.constant 155 : index
    %644 = memref.load %arg3[%c155] : memref<321xf32, #tpu.memory_space<smem>>
    %645 = vector.broadcast %644 : f32 to vector<8x128xf32>
    %646 = arith.mulf %645, %18 : vector<8x128xf32>
    %647 = arith.addf %643, %646 : vector<8x128xf32>
    %cst_28 = arith.constant 0.000000e+00 : f32
    %648 = vector.broadcast %cst_28 : f32 to vector<8x128xf32>
    %649 = arith.maximumf %647, %648 : vector<8x128xf32>
    %c157 = arith.constant 157 : index
    %650 = memref.load %arg3[%c157] : memref<321xf32, #tpu.memory_space<smem>>
    %651 = vector.broadcast %650 : f32 to vector<8x128xf32>
    %652 = arith.mulf %651, %649 : vector<8x128xf32>
    %653 = arith.addf %613, %652 : vector<8x128xf32>
    %c158 = arith.constant 158 : index
    %654 = memref.load %arg3[%c158] : memref<321xf32, #tpu.memory_space<smem>>
    %655 = vector.broadcast %654 : f32 to vector<8x128xf32>
    %656 = arith.mulf %655, %649 : vector<8x128xf32>
    %657 = arith.addf %617, %656 : vector<8x128xf32>
    %c159 = arith.constant 159 : index
    %658 = memref.load %arg3[%c159] : memref<321xf32, #tpu.memory_space<smem>>
    %659 = vector.broadcast %658 : f32 to vector<8x128xf32>
    %660 = arith.mulf %659, %649 : vector<8x128xf32>
    %661 = arith.addf %621, %660 : vector<8x128xf32>
    %c166 = arith.constant 166 : index
    %662 = memref.load %arg3[%c166] : memref<321xf32, #tpu.memory_space<smem>>
    %c160 = arith.constant 160 : index
    %663 = memref.load %arg3[%c160] : memref<321xf32, #tpu.memory_space<smem>>
    %664 = vector.broadcast %663 : f32 to vector<8x128xf32>
    %665 = arith.mulf %664, %9 : vector<8x128xf32>
    %666 = vector.broadcast %662 : f32 to vector<8x128xf32>
    %667 = arith.addf %666, %665 : vector<8x128xf32>
    %c161 = arith.constant 161 : index
    %668 = memref.load %arg3[%c161] : memref<321xf32, #tpu.memory_space<smem>>
    %669 = vector.broadcast %668 : f32 to vector<8x128xf32>
    %670 = arith.mulf %669, %0 : vector<8x128xf32>
    %671 = arith.addf %667, %670 : vector<8x128xf32>
    %c162 = arith.constant 162 : index
    %672 = memref.load %arg3[%c162] : memref<321xf32, #tpu.memory_space<smem>>
    %673 = vector.broadcast %672 : f32 to vector<8x128xf32>
    %674 = arith.mulf %673, %12 : vector<8x128xf32>
    %675 = arith.addf %671, %674 : vector<8x128xf32>
    %c163 = arith.constant 163 : index
    %676 = memref.load %arg3[%c163] : memref<321xf32, #tpu.memory_space<smem>>
    %677 = vector.broadcast %676 : f32 to vector<8x128xf32>
    %678 = arith.mulf %677, %15 : vector<8x128xf32>
    %679 = arith.addf %675, %678 : vector<8x128xf32>
    %c164 = arith.constant 164 : index
    %680 = memref.load %arg3[%c164] : memref<321xf32, #tpu.memory_space<smem>>
    %681 = vector.broadcast %680 : f32 to vector<8x128xf32>
    %682 = arith.mulf %681, %1 : vector<8x128xf32>
    %683 = arith.addf %679, %682 : vector<8x128xf32>
    %c165 = arith.constant 165 : index
    %684 = memref.load %arg3[%c165] : memref<321xf32, #tpu.memory_space<smem>>
    %685 = vector.broadcast %684 : f32 to vector<8x128xf32>
    %686 = arith.mulf %685, %18 : vector<8x128xf32>
    %687 = arith.addf %683, %686 : vector<8x128xf32>
    %cst_29 = arith.constant 0.000000e+00 : f32
    %688 = vector.broadcast %cst_29 : f32 to vector<8x128xf32>
    %689 = arith.maximumf %687, %688 : vector<8x128xf32>
    %c167 = arith.constant 167 : index
    %690 = memref.load %arg3[%c167] : memref<321xf32, #tpu.memory_space<smem>>
    %691 = vector.broadcast %690 : f32 to vector<8x128xf32>
    %692 = arith.mulf %691, %689 : vector<8x128xf32>
    %693 = arith.addf %653, %692 : vector<8x128xf32>
    %c168 = arith.constant 168 : index
    %694 = memref.load %arg3[%c168] : memref<321xf32, #tpu.memory_space<smem>>
    %695 = vector.broadcast %694 : f32 to vector<8x128xf32>
    %696 = arith.mulf %695, %689 : vector<8x128xf32>
    %697 = arith.addf %657, %696 : vector<8x128xf32>
    %c169 = arith.constant 169 : index
    %698 = memref.load %arg3[%c169] : memref<321xf32, #tpu.memory_space<smem>>
    %699 = vector.broadcast %698 : f32 to vector<8x128xf32>
    %700 = arith.mulf %699, %689 : vector<8x128xf32>
    %701 = arith.addf %661, %700 : vector<8x128xf32>
    %c176 = arith.constant 176 : index
    %702 = memref.load %arg3[%c176] : memref<321xf32, #tpu.memory_space<smem>>
    %c170 = arith.constant 170 : index
    %703 = memref.load %arg3[%c170] : memref<321xf32, #tpu.memory_space<smem>>
    %704 = vector.broadcast %703 : f32 to vector<8x128xf32>
    %705 = arith.mulf %704, %9 : vector<8x128xf32>
    %706 = vector.broadcast %702 : f32 to vector<8x128xf32>
    %707 = arith.addf %706, %705 : vector<8x128xf32>
    %c171 = arith.constant 171 : index
    %708 = memref.load %arg3[%c171] : memref<321xf32, #tpu.memory_space<smem>>
    %709 = vector.broadcast %708 : f32 to vector<8x128xf32>
    %710 = arith.mulf %709, %0 : vector<8x128xf32>
    %711 = arith.addf %707, %710 : vector<8x128xf32>
    %c172 = arith.constant 172 : index
    %712 = memref.load %arg3[%c172] : memref<321xf32, #tpu.memory_space<smem>>
    %713 = vector.broadcast %712 : f32 to vector<8x128xf32>
    %714 = arith.mulf %713, %12 : vector<8x128xf32>
    %715 = arith.addf %711, %714 : vector<8x128xf32>
    %c173 = arith.constant 173 : index
    %716 = memref.load %arg3[%c173] : memref<321xf32, #tpu.memory_space<smem>>
    %717 = vector.broadcast %716 : f32 to vector<8x128xf32>
    %718 = arith.mulf %717, %15 : vector<8x128xf32>
    %719 = arith.addf %715, %718 : vector<8x128xf32>
    %c174 = arith.constant 174 : index
    %720 = memref.load %arg3[%c174] : memref<321xf32, #tpu.memory_space<smem>>
    %721 = vector.broadcast %720 : f32 to vector<8x128xf32>
    %722 = arith.mulf %721, %1 : vector<8x128xf32>
    %723 = arith.addf %719, %722 : vector<8x128xf32>
    %c175 = arith.constant 175 : index
    %724 = memref.load %arg3[%c175] : memref<321xf32, #tpu.memory_space<smem>>
    %725 = vector.broadcast %724 : f32 to vector<8x128xf32>
    %726 = arith.mulf %725, %18 : vector<8x128xf32>
    %727 = arith.addf %723, %726 : vector<8x128xf32>
    %cst_30 = arith.constant 0.000000e+00 : f32
    %728 = vector.broadcast %cst_30 : f32 to vector<8x128xf32>
    %729 = arith.maximumf %727, %728 : vector<8x128xf32>
    %c177 = arith.constant 177 : index
    %730 = memref.load %arg3[%c177] : memref<321xf32, #tpu.memory_space<smem>>
    %731 = vector.broadcast %730 : f32 to vector<8x128xf32>
    %732 = arith.mulf %731, %729 : vector<8x128xf32>
    %733 = arith.addf %693, %732 : vector<8x128xf32>
    %c178 = arith.constant 178 : index
    %734 = memref.load %arg3[%c178] : memref<321xf32, #tpu.memory_space<smem>>
    %735 = vector.broadcast %734 : f32 to vector<8x128xf32>
    %736 = arith.mulf %735, %729 : vector<8x128xf32>
    %737 = arith.addf %697, %736 : vector<8x128xf32>
    %c179 = arith.constant 179 : index
    %738 = memref.load %arg3[%c179] : memref<321xf32, #tpu.memory_space<smem>>
    %739 = vector.broadcast %738 : f32 to vector<8x128xf32>
    %740 = arith.mulf %739, %729 : vector<8x128xf32>
    %741 = arith.addf %701, %740 : vector<8x128xf32>
    %c186 = arith.constant 186 : index
    %742 = memref.load %arg3[%c186] : memref<321xf32, #tpu.memory_space<smem>>
    %c180 = arith.constant 180 : index
    %743 = memref.load %arg3[%c180] : memref<321xf32, #tpu.memory_space<smem>>
    %744 = vector.broadcast %743 : f32 to vector<8x128xf32>
    %745 = arith.mulf %744, %9 : vector<8x128xf32>
    %746 = vector.broadcast %742 : f32 to vector<8x128xf32>
    %747 = arith.addf %746, %745 : vector<8x128xf32>
    %c181 = arith.constant 181 : index
    %748 = memref.load %arg3[%c181] : memref<321xf32, #tpu.memory_space<smem>>
    %749 = vector.broadcast %748 : f32 to vector<8x128xf32>
    %750 = arith.mulf %749, %0 : vector<8x128xf32>
    %751 = arith.addf %747, %750 : vector<8x128xf32>
    %c182 = arith.constant 182 : index
    %752 = memref.load %arg3[%c182] : memref<321xf32, #tpu.memory_space<smem>>
    %753 = vector.broadcast %752 : f32 to vector<8x128xf32>
    %754 = arith.mulf %753, %12 : vector<8x128xf32>
    %755 = arith.addf %751, %754 : vector<8x128xf32>
    %c183 = arith.constant 183 : index
    %756 = memref.load %arg3[%c183] : memref<321xf32, #tpu.memory_space<smem>>
    %757 = vector.broadcast %756 : f32 to vector<8x128xf32>
    %758 = arith.mulf %757, %15 : vector<8x128xf32>
    %759 = arith.addf %755, %758 : vector<8x128xf32>
    %c184 = arith.constant 184 : index
    %760 = memref.load %arg3[%c184] : memref<321xf32, #tpu.memory_space<smem>>
    %761 = vector.broadcast %760 : f32 to vector<8x128xf32>
    %762 = arith.mulf %761, %1 : vector<8x128xf32>
    %763 = arith.addf %759, %762 : vector<8x128xf32>
    %c185 = arith.constant 185 : index
    %764 = memref.load %arg3[%c185] : memref<321xf32, #tpu.memory_space<smem>>
    %765 = vector.broadcast %764 : f32 to vector<8x128xf32>
    %766 = arith.mulf %765, %18 : vector<8x128xf32>
    %767 = arith.addf %763, %766 : vector<8x128xf32>
    %cst_31 = arith.constant 0.000000e+00 : f32
    %768 = vector.broadcast %cst_31 : f32 to vector<8x128xf32>
    %769 = arith.maximumf %767, %768 : vector<8x128xf32>
    %c187 = arith.constant 187 : index
    %770 = memref.load %arg3[%c187] : memref<321xf32, #tpu.memory_space<smem>>
    %771 = vector.broadcast %770 : f32 to vector<8x128xf32>
    %772 = arith.mulf %771, %769 : vector<8x128xf32>
    %773 = arith.addf %733, %772 : vector<8x128xf32>
    %c188 = arith.constant 188 : index
    %774 = memref.load %arg3[%c188] : memref<321xf32, #tpu.memory_space<smem>>
    %775 = vector.broadcast %774 : f32 to vector<8x128xf32>
    %776 = arith.mulf %775, %769 : vector<8x128xf32>
    %777 = arith.addf %737, %776 : vector<8x128xf32>
    %c189 = arith.constant 189 : index
    %778 = memref.load %arg3[%c189] : memref<321xf32, #tpu.memory_space<smem>>
    %779 = vector.broadcast %778 : f32 to vector<8x128xf32>
    %780 = arith.mulf %779, %769 : vector<8x128xf32>
    %781 = arith.addf %741, %780 : vector<8x128xf32>
    %c196 = arith.constant 196 : index
    %782 = memref.load %arg3[%c196] : memref<321xf32, #tpu.memory_space<smem>>
    %c190 = arith.constant 190 : index
    %783 = memref.load %arg3[%c190] : memref<321xf32, #tpu.memory_space<smem>>
    %784 = vector.broadcast %783 : f32 to vector<8x128xf32>
    %785 = arith.mulf %784, %9 : vector<8x128xf32>
    %786 = vector.broadcast %782 : f32 to vector<8x128xf32>
    %787 = arith.addf %786, %785 : vector<8x128xf32>
    %c191 = arith.constant 191 : index
    %788 = memref.load %arg3[%c191] : memref<321xf32, #tpu.memory_space<smem>>
    %789 = vector.broadcast %788 : f32 to vector<8x128xf32>
    %790 = arith.mulf %789, %0 : vector<8x128xf32>
    %791 = arith.addf %787, %790 : vector<8x128xf32>
    %c192 = arith.constant 192 : index
    %792 = memref.load %arg3[%c192] : memref<321xf32, #tpu.memory_space<smem>>
    %793 = vector.broadcast %792 : f32 to vector<8x128xf32>
    %794 = arith.mulf %793, %12 : vector<8x128xf32>
    %795 = arith.addf %791, %794 : vector<8x128xf32>
    %c193 = arith.constant 193 : index
    %796 = memref.load %arg3[%c193] : memref<321xf32, #tpu.memory_space<smem>>
    %797 = vector.broadcast %796 : f32 to vector<8x128xf32>
    %798 = arith.mulf %797, %15 : vector<8x128xf32>
    %799 = arith.addf %795, %798 : vector<8x128xf32>
    %c194 = arith.constant 194 : index
    %800 = memref.load %arg3[%c194] : memref<321xf32, #tpu.memory_space<smem>>
    %801 = vector.broadcast %800 : f32 to vector<8x128xf32>
    %802 = arith.mulf %801, %1 : vector<8x128xf32>
    %803 = arith.addf %799, %802 : vector<8x128xf32>
    %c195 = arith.constant 195 : index
    %804 = memref.load %arg3[%c195] : memref<321xf32, #tpu.memory_space<smem>>
    %805 = vector.broadcast %804 : f32 to vector<8x128xf32>
    %806 = arith.mulf %805, %18 : vector<8x128xf32>
    %807 = arith.addf %803, %806 : vector<8x128xf32>
    %cst_32 = arith.constant 0.000000e+00 : f32
    %808 = vector.broadcast %cst_32 : f32 to vector<8x128xf32>
    %809 = arith.maximumf %807, %808 : vector<8x128xf32>
    %c197 = arith.constant 197 : index
    %810 = memref.load %arg3[%c197] : memref<321xf32, #tpu.memory_space<smem>>
    %811 = vector.broadcast %810 : f32 to vector<8x128xf32>
    %812 = arith.mulf %811, %809 : vector<8x128xf32>
    %813 = arith.addf %773, %812 : vector<8x128xf32>
    %c198 = arith.constant 198 : index
    %814 = memref.load %arg3[%c198] : memref<321xf32, #tpu.memory_space<smem>>
    %815 = vector.broadcast %814 : f32 to vector<8x128xf32>
    %816 = arith.mulf %815, %809 : vector<8x128xf32>
    %817 = arith.addf %777, %816 : vector<8x128xf32>
    %c199 = arith.constant 199 : index
    %818 = memref.load %arg3[%c199] : memref<321xf32, #tpu.memory_space<smem>>
    %819 = vector.broadcast %818 : f32 to vector<8x128xf32>
    %820 = arith.mulf %819, %809 : vector<8x128xf32>
    %821 = arith.addf %781, %820 : vector<8x128xf32>
    %c206 = arith.constant 206 : index
    %822 = memref.load %arg3[%c206] : memref<321xf32, #tpu.memory_space<smem>>
    %c200 = arith.constant 200 : index
    %823 = memref.load %arg3[%c200] : memref<321xf32, #tpu.memory_space<smem>>
    %824 = vector.broadcast %823 : f32 to vector<8x128xf32>
    %825 = arith.mulf %824, %9 : vector<8x128xf32>
    %826 = vector.broadcast %822 : f32 to vector<8x128xf32>
    %827 = arith.addf %826, %825 : vector<8x128xf32>
    %c201 = arith.constant 201 : index
    %828 = memref.load %arg3[%c201] : memref<321xf32, #tpu.memory_space<smem>>
    %829 = vector.broadcast %828 : f32 to vector<8x128xf32>
    %830 = arith.mulf %829, %0 : vector<8x128xf32>
    %831 = arith.addf %827, %830 : vector<8x128xf32>
    %c202 = arith.constant 202 : index
    %832 = memref.load %arg3[%c202] : memref<321xf32, #tpu.memory_space<smem>>
    %833 = vector.broadcast %832 : f32 to vector<8x128xf32>
    %834 = arith.mulf %833, %12 : vector<8x128xf32>
    %835 = arith.addf %831, %834 : vector<8x128xf32>
    %c203 = arith.constant 203 : index
    %836 = memref.load %arg3[%c203] : memref<321xf32, #tpu.memory_space<smem>>
    %837 = vector.broadcast %836 : f32 to vector<8x128xf32>
    %838 = arith.mulf %837, %15 : vector<8x128xf32>
    %839 = arith.addf %835, %838 : vector<8x128xf32>
    %c204 = arith.constant 204 : index
    %840 = memref.load %arg3[%c204] : memref<321xf32, #tpu.memory_space<smem>>
    %841 = vector.broadcast %840 : f32 to vector<8x128xf32>
    %842 = arith.mulf %841, %1 : vector<8x128xf32>
    %843 = arith.addf %839, %842 : vector<8x128xf32>
    %c205 = arith.constant 205 : index
    %844 = memref.load %arg3[%c205] : memref<321xf32, #tpu.memory_space<smem>>
    %845 = vector.broadcast %844 : f32 to vector<8x128xf32>
    %846 = arith.mulf %845, %18 : vector<8x128xf32>
    %847 = arith.addf %843, %846 : vector<8x128xf32>
    %cst_33 = arith.constant 0.000000e+00 : f32
    %848 = vector.broadcast %cst_33 : f32 to vector<8x128xf32>
    %849 = arith.maximumf %847, %848 : vector<8x128xf32>
    %c207 = arith.constant 207 : index
    %850 = memref.load %arg3[%c207] : memref<321xf32, #tpu.memory_space<smem>>
    %851 = vector.broadcast %850 : f32 to vector<8x128xf32>
    %852 = arith.mulf %851, %849 : vector<8x128xf32>
    %853 = arith.addf %813, %852 : vector<8x128xf32>
    %c208 = arith.constant 208 : index
    %854 = memref.load %arg3[%c208] : memref<321xf32, #tpu.memory_space<smem>>
    %855 = vector.broadcast %854 : f32 to vector<8x128xf32>
    %856 = arith.mulf %855, %849 : vector<8x128xf32>
    %857 = arith.addf %817, %856 : vector<8x128xf32>
    %c209 = arith.constant 209 : index
    %858 = memref.load %arg3[%c209] : memref<321xf32, #tpu.memory_space<smem>>
    %859 = vector.broadcast %858 : f32 to vector<8x128xf32>
    %860 = arith.mulf %859, %849 : vector<8x128xf32>
    %861 = arith.addf %821, %860 : vector<8x128xf32>
    %c216 = arith.constant 216 : index
    %862 = memref.load %arg3[%c216] : memref<321xf32, #tpu.memory_space<smem>>
    %c210 = arith.constant 210 : index
    %863 = memref.load %arg3[%c210] : memref<321xf32, #tpu.memory_space<smem>>
    %864 = vector.broadcast %863 : f32 to vector<8x128xf32>
    %865 = arith.mulf %864, %9 : vector<8x128xf32>
    %866 = vector.broadcast %862 : f32 to vector<8x128xf32>
    %867 = arith.addf %866, %865 : vector<8x128xf32>
    %c211 = arith.constant 211 : index
    %868 = memref.load %arg3[%c211] : memref<321xf32, #tpu.memory_space<smem>>
    %869 = vector.broadcast %868 : f32 to vector<8x128xf32>
    %870 = arith.mulf %869, %0 : vector<8x128xf32>
    %871 = arith.addf %867, %870 : vector<8x128xf32>
    %c212 = arith.constant 212 : index
    %872 = memref.load %arg3[%c212] : memref<321xf32, #tpu.memory_space<smem>>
    %873 = vector.broadcast %872 : f32 to vector<8x128xf32>
    %874 = arith.mulf %873, %12 : vector<8x128xf32>
    %875 = arith.addf %871, %874 : vector<8x128xf32>
    %c213 = arith.constant 213 : index
    %876 = memref.load %arg3[%c213] : memref<321xf32, #tpu.memory_space<smem>>
    %877 = vector.broadcast %876 : f32 to vector<8x128xf32>
    %878 = arith.mulf %877, %15 : vector<8x128xf32>
    %879 = arith.addf %875, %878 : vector<8x128xf32>
    %c214 = arith.constant 214 : index
    %880 = memref.load %arg3[%c214] : memref<321xf32, #tpu.memory_space<smem>>
    %881 = vector.broadcast %880 : f32 to vector<8x128xf32>
    %882 = arith.mulf %881, %1 : vector<8x128xf32>
    %883 = arith.addf %879, %882 : vector<8x128xf32>
    %c215 = arith.constant 215 : index
    %884 = memref.load %arg3[%c215] : memref<321xf32, #tpu.memory_space<smem>>
    %885 = vector.broadcast %884 : f32 to vector<8x128xf32>
    %886 = arith.mulf %885, %18 : vector<8x128xf32>
    %887 = arith.addf %883, %886 : vector<8x128xf32>
    %cst_34 = arith.constant 0.000000e+00 : f32
    %888 = vector.broadcast %cst_34 : f32 to vector<8x128xf32>
    %889 = arith.maximumf %887, %888 : vector<8x128xf32>
    %c217 = arith.constant 217 : index
    %890 = memref.load %arg3[%c217] : memref<321xf32, #tpu.memory_space<smem>>
    %891 = vector.broadcast %890 : f32 to vector<8x128xf32>
    %892 = arith.mulf %891, %889 : vector<8x128xf32>
    %893 = arith.addf %853, %892 : vector<8x128xf32>
    %c218 = arith.constant 218 : index
    %894 = memref.load %arg3[%c218] : memref<321xf32, #tpu.memory_space<smem>>
    %895 = vector.broadcast %894 : f32 to vector<8x128xf32>
    %896 = arith.mulf %895, %889 : vector<8x128xf32>
    %897 = arith.addf %857, %896 : vector<8x128xf32>
    %c219 = arith.constant 219 : index
    %898 = memref.load %arg3[%c219] : memref<321xf32, #tpu.memory_space<smem>>
    %899 = vector.broadcast %898 : f32 to vector<8x128xf32>
    %900 = arith.mulf %899, %889 : vector<8x128xf32>
    %901 = arith.addf %861, %900 : vector<8x128xf32>
    %c226 = arith.constant 226 : index
    %902 = memref.load %arg3[%c226] : memref<321xf32, #tpu.memory_space<smem>>
    %c220 = arith.constant 220 : index
    %903 = memref.load %arg3[%c220] : memref<321xf32, #tpu.memory_space<smem>>
    %904 = vector.broadcast %903 : f32 to vector<8x128xf32>
    %905 = arith.mulf %904, %9 : vector<8x128xf32>
    %906 = vector.broadcast %902 : f32 to vector<8x128xf32>
    %907 = arith.addf %906, %905 : vector<8x128xf32>
    %c221 = arith.constant 221 : index
    %908 = memref.load %arg3[%c221] : memref<321xf32, #tpu.memory_space<smem>>
    %909 = vector.broadcast %908 : f32 to vector<8x128xf32>
    %910 = arith.mulf %909, %0 : vector<8x128xf32>
    %911 = arith.addf %907, %910 : vector<8x128xf32>
    %c222 = arith.constant 222 : index
    %912 = memref.load %arg3[%c222] : memref<321xf32, #tpu.memory_space<smem>>
    %913 = vector.broadcast %912 : f32 to vector<8x128xf32>
    %914 = arith.mulf %913, %12 : vector<8x128xf32>
    %915 = arith.addf %911, %914 : vector<8x128xf32>
    %c223 = arith.constant 223 : index
    %916 = memref.load %arg3[%c223] : memref<321xf32, #tpu.memory_space<smem>>
    %917 = vector.broadcast %916 : f32 to vector<8x128xf32>
    %918 = arith.mulf %917, %15 : vector<8x128xf32>
    %919 = arith.addf %915, %918 : vector<8x128xf32>
    %c224 = arith.constant 224 : index
    %920 = memref.load %arg3[%c224] : memref<321xf32, #tpu.memory_space<smem>>
    %921 = vector.broadcast %920 : f32 to vector<8x128xf32>
    %922 = arith.mulf %921, %1 : vector<8x128xf32>
    %923 = arith.addf %919, %922 : vector<8x128xf32>
    %c225 = arith.constant 225 : index
    %924 = memref.load %arg3[%c225] : memref<321xf32, #tpu.memory_space<smem>>
    %925 = vector.broadcast %924 : f32 to vector<8x128xf32>
    %926 = arith.mulf %925, %18 : vector<8x128xf32>
    %927 = arith.addf %923, %926 : vector<8x128xf32>
    %cst_35 = arith.constant 0.000000e+00 : f32
    %928 = vector.broadcast %cst_35 : f32 to vector<8x128xf32>
    %929 = arith.maximumf %927, %928 : vector<8x128xf32>
    %c227 = arith.constant 227 : index
    %930 = memref.load %arg3[%c227] : memref<321xf32, #tpu.memory_space<smem>>
    %931 = vector.broadcast %930 : f32 to vector<8x128xf32>
    %932 = arith.mulf %931, %929 : vector<8x128xf32>
    %933 = arith.addf %893, %932 : vector<8x128xf32>
    %c228 = arith.constant 228 : index
    %934 = memref.load %arg3[%c228] : memref<321xf32, #tpu.memory_space<smem>>
    %935 = vector.broadcast %934 : f32 to vector<8x128xf32>
    %936 = arith.mulf %935, %929 : vector<8x128xf32>
    %937 = arith.addf %897, %936 : vector<8x128xf32>
    %c229 = arith.constant 229 : index
    %938 = memref.load %arg3[%c229] : memref<321xf32, #tpu.memory_space<smem>>
    %939 = vector.broadcast %938 : f32 to vector<8x128xf32>
    %940 = arith.mulf %939, %929 : vector<8x128xf32>
    %941 = arith.addf %901, %940 : vector<8x128xf32>
    %c236 = arith.constant 236 : index
    %942 = memref.load %arg3[%c236] : memref<321xf32, #tpu.memory_space<smem>>
    %c230 = arith.constant 230 : index
    %943 = memref.load %arg3[%c230] : memref<321xf32, #tpu.memory_space<smem>>
    %944 = vector.broadcast %943 : f32 to vector<8x128xf32>
    %945 = arith.mulf %944, %9 : vector<8x128xf32>
    %946 = vector.broadcast %942 : f32 to vector<8x128xf32>
    %947 = arith.addf %946, %945 : vector<8x128xf32>
    %c231 = arith.constant 231 : index
    %948 = memref.load %arg3[%c231] : memref<321xf32, #tpu.memory_space<smem>>
    %949 = vector.broadcast %948 : f32 to vector<8x128xf32>
    %950 = arith.mulf %949, %0 : vector<8x128xf32>
    %951 = arith.addf %947, %950 : vector<8x128xf32>
    %c232 = arith.constant 232 : index
    %952 = memref.load %arg3[%c232] : memref<321xf32, #tpu.memory_space<smem>>
    %953 = vector.broadcast %952 : f32 to vector<8x128xf32>
    %954 = arith.mulf %953, %12 : vector<8x128xf32>
    %955 = arith.addf %951, %954 : vector<8x128xf32>
    %c233 = arith.constant 233 : index
    %956 = memref.load %arg3[%c233] : memref<321xf32, #tpu.memory_space<smem>>
    %957 = vector.broadcast %956 : f32 to vector<8x128xf32>
    %958 = arith.mulf %957, %15 : vector<8x128xf32>
    %959 = arith.addf %955, %958 : vector<8x128xf32>
    %c234 = arith.constant 234 : index
    %960 = memref.load %arg3[%c234] : memref<321xf32, #tpu.memory_space<smem>>
    %961 = vector.broadcast %960 : f32 to vector<8x128xf32>
    %962 = arith.mulf %961, %1 : vector<8x128xf32>
    %963 = arith.addf %959, %962 : vector<8x128xf32>
    %c235 = arith.constant 235 : index
    %964 = memref.load %arg3[%c235] : memref<321xf32, #tpu.memory_space<smem>>
    %965 = vector.broadcast %964 : f32 to vector<8x128xf32>
    %966 = arith.mulf %965, %18 : vector<8x128xf32>
    %967 = arith.addf %963, %966 : vector<8x128xf32>
    %cst_36 = arith.constant 0.000000e+00 : f32
    %968 = vector.broadcast %cst_36 : f32 to vector<8x128xf32>
    %969 = arith.maximumf %967, %968 : vector<8x128xf32>
    %c237 = arith.constant 237 : index
    %970 = memref.load %arg3[%c237] : memref<321xf32, #tpu.memory_space<smem>>
    %971 = vector.broadcast %970 : f32 to vector<8x128xf32>
    %972 = arith.mulf %971, %969 : vector<8x128xf32>
    %973 = arith.addf %933, %972 : vector<8x128xf32>
    %c238 = arith.constant 238 : index
    %974 = memref.load %arg3[%c238] : memref<321xf32, #tpu.memory_space<smem>>
    %975 = vector.broadcast %974 : f32 to vector<8x128xf32>
    %976 = arith.mulf %975, %969 : vector<8x128xf32>
    %977 = arith.addf %937, %976 : vector<8x128xf32>
    %c239 = arith.constant 239 : index
    %978 = memref.load %arg3[%c239] : memref<321xf32, #tpu.memory_space<smem>>
    %979 = vector.broadcast %978 : f32 to vector<8x128xf32>
    %980 = arith.mulf %979, %969 : vector<8x128xf32>
    %981 = arith.addf %941, %980 : vector<8x128xf32>
    %c246 = arith.constant 246 : index
    %982 = memref.load %arg3[%c246] : memref<321xf32, #tpu.memory_space<smem>>
    %c240 = arith.constant 240 : index
    %983 = memref.load %arg3[%c240] : memref<321xf32, #tpu.memory_space<smem>>
    %984 = vector.broadcast %983 : f32 to vector<8x128xf32>
    %985 = arith.mulf %984, %9 : vector<8x128xf32>
    %986 = vector.broadcast %982 : f32 to vector<8x128xf32>
    %987 = arith.addf %986, %985 : vector<8x128xf32>
    %c241 = arith.constant 241 : index
    %988 = memref.load %arg3[%c241] : memref<321xf32, #tpu.memory_space<smem>>
    %989 = vector.broadcast %988 : f32 to vector<8x128xf32>
    %990 = arith.mulf %989, %0 : vector<8x128xf32>
    %991 = arith.addf %987, %990 : vector<8x128xf32>
    %c242 = arith.constant 242 : index
    %992 = memref.load %arg3[%c242] : memref<321xf32, #tpu.memory_space<smem>>
    %993 = vector.broadcast %992 : f32 to vector<8x128xf32>
    %994 = arith.mulf %993, %12 : vector<8x128xf32>
    %995 = arith.addf %991, %994 : vector<8x128xf32>
    %c243 = arith.constant 243 : index
    %996 = memref.load %arg3[%c243] : memref<321xf32, #tpu.memory_space<smem>>
    %997 = vector.broadcast %996 : f32 to vector<8x128xf32>
    %998 = arith.mulf %997, %15 : vector<8x128xf32>
    %999 = arith.addf %995, %998 : vector<8x128xf32>
    %c244 = arith.constant 244 : index
    %1000 = memref.load %arg3[%c244] : memref<321xf32, #tpu.memory_space<smem>>
    %1001 = vector.broadcast %1000 : f32 to vector<8x128xf32>
    %1002 = arith.mulf %1001, %1 : vector<8x128xf32>
    %1003 = arith.addf %999, %1002 : vector<8x128xf32>
    %c245 = arith.constant 245 : index
    %1004 = memref.load %arg3[%c245] : memref<321xf32, #tpu.memory_space<smem>>
    %1005 = vector.broadcast %1004 : f32 to vector<8x128xf32>
    %1006 = arith.mulf %1005, %18 : vector<8x128xf32>
    %1007 = arith.addf %1003, %1006 : vector<8x128xf32>
    %cst_37 = arith.constant 0.000000e+00 : f32
    %1008 = vector.broadcast %cst_37 : f32 to vector<8x128xf32>
    %1009 = arith.maximumf %1007, %1008 : vector<8x128xf32>
    %c247 = arith.constant 247 : index
    %1010 = memref.load %arg3[%c247] : memref<321xf32, #tpu.memory_space<smem>>
    %1011 = vector.broadcast %1010 : f32 to vector<8x128xf32>
    %1012 = arith.mulf %1011, %1009 : vector<8x128xf32>
    %1013 = arith.addf %973, %1012 : vector<8x128xf32>
    %c248 = arith.constant 248 : index
    %1014 = memref.load %arg3[%c248] : memref<321xf32, #tpu.memory_space<smem>>
    %1015 = vector.broadcast %1014 : f32 to vector<8x128xf32>
    %1016 = arith.mulf %1015, %1009 : vector<8x128xf32>
    %1017 = arith.addf %977, %1016 : vector<8x128xf32>
    %c249 = arith.constant 249 : index
    %1018 = memref.load %arg3[%c249] : memref<321xf32, #tpu.memory_space<smem>>
    %1019 = vector.broadcast %1018 : f32 to vector<8x128xf32>
    %1020 = arith.mulf %1019, %1009 : vector<8x128xf32>
    %1021 = arith.addf %981, %1020 : vector<8x128xf32>
    %c256 = arith.constant 256 : index
    %1022 = memref.load %arg3[%c256] : memref<321xf32, #tpu.memory_space<smem>>
    %c250 = arith.constant 250 : index
    %1023 = memref.load %arg3[%c250] : memref<321xf32, #tpu.memory_space<smem>>
    %1024 = vector.broadcast %1023 : f32 to vector<8x128xf32>
    %1025 = arith.mulf %1024, %9 : vector<8x128xf32>
    %1026 = vector.broadcast %1022 : f32 to vector<8x128xf32>
    %1027 = arith.addf %1026, %1025 : vector<8x128xf32>
    %c251 = arith.constant 251 : index
    %1028 = memref.load %arg3[%c251] : memref<321xf32, #tpu.memory_space<smem>>
    %1029 = vector.broadcast %1028 : f32 to vector<8x128xf32>
    %1030 = arith.mulf %1029, %0 : vector<8x128xf32>
    %1031 = arith.addf %1027, %1030 : vector<8x128xf32>
    %c252 = arith.constant 252 : index
    %1032 = memref.load %arg3[%c252] : memref<321xf32, #tpu.memory_space<smem>>
    %1033 = vector.broadcast %1032 : f32 to vector<8x128xf32>
    %1034 = arith.mulf %1033, %12 : vector<8x128xf32>
    %1035 = arith.addf %1031, %1034 : vector<8x128xf32>
    %c253 = arith.constant 253 : index
    %1036 = memref.load %arg3[%c253] : memref<321xf32, #tpu.memory_space<smem>>
    %1037 = vector.broadcast %1036 : f32 to vector<8x128xf32>
    %1038 = arith.mulf %1037, %15 : vector<8x128xf32>
    %1039 = arith.addf %1035, %1038 : vector<8x128xf32>
    %c254 = arith.constant 254 : index
    %1040 = memref.load %arg3[%c254] : memref<321xf32, #tpu.memory_space<smem>>
    %1041 = vector.broadcast %1040 : f32 to vector<8x128xf32>
    %1042 = arith.mulf %1041, %1 : vector<8x128xf32>
    %1043 = arith.addf %1039, %1042 : vector<8x128xf32>
    %c255 = arith.constant 255 : index
    %1044 = memref.load %arg3[%c255] : memref<321xf32, #tpu.memory_space<smem>>
    %1045 = vector.broadcast %1044 : f32 to vector<8x128xf32>
    %1046 = arith.mulf %1045, %18 : vector<8x128xf32>
    %1047 = arith.addf %1043, %1046 : vector<8x128xf32>
    %cst_38 = arith.constant 0.000000e+00 : f32
    %1048 = vector.broadcast %cst_38 : f32 to vector<8x128xf32>
    %1049 = arith.maximumf %1047, %1048 : vector<8x128xf32>
    %c257 = arith.constant 257 : index
    %1050 = memref.load %arg3[%c257] : memref<321xf32, #tpu.memory_space<smem>>
    %1051 = vector.broadcast %1050 : f32 to vector<8x128xf32>
    %1052 = arith.mulf %1051, %1049 : vector<8x128xf32>
    %1053 = arith.addf %1013, %1052 : vector<8x128xf32>
    %c258 = arith.constant 258 : index
    %1054 = memref.load %arg3[%c258] : memref<321xf32, #tpu.memory_space<smem>>
    %1055 = vector.broadcast %1054 : f32 to vector<8x128xf32>
    %1056 = arith.mulf %1055, %1049 : vector<8x128xf32>
    %1057 = arith.addf %1017, %1056 : vector<8x128xf32>
    %c259 = arith.constant 259 : index
    %1058 = memref.load %arg3[%c259] : memref<321xf32, #tpu.memory_space<smem>>
    %1059 = vector.broadcast %1058 : f32 to vector<8x128xf32>
    %1060 = arith.mulf %1059, %1049 : vector<8x128xf32>
    %1061 = arith.addf %1021, %1060 : vector<8x128xf32>
    %c266 = arith.constant 266 : index
    %1062 = memref.load %arg3[%c266] : memref<321xf32, #tpu.memory_space<smem>>
    %c260 = arith.constant 260 : index
    %1063 = memref.load %arg3[%c260] : memref<321xf32, #tpu.memory_space<smem>>
    %1064 = vector.broadcast %1063 : f32 to vector<8x128xf32>
    %1065 = arith.mulf %1064, %9 : vector<8x128xf32>
    %1066 = vector.broadcast %1062 : f32 to vector<8x128xf32>
    %1067 = arith.addf %1066, %1065 : vector<8x128xf32>
    %c261 = arith.constant 261 : index
    %1068 = memref.load %arg3[%c261] : memref<321xf32, #tpu.memory_space<smem>>
    %1069 = vector.broadcast %1068 : f32 to vector<8x128xf32>
    %1070 = arith.mulf %1069, %0 : vector<8x128xf32>
    %1071 = arith.addf %1067, %1070 : vector<8x128xf32>
    %c262 = arith.constant 262 : index
    %1072 = memref.load %arg3[%c262] : memref<321xf32, #tpu.memory_space<smem>>
    %1073 = vector.broadcast %1072 : f32 to vector<8x128xf32>
    %1074 = arith.mulf %1073, %12 : vector<8x128xf32>
    %1075 = arith.addf %1071, %1074 : vector<8x128xf32>
    %c263 = arith.constant 263 : index
    %1076 = memref.load %arg3[%c263] : memref<321xf32, #tpu.memory_space<smem>>
    %1077 = vector.broadcast %1076 : f32 to vector<8x128xf32>
    %1078 = arith.mulf %1077, %15 : vector<8x128xf32>
    %1079 = arith.addf %1075, %1078 : vector<8x128xf32>
    %c264 = arith.constant 264 : index
    %1080 = memref.load %arg3[%c264] : memref<321xf32, #tpu.memory_space<smem>>
    %1081 = vector.broadcast %1080 : f32 to vector<8x128xf32>
    %1082 = arith.mulf %1081, %1 : vector<8x128xf32>
    %1083 = arith.addf %1079, %1082 : vector<8x128xf32>
    %c265 = arith.constant 265 : index
    %1084 = memref.load %arg3[%c265] : memref<321xf32, #tpu.memory_space<smem>>
    %1085 = vector.broadcast %1084 : f32 to vector<8x128xf32>
    %1086 = arith.mulf %1085, %18 : vector<8x128xf32>
    %1087 = arith.addf %1083, %1086 : vector<8x128xf32>
    %cst_39 = arith.constant 0.000000e+00 : f32
    %1088 = vector.broadcast %cst_39 : f32 to vector<8x128xf32>
    %1089 = arith.maximumf %1087, %1088 : vector<8x128xf32>
    %c267 = arith.constant 267 : index
    %1090 = memref.load %arg3[%c267] : memref<321xf32, #tpu.memory_space<smem>>
    %1091 = vector.broadcast %1090 : f32 to vector<8x128xf32>
    %1092 = arith.mulf %1091, %1089 : vector<8x128xf32>
    %1093 = arith.addf %1053, %1092 : vector<8x128xf32>
    %c268 = arith.constant 268 : index
    %1094 = memref.load %arg3[%c268] : memref<321xf32, #tpu.memory_space<smem>>
    %1095 = vector.broadcast %1094 : f32 to vector<8x128xf32>
    %1096 = arith.mulf %1095, %1089 : vector<8x128xf32>
    %1097 = arith.addf %1057, %1096 : vector<8x128xf32>
    %c269 = arith.constant 269 : index
    %1098 = memref.load %arg3[%c269] : memref<321xf32, #tpu.memory_space<smem>>
    %1099 = vector.broadcast %1098 : f32 to vector<8x128xf32>
    %1100 = arith.mulf %1099, %1089 : vector<8x128xf32>
    %1101 = arith.addf %1061, %1100 : vector<8x128xf32>
    %c276 = arith.constant 276 : index
    %1102 = memref.load %arg3[%c276] : memref<321xf32, #tpu.memory_space<smem>>
    %c270 = arith.constant 270 : index
    %1103 = memref.load %arg3[%c270] : memref<321xf32, #tpu.memory_space<smem>>
    %1104 = vector.broadcast %1103 : f32 to vector<8x128xf32>
    %1105 = arith.mulf %1104, %9 : vector<8x128xf32>
    %1106 = vector.broadcast %1102 : f32 to vector<8x128xf32>
    %1107 = arith.addf %1106, %1105 : vector<8x128xf32>
    %c271 = arith.constant 271 : index
    %1108 = memref.load %arg3[%c271] : memref<321xf32, #tpu.memory_space<smem>>
    %1109 = vector.broadcast %1108 : f32 to vector<8x128xf32>
    %1110 = arith.mulf %1109, %0 : vector<8x128xf32>
    %1111 = arith.addf %1107, %1110 : vector<8x128xf32>
    %c272 = arith.constant 272 : index
    %1112 = memref.load %arg3[%c272] : memref<321xf32, #tpu.memory_space<smem>>
    %1113 = vector.broadcast %1112 : f32 to vector<8x128xf32>
    %1114 = arith.mulf %1113, %12 : vector<8x128xf32>
    %1115 = arith.addf %1111, %1114 : vector<8x128xf32>
    %c273 = arith.constant 273 : index
    %1116 = memref.load %arg3[%c273] : memref<321xf32, #tpu.memory_space<smem>>
    %1117 = vector.broadcast %1116 : f32 to vector<8x128xf32>
    %1118 = arith.mulf %1117, %15 : vector<8x128xf32>
    %1119 = arith.addf %1115, %1118 : vector<8x128xf32>
    %c274 = arith.constant 274 : index
    %1120 = memref.load %arg3[%c274] : memref<321xf32, #tpu.memory_space<smem>>
    %1121 = vector.broadcast %1120 : f32 to vector<8x128xf32>
    %1122 = arith.mulf %1121, %1 : vector<8x128xf32>
    %1123 = arith.addf %1119, %1122 : vector<8x128xf32>
    %c275 = arith.constant 275 : index
    %1124 = memref.load %arg3[%c275] : memref<321xf32, #tpu.memory_space<smem>>
    %1125 = vector.broadcast %1124 : f32 to vector<8x128xf32>
    %1126 = arith.mulf %1125, %18 : vector<8x128xf32>
    %1127 = arith.addf %1123, %1126 : vector<8x128xf32>
    %cst_40 = arith.constant 0.000000e+00 : f32
    %1128 = vector.broadcast %cst_40 : f32 to vector<8x128xf32>
    %1129 = arith.maximumf %1127, %1128 : vector<8x128xf32>
    %c277 = arith.constant 277 : index
    %1130 = memref.load %arg3[%c277] : memref<321xf32, #tpu.memory_space<smem>>
    %1131 = vector.broadcast %1130 : f32 to vector<8x128xf32>
    %1132 = arith.mulf %1131, %1129 : vector<8x128xf32>
    %1133 = arith.addf %1093, %1132 : vector<8x128xf32>
    %c278 = arith.constant 278 : index
    %1134 = memref.load %arg3[%c278] : memref<321xf32, #tpu.memory_space<smem>>
    %1135 = vector.broadcast %1134 : f32 to vector<8x128xf32>
    %1136 = arith.mulf %1135, %1129 : vector<8x128xf32>
    %1137 = arith.addf %1097, %1136 : vector<8x128xf32>
    %c279 = arith.constant 279 : index
    %1138 = memref.load %arg3[%c279] : memref<321xf32, #tpu.memory_space<smem>>
    %1139 = vector.broadcast %1138 : f32 to vector<8x128xf32>
    %1140 = arith.mulf %1139, %1129 : vector<8x128xf32>
    %1141 = arith.addf %1101, %1140 : vector<8x128xf32>
    %c286 = arith.constant 286 : index
    %1142 = memref.load %arg3[%c286] : memref<321xf32, #tpu.memory_space<smem>>
    %c280 = arith.constant 280 : index
    %1143 = memref.load %arg3[%c280] : memref<321xf32, #tpu.memory_space<smem>>
    %1144 = vector.broadcast %1143 : f32 to vector<8x128xf32>
    %1145 = arith.mulf %1144, %9 : vector<8x128xf32>
    %1146 = vector.broadcast %1142 : f32 to vector<8x128xf32>
    %1147 = arith.addf %1146, %1145 : vector<8x128xf32>
    %c281 = arith.constant 281 : index
    %1148 = memref.load %arg3[%c281] : memref<321xf32, #tpu.memory_space<smem>>
    %1149 = vector.broadcast %1148 : f32 to vector<8x128xf32>
    %1150 = arith.mulf %1149, %0 : vector<8x128xf32>
    %1151 = arith.addf %1147, %1150 : vector<8x128xf32>
    %c282 = arith.constant 282 : index
    %1152 = memref.load %arg3[%c282] : memref<321xf32, #tpu.memory_space<smem>>
    %1153 = vector.broadcast %1152 : f32 to vector<8x128xf32>
    %1154 = arith.mulf %1153, %12 : vector<8x128xf32>
    %1155 = arith.addf %1151, %1154 : vector<8x128xf32>
    %c283 = arith.constant 283 : index
    %1156 = memref.load %arg3[%c283] : memref<321xf32, #tpu.memory_space<smem>>
    %1157 = vector.broadcast %1156 : f32 to vector<8x128xf32>
    %1158 = arith.mulf %1157, %15 : vector<8x128xf32>
    %1159 = arith.addf %1155, %1158 : vector<8x128xf32>
    %c284 = arith.constant 284 : index
    %1160 = memref.load %arg3[%c284] : memref<321xf32, #tpu.memory_space<smem>>
    %1161 = vector.broadcast %1160 : f32 to vector<8x128xf32>
    %1162 = arith.mulf %1161, %1 : vector<8x128xf32>
    %1163 = arith.addf %1159, %1162 : vector<8x128xf32>
    %c285 = arith.constant 285 : index
    %1164 = memref.load %arg3[%c285] : memref<321xf32, #tpu.memory_space<smem>>
    %1165 = vector.broadcast %1164 : f32 to vector<8x128xf32>
    %1166 = arith.mulf %1165, %18 : vector<8x128xf32>
    %1167 = arith.addf %1163, %1166 : vector<8x128xf32>
    %cst_41 = arith.constant 0.000000e+00 : f32
    %1168 = vector.broadcast %cst_41 : f32 to vector<8x128xf32>
    %1169 = arith.maximumf %1167, %1168 : vector<8x128xf32>
    %c287 = arith.constant 287 : index
    %1170 = memref.load %arg3[%c287] : memref<321xf32, #tpu.memory_space<smem>>
    %1171 = vector.broadcast %1170 : f32 to vector<8x128xf32>
    %1172 = arith.mulf %1171, %1169 : vector<8x128xf32>
    %1173 = arith.addf %1133, %1172 : vector<8x128xf32>
    %c288 = arith.constant 288 : index
    %1174 = memref.load %arg3[%c288] : memref<321xf32, #tpu.memory_space<smem>>
    %1175 = vector.broadcast %1174 : f32 to vector<8x128xf32>
    %1176 = arith.mulf %1175, %1169 : vector<8x128xf32>
    %1177 = arith.addf %1137, %1176 : vector<8x128xf32>
    %c289 = arith.constant 289 : index
    %1178 = memref.load %arg3[%c289] : memref<321xf32, #tpu.memory_space<smem>>
    %1179 = vector.broadcast %1178 : f32 to vector<8x128xf32>
    %1180 = arith.mulf %1179, %1169 : vector<8x128xf32>
    %1181 = arith.addf %1141, %1180 : vector<8x128xf32>
    %c296 = arith.constant 296 : index
    %1182 = memref.load %arg3[%c296] : memref<321xf32, #tpu.memory_space<smem>>
    %c290 = arith.constant 290 : index
    %1183 = memref.load %arg3[%c290] : memref<321xf32, #tpu.memory_space<smem>>
    %1184 = vector.broadcast %1183 : f32 to vector<8x128xf32>
    %1185 = arith.mulf %1184, %9 : vector<8x128xf32>
    %1186 = vector.broadcast %1182 : f32 to vector<8x128xf32>
    %1187 = arith.addf %1186, %1185 : vector<8x128xf32>
    %c291 = arith.constant 291 : index
    %1188 = memref.load %arg3[%c291] : memref<321xf32, #tpu.memory_space<smem>>
    %1189 = vector.broadcast %1188 : f32 to vector<8x128xf32>
    %1190 = arith.mulf %1189, %0 : vector<8x128xf32>
    %1191 = arith.addf %1187, %1190 : vector<8x128xf32>
    %c292 = arith.constant 292 : index
    %1192 = memref.load %arg3[%c292] : memref<321xf32, #tpu.memory_space<smem>>
    %1193 = vector.broadcast %1192 : f32 to vector<8x128xf32>
    %1194 = arith.mulf %1193, %12 : vector<8x128xf32>
    %1195 = arith.addf %1191, %1194 : vector<8x128xf32>
    %c293 = arith.constant 293 : index
    %1196 = memref.load %arg3[%c293] : memref<321xf32, #tpu.memory_space<smem>>
    %1197 = vector.broadcast %1196 : f32 to vector<8x128xf32>
    %1198 = arith.mulf %1197, %15 : vector<8x128xf32>
    %1199 = arith.addf %1195, %1198 : vector<8x128xf32>
    %c294 = arith.constant 294 : index
    %1200 = memref.load %arg3[%c294] : memref<321xf32, #tpu.memory_space<smem>>
    %1201 = vector.broadcast %1200 : f32 to vector<8x128xf32>
    %1202 = arith.mulf %1201, %1 : vector<8x128xf32>
    %1203 = arith.addf %1199, %1202 : vector<8x128xf32>
    %c295 = arith.constant 295 : index
    %1204 = memref.load %arg3[%c295] : memref<321xf32, #tpu.memory_space<smem>>
    %1205 = vector.broadcast %1204 : f32 to vector<8x128xf32>
    %1206 = arith.mulf %1205, %18 : vector<8x128xf32>
    %1207 = arith.addf %1203, %1206 : vector<8x128xf32>
    %cst_42 = arith.constant 0.000000e+00 : f32
    %1208 = vector.broadcast %cst_42 : f32 to vector<8x128xf32>
    %1209 = arith.maximumf %1207, %1208 : vector<8x128xf32>
    %c297 = arith.constant 297 : index
    %1210 = memref.load %arg3[%c297] : memref<321xf32, #tpu.memory_space<smem>>
    %1211 = vector.broadcast %1210 : f32 to vector<8x128xf32>
    %1212 = arith.mulf %1211, %1209 : vector<8x128xf32>
    %1213 = arith.addf %1173, %1212 : vector<8x128xf32>
    %c298 = arith.constant 298 : index
    %1214 = memref.load %arg3[%c298] : memref<321xf32, #tpu.memory_space<smem>>
    %1215 = vector.broadcast %1214 : f32 to vector<8x128xf32>
    %1216 = arith.mulf %1215, %1209 : vector<8x128xf32>
    %1217 = arith.addf %1177, %1216 : vector<8x128xf32>
    %c299 = arith.constant 299 : index
    %1218 = memref.load %arg3[%c299] : memref<321xf32, #tpu.memory_space<smem>>
    %1219 = vector.broadcast %1218 : f32 to vector<8x128xf32>
    %1220 = arith.mulf %1219, %1209 : vector<8x128xf32>
    %1221 = arith.addf %1181, %1220 : vector<8x128xf32>
    %c306 = arith.constant 306 : index
    %1222 = memref.load %arg3[%c306] : memref<321xf32, #tpu.memory_space<smem>>
    %c300 = arith.constant 300 : index
    %1223 = memref.load %arg3[%c300] : memref<321xf32, #tpu.memory_space<smem>>
    %1224 = vector.broadcast %1223 : f32 to vector<8x128xf32>
    %1225 = arith.mulf %1224, %9 : vector<8x128xf32>
    %1226 = vector.broadcast %1222 : f32 to vector<8x128xf32>
    %1227 = arith.addf %1226, %1225 : vector<8x128xf32>
    %c301 = arith.constant 301 : index
    %1228 = memref.load %arg3[%c301] : memref<321xf32, #tpu.memory_space<smem>>
    %1229 = vector.broadcast %1228 : f32 to vector<8x128xf32>
    %1230 = arith.mulf %1229, %0 : vector<8x128xf32>
    %1231 = arith.addf %1227, %1230 : vector<8x128xf32>
    %c302 = arith.constant 302 : index
    %1232 = memref.load %arg3[%c302] : memref<321xf32, #tpu.memory_space<smem>>
    %1233 = vector.broadcast %1232 : f32 to vector<8x128xf32>
    %1234 = arith.mulf %1233, %12 : vector<8x128xf32>
    %1235 = arith.addf %1231, %1234 : vector<8x128xf32>
    %c303 = arith.constant 303 : index
    %1236 = memref.load %arg3[%c303] : memref<321xf32, #tpu.memory_space<smem>>
    %1237 = vector.broadcast %1236 : f32 to vector<8x128xf32>
    %1238 = arith.mulf %1237, %15 : vector<8x128xf32>
    %1239 = arith.addf %1235, %1238 : vector<8x128xf32>
    %c304 = arith.constant 304 : index
    %1240 = memref.load %arg3[%c304] : memref<321xf32, #tpu.memory_space<smem>>
    %1241 = vector.broadcast %1240 : f32 to vector<8x128xf32>
    %1242 = arith.mulf %1241, %1 : vector<8x128xf32>
    %1243 = arith.addf %1239, %1242 : vector<8x128xf32>
    %c305 = arith.constant 305 : index
    %1244 = memref.load %arg3[%c305] : memref<321xf32, #tpu.memory_space<smem>>
    %1245 = vector.broadcast %1244 : f32 to vector<8x128xf32>
    %1246 = arith.mulf %1245, %18 : vector<8x128xf32>
    %1247 = arith.addf %1243, %1246 : vector<8x128xf32>
    %cst_43 = arith.constant 0.000000e+00 : f32
    %1248 = vector.broadcast %cst_43 : f32 to vector<8x128xf32>
    %1249 = arith.maximumf %1247, %1248 : vector<8x128xf32>
    %c307 = arith.constant 307 : index
    %1250 = memref.load %arg3[%c307] : memref<321xf32, #tpu.memory_space<smem>>
    %1251 = vector.broadcast %1250 : f32 to vector<8x128xf32>
    %1252 = arith.mulf %1251, %1249 : vector<8x128xf32>
    %1253 = arith.addf %1213, %1252 : vector<8x128xf32>
    %c308 = arith.constant 308 : index
    %1254 = memref.load %arg3[%c308] : memref<321xf32, #tpu.memory_space<smem>>
    %1255 = vector.broadcast %1254 : f32 to vector<8x128xf32>
    %1256 = arith.mulf %1255, %1249 : vector<8x128xf32>
    %1257 = arith.addf %1217, %1256 : vector<8x128xf32>
    %c309 = arith.constant 309 : index
    %1258 = memref.load %arg3[%c309] : memref<321xf32, #tpu.memory_space<smem>>
    %1259 = vector.broadcast %1258 : f32 to vector<8x128xf32>
    %1260 = arith.mulf %1259, %1249 : vector<8x128xf32>
    %1261 = arith.addf %1221, %1260 : vector<8x128xf32>
    %c316 = arith.constant 316 : index
    %1262 = memref.load %arg3[%c316] : memref<321xf32, #tpu.memory_space<smem>>
    %c310 = arith.constant 310 : index
    %1263 = memref.load %arg3[%c310] : memref<321xf32, #tpu.memory_space<smem>>
    %1264 = vector.broadcast %1263 : f32 to vector<8x128xf32>
    %1265 = arith.mulf %1264, %9 : vector<8x128xf32>
    %1266 = vector.broadcast %1262 : f32 to vector<8x128xf32>
    %1267 = arith.addf %1266, %1265 : vector<8x128xf32>
    %c311 = arith.constant 311 : index
    %1268 = memref.load %arg3[%c311] : memref<321xf32, #tpu.memory_space<smem>>
    %1269 = vector.broadcast %1268 : f32 to vector<8x128xf32>
    %1270 = arith.mulf %1269, %0 : vector<8x128xf32>
    %1271 = arith.addf %1267, %1270 : vector<8x128xf32>
    %c312 = arith.constant 312 : index
    %1272 = memref.load %arg3[%c312] : memref<321xf32, #tpu.memory_space<smem>>
    %1273 = vector.broadcast %1272 : f32 to vector<8x128xf32>
    %1274 = arith.mulf %1273, %12 : vector<8x128xf32>
    %1275 = arith.addf %1271, %1274 : vector<8x128xf32>
    %c313 = arith.constant 313 : index
    %1276 = memref.load %arg3[%c313] : memref<321xf32, #tpu.memory_space<smem>>
    %1277 = vector.broadcast %1276 : f32 to vector<8x128xf32>
    %1278 = arith.mulf %1277, %15 : vector<8x128xf32>
    %1279 = arith.addf %1275, %1278 : vector<8x128xf32>
    %c314 = arith.constant 314 : index
    %1280 = memref.load %arg3[%c314] : memref<321xf32, #tpu.memory_space<smem>>
    %1281 = vector.broadcast %1280 : f32 to vector<8x128xf32>
    %1282 = arith.mulf %1281, %1 : vector<8x128xf32>
    %1283 = arith.addf %1279, %1282 : vector<8x128xf32>
    %c315 = arith.constant 315 : index
    %1284 = memref.load %arg3[%c315] : memref<321xf32, #tpu.memory_space<smem>>
    %1285 = vector.broadcast %1284 : f32 to vector<8x128xf32>
    %1286 = arith.mulf %1285, %18 : vector<8x128xf32>
    %1287 = arith.addf %1283, %1286 : vector<8x128xf32>
    %cst_44 = arith.constant 0.000000e+00 : f32
    %1288 = vector.broadcast %cst_44 : f32 to vector<8x128xf32>
    %1289 = arith.maximumf %1287, %1288 : vector<8x128xf32>
    %c317 = arith.constant 317 : index
    %1290 = memref.load %arg3[%c317] : memref<321xf32, #tpu.memory_space<smem>>
    %1291 = vector.broadcast %1290 : f32 to vector<8x128xf32>
    %1292 = arith.mulf %1291, %1289 : vector<8x128xf32>
    %1293 = arith.addf %1253, %1292 : vector<8x128xf32>
    %c318 = arith.constant 318 : index
    %1294 = memref.load %arg3[%c318] : memref<321xf32, #tpu.memory_space<smem>>
    %1295 = vector.broadcast %1294 : f32 to vector<8x128xf32>
    %1296 = arith.mulf %1295, %1289 : vector<8x128xf32>
    %1297 = arith.addf %1257, %1296 : vector<8x128xf32>
    %c319 = arith.constant 319 : index
    %1298 = memref.load %arg3[%c319] : memref<321xf32, #tpu.memory_space<smem>>
    %1299 = vector.broadcast %1298 : f32 to vector<8x128xf32>
    %1300 = arith.mulf %1299, %1289 : vector<8x128xf32>
    %1301 = arith.addf %1261, %1300 : vector<8x128xf32>
    %c320 = arith.constant 320 : index
    %1302 = memref.load %arg3[%c320] : memref<321xf32, #tpu.memory_space<smem>>
    %c1_i32_45 = arith.constant 1 : i32
    %1303 = tpu.dynamic_rotate %1293 by %c1_i32_45 dim 1 : vector<8x128xf32>, i32 -> vector<8x128xf32>
    %cst_46 = arith.constant 0.000000e+00 : f32
    %1304 = vector.broadcast %cst_46 : f32 to vector<8x128xf32>
    %1305 = arith.select %4, %1304, %1303 : vector<8x128xi1>, vector<8x128xf32>
    %1306 = vector.broadcast %1302 : f32 to vector<8x128xf32>
    %1307 = arith.addf %1306, %1305 : vector<8x128xf32>
    %1308 = arith.addf %1307, %1297 : vector<8x128xf32>
    %c127_i32_47 = arith.constant 127 : i32
    %1309 = tpu.dynamic_rotate %1301 by %c127_i32_47 dim 1 : vector<8x128xf32>, i32 -> vector<8x128xf32>
    %cst_48 = arith.constant 0.000000e+00 : f32
    %1310 = vector.broadcast %cst_48 : f32 to vector<8x128xf32>
    %1311 = arith.select %6, %1310, %1309 : vector<8x128xi1>, vector<8x128xf32>
    %1312 = arith.addf %1308, %1311 : vector<8x128xf32>
    %1313 = arith.truncf %1312 : vector<8x128xf32> to vector<8x128xbf16>
    %c0_49 = arith.constant 0 : index
    %c0_50 = arith.constant 0 : index
    %1314 = vector.load %arg4[%c0_49, %c0_50] : memref<128x256xbf16, #tpu.memory_space<vmem>>, vector<128x256xbf16>
    %cst_51 = arith.constant dense<0.000000e+00> : vector<8x256xf32>
    %1315 = tpu.matmul %1313, %1314, %cst_51 {dimension_numbers = #tpu.dot_dimension_numbers<[1], [0], [0], [1], [0, 0, 1, 1], [], []>} : vector<8x128xbf16>, vector<128x256xbf16>, vector<8x256xf32> -> vector<8x256xf32>
    %c0_52 = arith.constant 0 : index
    %c0_53 = arith.constant 0 : index
    %1316 = vector.load %arg5[%c0_52, %c0_53] : memref<8x256xf32, #tpu.memory_space<vmem>>, vector<8x256xf32>
    tpu.vector_store %arg5[%c0_52, %c0_53], %1315 {strides = array<i32>} : memref<8x256xf32, #tpu.memory_space<vmem>>, vector<8x256xf32>,
    return
  }
  func.func @transform_0(%arg0: i32) -> (i32, i32) {
    %c0_i32 = arith.constant 0 : i32
    %c0_i32_0 = arith.constant 0 : i32
    %c0_i32_1 = arith.constant 0 : i32
    return %c0_i32, %c0_i32_0 : i32, i32
  }
  func.func @transform_1(%arg0: i32) -> (i32, i32) {
    %c0_i32 = arith.constant 0 : i32
    %c0_i32_0 = arith.constant 0 : i32
    %c0_i32_1 = arith.constant 0 : i32
    return %c0_i32, %c0_i32_0 : i32, i32
  }
  func.func @transform_2(%arg0: i32) -> i32 {
    %c0_i32 = arith.constant 0 : i32
    %c0_i32_0 = arith.constant 0 : i32
    return %c0_i32 : i32
  }
  func.func @transform_3(%arg0: i32) -> (i32, i32) {
    %c0_i32 = arith.constant 0 : i32
    %c0_i32_0 = arith.constant 0 : i32
    return %c0_i32, %arg0 : i32, i32
  }
  func.func @transform_4(%arg0: i32) -> (i32, i32) {
    %c0_i32 = arith.constant 0 : i32
    %c0_i32_0 = arith.constant 0 : i32
    return %c0_i32, %arg0 : i32, i32
  }
}

</mosaic_0001>

<bundles_post_ra>
// kernel: tpu_custom_call.1
= control target key start
LH: loop header
LB: loop body
LE: loop exit
PB: predicated region body
PF: predicated region fallthrough
CT: control target
= control target key end

     0   :  { %s4553_s0 = inlined_call_operand.hbm [shape: f32[8,128], index: 0, kind: input, shape index: {}]   ;;  %s4554_s1 = inlined_call_operand.hbm [shape: f32[8,128], index: 1, kind: input, shape index: {}]   ;;  %s4555_s2 = inlined_call_operand.vmem [shape: f32[321], index: 2, kind: input, shape index: {}]   ;;  %s4556_s3 = inlined_call_operand.hbm [shape: bf16[128,1024], index: 3, kind: input, shape index: {}]   ;;  %s4557_s4 = inlined_call_operand.hbm [shape: f32[8,1024], index: 4, kind: output, shape index: {}]  }
   0x1   :  { %4732 = sst [smem:[#allocation193_spill]] %s4553_s0 }
   0x2   :  { %4733 = sst [smem:[#allocation194_spill]] %s4554_s1 }
   0x3   :  { %4734 = sst [smem:[#allocation195_spill]] %s4555_s2 }
   0x4   :  { %4735 = sst [smem:[#allocation196_spill]] %s4556_s3 }
   0x5   :  { %4736 = sst [smem:[#allocation197_spill]] %s4557_s4 }
   0x6   :  { %9 = vsyncpa [#allocation3], 0 }
   0x7   :  { %10 = vsyncpa [#allocation7], 0 }
   0x8   :  { %11 = vsyncpa [#allocation5], 0 }
   0x9   :  { %12 = vsyncpa [#allocation4], 0 }
   0xa   :  { %14 = vsyncpa [#allocation4 + $0x1], 0  ;;  %s2473_s15 = smov 0   ;;  %s2475_s16 = smov 0  }
   0xb   :  { %s2477_s17 = smov 0   ;;  %s2479_s18 = smov 0  }
   0xc LB: > { %4737 = sst [smem:[#allocation16_spill]] %s2423_s15  ;;  %s2494_s19 = sadd.s32 4294967295, %s2435_s18   ;;  %s2435_s18 = sphi %s2479_s18, %s5425_s18   ;;  %s2431_s17 = sphi %s2477_s17, %s5428_s17   ;;  %s2427_s16 = sphi %s2475_s16, %s5427_s16   ;;  %s2423_s15 = sphi %s2473_s15, %s5426_s15  }
   0xd   : > { %4738 = sst [smem:[#allocation17_spill]] %s2427_s16  ;;  %s1789_s20 = sadd.s32 4294967294, %s2435_s18  }
   0xe   : > { %4739 = sst [smem:[#allocation18_spill]] %s2431_s17  ;;  %s2498_s21 = sadd.s32 1, %s2435_s18  }
   0xf   : > { %4740 = sst [smem:[#allocation19_spill]] %s2435_s18  ;;  %s90_s22 = sadd.s32 1, %s2431_s17 }
  0x10   : > { %4741 = sst [smem:[#allocation20_spill]] %s2494_s19  ;;  %s87_s23 = ssub.s32 %s2435_s18, %s2498_s21 }
  0x11   : > { %4742 = sst [smem:[#allocation21_spill]] %s2498_s21  ;;  %p97_p0 = scmp.ne.s32.totalorder %s2431_s17, %s2427_s16 }
  0x12   : > { %p88_p1 = scmp.eq.s32.totalorder %s87_s23, 0  ;;  %p98_p2 = scmp.eq.s32.totalorder %s2435_s18, 0 }
  0x13   : > { %p103_p3 = scmp.ne.s32.totalorder %s2427_s16, %s2423_s15  ;;  %p4558_p4 = scmp.eq.s32.totalorder %s2494_s19, 0 }
  0x14   : > { %s2510_s24 = scalar_select %p88_p1, %s2431_s17, %s90_s22  }
  0x15   : > { %p2512_p5 = por %p98_p2, %p97_p0  ;;  %p2518_p6 = por %p4558_p4, %p103_p3 }
  0x16   : > { %4743 = sst [smem:[#allocation22_spill]] %s2510_s24  ;;  %p127_p7 = scmp.eq.s32.totalorder %s2494_s19, 3 }
  0x17   : > { %s4745_s26 = scalar_select %p2518_p6, 1, 0 }
  0x18   : > { %p133_p8 = scmp.eq.s32.totalorder %s1789_s20, 3  ;;  %p1790_p9 = scmp.ge.s32.totalorder %s2435_s18, 1 }
  0x19   : > { %p140_p10 = scmp.lt.s32.totalorder %s2435_s18, 5  ;;  %p2525_p11 = por %p127_p7, %p97_p0 }
  0x1a   : > { %p2529_p12 = por %p133_p8, %p103_p3  ;;  %s2437_s30 = smov [#allocation2]  }
  0x1b   : > { %s4746_s27 = scalar_select %p2525_p11, 1, 0 }
  0x1c   : > { %s4748_s28 = scalar_select %p2529_p12, 1, 0 }
  0x1d   : > { %4747 = sst [smem:[#allocation23_spill]] %s4746_s27  ;;  %p2533_p13 = pnand %p1790_p9, %p140_p10 }
  0x1e   : > { %4749 = sst [smem:[#allocation24_spill]] %s4748_s28  ;;  %s153_s5 = sshll.u32 %s2437_s30, 4  ;;  %s154_s5 = int_to_ptr.vmem [resolvable:$true] %s153_s5 }
  0x1f   : > { %s4750_s29 = scalar_select %p2533_p13, 1, 0 }
  0x20   : > { %p2163_p1 = pneg %p2533_p13  ;;  %p2184_p2 = scmp.lt.s32.totalorder %s2435_s18, 4 }
  0x21   : > { %s2438_s8 = smov [#allocation6]   ;;  %s4753_s0 = sld [smem:[#allocation193_spill]] }
  0x22   : > { %p2542_p0 = pnand %p2163_p1, %p4558_p4  ;;  %p2548_p3 = pnand %p2184_p2, %p2512_p5 }
  0x23   : > { %s164_s9 = sshll.u32 %s2438_s8, 4  ;;  %s2552_s9 = int_to_ptr.vmem [resolvable:$true] %s164_s9 }
  0x24   : > { %s4752_s7 = scalar_select %p2548_p3, 1, 0 }
  0x25   : > { %p2562_p8 = pneg %p2542_p0 }
  0x27   : > { %s2256_s12 = scalar_lea.hbm %s4753_s0, 128 }
  0x28   : > { %p2257_p7 = scmp.ne.s32.totalorder %s4753_s0, %s2256_s12  ;;  %p2263_p10 = scmp.lt.u32.totalorder %s2256_s12, %s4753_s0 }
  0x2a   : > { %p2259_p5 = pnand %p2562_p8, %p2257_p7 }
  0x2c   : > { %p2260_p9 = pneg %p2259_p5 }
  0x2e   : > { %p2265_p1 = pnand %p2263_p10, %p2260_p9 }
  0x30   : > { %2268 = shalt.err (!%p2265_p1)
}
  0x31   : > { %s2269_s25 = scalar_lea.vmem %s154_s5, 128  ;;  %p2277_p11 = scmp.lt.s32.totalorder %s154_s5, %s154_s5 }
  0x32   : > { %p2270_p2 = scmp.ne.s32.totalorder %s154_s5, %s2269_s25  ;;  %p2278_p6 = scmp.lt.s32.totalorder %s2269_s25, %s2269_s25 }
  0x34   : > { %p2272_p4 = pnand %p2270_p2, %p2562_p8  ;;  %p2279_p13 = por %p2278_p6, %p2277_p11 }
  0x36   : > { %p2273_p12 = pneg %p2272_p4 }
  0x38   : > { %p2280_p3 = pnand %p2279_p13, %p2273_p12 }
  0x3a   : > { %2283 = shalt.err (!%p2280_p3)
}
  0x3b   : > { %2166 = dma.hbm_to_vmem [thread:$0]  (!%p2542_p0), %s4753_s0, 128, %s154_s5, [#allocation3]  }
  0x3c   : > { %s4755_s2 = sld [smem:[#allocation195_spill]]  ;;  %s4756_s1 = sld [smem:[#allocation194_spill]] }
  0x42   : > { %s175_s12 = sshll.u32 %s4755_s2, 4  ;;  %s2284_s22 = scalar_lea.hbm %s4756_s1, 128  ;;  %s176_s12 = int_to_ptr.vmem [resolvable:$true] %s175_s12 }
  0x43   : > { %p2285_p4 = scmp.ne.s32.totalorder %s4756_s1, %s2284_s22  ;;  %p2291_p12 = scmp.lt.u32.totalorder %s2284_s22, %s4756_s1 }
  0x45   : > { %p2287_p6 = pnand %p2285_p4, %p2562_p8 }
  0x47   : > { %p2288_p11 = pneg %p2287_p6 }
  0x49   : > { %p2293_p13 = pnand %p2291_p12, %p2288_p11 }
  0x4b   : > { %2296 = shalt.err (!%p2293_p13)
}
  0x4c   : > { %s2297_s5 = scalar_lea.vmem %s2552_s9, 128  ;;  %p2305_p9 = scmp.lt.s32.totalorder %s2552_s9, %s2552_s9 }
  0x4d   : > { %p2298_p3 = scmp.ne.s32.totalorder %s2552_s9, %s2297_s5  ;;  %p2306_p10 = scmp.lt.s32.totalorder %s2297_s5, %s2297_s5 }
  0x4f   : > { %p2300_p7 = pnand %p2298_p3, %p2562_p8  ;;  %p2307_p1 = por %p2306_p10, %p2305_p9 }
  0x51   : > { %p2301_p5 = pneg %p2300_p7 }
  0x53   : > { %p2308_p2 = pnand %p2307_p1, %p2301_p5 }
  0x55   : > { %2311 = shalt.err (!%p2308_p2)
}
  0x56   : > { %2169 = dma.hbm_to_vmem [thread:$0]  (!%p2542_p0), %s4756_s1, 128, %s2552_s9, [#allocation7]  }
  0x57   : > { %s2312_s30 = scalar_lea.vmem %s176_s12, 48  ;;  %s2319_s8 = scalar_lea.vmem %s176_s12, 64 }
  0x58   : > { %p2313_p4 = scmp.ne.s32.totalorder %s176_s12, %s2312_s30  ;;  %p2320_p12 = scmp.lt.s32.totalorder %s176_s12, %s176_s12 }
  0x59   : > { %p2321_p13 = scmp.lt.s32.totalorder %s2319_s8, %s2312_s30 }
  0x5a   : > { %p2315_p6 = pnand %p2313_p4, %p2562_p8 }
  0x5b   : > { %p2322_p3 = por %p2321_p13, %p2320_p12 }
  0x5c   : > { %p2316_p11 = pneg %p2315_p6 }
  0x5e   : > { %p2323_p7 = pnand %p2322_p3, %p2316_p11 }
  0x60   : > { %2326 = shalt.err (!%p2323_p7)
}
  0x61   : > { %s2439_s10 = smov [#allocation8]   ;;  %s186_s9 = sand.u32 1, %s2435_s18  }
  0x62   : > { %2172 = dma.vmem_to_smem (!%p2542_p0), %s176_s12, 48, %s2439_s10, [#allocation5]  }
  0x63   : > { %s188_s11 = sand.u32 1, %s2431_s17   ;;  %s2145_s13 = sshll.u32 %s2435_s18, 7 }
  0x64   : > { %s1795_s20 = sshll.u32 %s188_s11, 7  ;;  %s4757_s3 = sld [smem:[#allocation196_spill]] }
  0x65   : > { %s190_s6 = scalar_lea.vmem [#allocation9], %s1795_s20  ;;  %s2618_s5 = scalar_lea.sflag [#allocation3], %s186_s9 }
  0x66   : > { %s197_s25 = sshll.u32 %s190_s6, 4  ;;  %p4758_p8 = scmp.ne.s32.totalorder %s4752_s7, 0  ;;  %s2616_s25 = int_to_ptr.vmem [resolvable:$true] %s197_s25 }
  0x68   : > { %p2329_p5 = pneg %p4758_p8 }
  0x6a   : > { %s2614_s23 = scalar_lea.hbm %s4757_s3, %s2145_s13  ;;  %s2332_s30 = scalar_lea.hbm %s4757_s3, 8192 }
  0x6b   : > { %s2327_s12 = scalar_lea.hbm %s2614_s23, 2048  ;;  %p2333_p1 = scmp.lt.u32.totalorder %s2614_s23, %s4757_s3 }
  0x6c   : > { %p2328_p0 = scmp.ne.s32.totalorder %s2614_s23, %s2327_s12  ;;  %p2334_p2 = scmp.lt.u32.totalorder %s2332_s30, %s2327_s12 }
  0x6d   : > { %p2336_p6 = scmp.lt.u32.totalorder %s2327_s12, %s2614_s23 }
  0x6e   : > { %p2330_p9 = pnand %p2329_p5, %p2328_p0  ;;  %p2335_p4 = por %p2334_p2, %p2333_p1 }
  0x70   : > { %p2331_p10 = pneg %p2330_p9  ;;  %p2337_p11 = por %p2336_p6, %p2335_p4 }
  0x72   : > { %p2338_p12 = pnand %p2337_p11, %p2331_p10 }
  0x74   : > { %2341 = shalt.err (!%p2338_p12)
}
  0x75   : > { %s2342_s9 = scalar_lea.vmem %s2616_s25, 2048  ;;  %s2440_s11 = smov [#allocation9]  }
  0x76   : > { %p2343_p13 = scmp.ne.s32.totalorder %s2616_s25, %s2342_s9  ;;  %s2347_s20 = sshll.u32 %s2440_s11, 4  ;;  %s2348_s20 = int_to_ptr.vmem [resolvable:$false] %s2347_s20 }
  0x77   : > { %s2349_s13 = scalar_lea.vmem %s2348_s20, 4096  ;;  %p2350_p0 = scmp.lt.s32.totalorder %s2616_s25, %s2348_s20 }
  0x78   : > { %p2345_p3 = pnand %p2343_p13, %p2329_p5  ;;  %p2351_p9 = scmp.lt.s32.totalorder %s2349_s13, %s2342_s9 }
  0x7a   : > { %p2346_p7 = pneg %p2345_p3  ;;  %p2352_p1 = por %p2351_p9, %p2350_p0 }
  0x7c   : > { %p2353_p2 = pnand %p2352_p1, %p2346_p7 }
  0x7e   : > { %2356 = shalt.err (!%p2353_p2)
}
  0x7f   : > { %s2441_s14 = smov 512   ;;  %s2442_s22 = smov 128  }
  0x80   : > { %s2443_s6 = smov 8   ;;  %p4759_p5 = scmp.ne.s32.totalorder %s4750_s29, 0 }
  0x81   : > { %2176 = dma.hbm_to_vmem [thread:$0]  (!%p4758_p8), %s2614_s23, 2048, %s2616_s25, %s2618_s5, %s2441_s14, %s2442_s22, %s2443_s6  }
  0x82   : > { %209 = sbr.rel (%p4759_p5) target bundleno = 938 (0x3aa), region = 36 }
  0x89   : > { %p4760_p10 = scmp.eq.s32.totalorder %s2494_s19, 0 }
  0x8b   : > { %2402 = dma.done.wait (%p4760_p10), [#allocation3], 128   ;;  %p4761_p4 = pmov %p4760_p10 }
  0x8d   : > { %2404 = vsyncadd (%p4761_p4), [#allocation3], 4294967168  ;;  %p4762_p6 = pmov %p4761_p4 }
  0x8e   : > { %p4763_p11 = pmov %p4761_p4 }
  0x8f   : > { %2406 = dma.done.wait (%p4762_p6), [#allocation7], 128  }
  0x90   : > { %2408 = vsyncadd (%p4763_p11), [#allocation7], 4294967168  ;;  %p4764_p12 = pmov %p4761_p4 }
  0x91   : > { %p4765_p8 = pmov %p4761_p4 }
  0x92   : > { %2410 = dma.done.wait (%p4764_p12), [#allocation5], 48  }
  0x93   : > { %2412 = vsyncadd (%p4765_p8), [#allocation5], 4294967248  ;;  %s223_s29 = sand.u32 1, %s2494_s19   ;;  %s2662_s7 = sand.u32 1, %s2427_s16  }
  0x94   : > { %4766 = sst [smem:[#allocation25_spill]] %s2662_s7  ;;  %s1802_s23 = sshll.u32 %s2662_s7, 7 }
  0x95   : > { %s224_s25 = scalar_lea.sflag [#allocation3], %s223_s29  ;;  %s2665_s5 = scalar_lea.vmem [#allocation9], %s1802_s23 }
  0x96   : > { %4767 = sst [smem:[#allocation26_spill]] %s2665_s5  ;;  %p4768_p13 = scmp.ne.s32.totalorder %s4745_s26, 0 }
  0x98   : > { %2414 = dma.done.wait (%p4768_p13), %s224_s25, 2048  }
  0x99   : > { %2416 = vsyncadd (%p4768_p13), %s224_s25, 4294965248 }
  0x9a   : > { %232 = sfence }
  0x9b   : > { %v2671_v0 = vld [vmem:[#allocation2] sm:$0xff]  ;;  %v2673_v1 = vld [vmem:[#allocation6] sm:$0xff]  ;;  %s4565_s12 = smov 1   ;;  %s2679_s21 = sld [smem:[#allocation8 + $0x6]]  ;;  %v258_v2 = vlaneseq }
  0x9c   : > { %262 = vrot.lane.b32.xlu0 %v2671_v0, %s4565_s12  ;;  %268 = vrot.lane.b32.xlu1 %v2673_v1, %s4565_s12  ;;  %s2681_s24 = sld [smem:[#allocation8]]  ;;  %s2683_s30 = sld [smem:[#allocation8 + $0x1]] }
  0x9d   : > { %s2685_s26 = sld [smem:[#allocation8 + $0x2]]  ;;  %s2687_s8 = sld [smem:[#allocation8 + $0x3]]  ;;  %v2873_v5 = vand.u32 127, %v258_v2 }
  0x9e   : > { %s2689_s10 = sld [smem:[#allocation8 + $0x4]]  ;;  %s4566_s9 = smov 127  }
  0x9f   : > { %s2695_s11 = sld [smem:[#allocation8 + $0x5]]  ;;  %s2697_s20 = sld [smem:[#allocation8 + $0x9]]  ;;  %4851 = vst [vmem:[#allocation109_spill] sm:$0xff] %v2873_v5  ;;  %vm260_vm0 = vcmp.eq.s32.totalorder %v2873_v5, 0  ;;  %vm261_vm1 = vcmp.eq.s32.totalorder %v2873_v5, 127 }
  0xa0   : > { %265 = vrot.lane.b32.xlu0 %v2671_v0, %s4566_s9  ;;  %271 = vrot.lane.b32.xlu1 %v2673_v1, %s4566_s9  ;;  %s2699_s13 = sld [smem:[#allocation8 + $0x10]]  ;;  %s2701_s14 = sld [smem:[#allocation8 + $0xa]] }
  0xa1   : > { %4769 = sst [smem:[#allocation27_spill]] %s2679_s21  ;;  %s2705_s6 = sld [smem:[#allocation8 + $0xc]] }
  0xa2   : > { %4770 = sst [smem:[#allocation28_spill]] %s2681_s24  ;;  %s2703_s22 = sld [smem:[#allocation8 + $0xb]]  ;;  %v281_v3 = vstv %s2683_s30 }
  0xa3   : > { %4771 = sst [smem:[#allocation29_spill]] %s2685_s26  ;;  %s2709_s23 = sld [smem:[#allocation8 + $0xe]]  ;;  %v2882_v8 = vmul.f32 %v281_v3, %v2671_v0 }
  0xa4   : > { %4772 = sst [smem:[#allocation30_spill]] %s2687_s8  ;;  %s2707_s29 = sld [smem:[#allocation8 + $0xd]]  ;;  %v293_v4 = vstv %s2689_s10 }
  0xa5   : > { %4773 = sst [smem:[#allocation31_spill]] %s2695_s11  ;;  %s2713_s12 = sld [smem:[#allocation8 + $0x13]]  ;;  %v2892_v12 = vmul.f32 %v293_v4, %v2673_v1 }
  0xa6   : > { %4774 = sst [smem:[#allocation32_spill]] %s2697_s20  ;;  %s2711_s25 = sld [smem:[#allocation8 + $0xf]] }
  0xa7   : > { %4775 = sst [smem:[#allocation33_spill]] %s2699_s13  ;;  %s2715_s9 = sld [smem:[#allocation8 + $0x1a]] }
  0xa8   : > { %4776 = sst [smem:[#allocation34_spill]] %s2701_s14  ;;  %s2717_s0 = sld [smem:[#allocation8 + $0x14]]  ;;  %v320_v10 = vstv %s2703_s22 }
  0xa9   : > { %4777 = sst [smem:[#allocation35_spill]] %s2705_s6  ;;  %s2719_s1 = sld [smem:[#allocation8 + $0x15]]  ;;  %v332_v14 = vstv %s2709_s23  ;;  %v2909_v19 = vmul.f32 %v320_v10, %v2671_v0 }
  0xaa   : > { %4778 = sst [smem:[#allocation36_spill]] %s2707_s29  ;;  %s2721_s2 = sld [smem:[#allocation8 + $0x16]]  ;;  %v2919_v23 = vmul.f32 %v332_v14, %v2673_v1 }
  0xab   : > { %4780 = sst [smem:[#allocation38_spill]] %s2713_s12  ;;  %s2723_s3 = sld [smem:[#allocation8 + $0x17]] }
  0xac   : > { %4779 = sst [smem:[#allocation37_spill]] %s2711_s25  ;;  %s2725_s17 = sld [smem:[#allocation8 + $0x18]] }
  0xad   : > { %4781 = sst [smem:[#allocation39_spill]] %s2715_s9  ;;  %s2727_s16 = sld [smem:[#allocation8 + $0x19]] }
  0xae   : > { %4782 = sst [smem:[#allocation40_spill]] %s2717_s0  ;;  %s2729_s28 = sld [smem:[#allocation8 + $0x1d]] }
  0xaf   : > { %s2731_s15 = sld [smem:[#allocation8 + $0x24]]  ;;  %s2733_s18 = sld [smem:[#allocation8 + $0x1e]]  ;;  %v359_v18 = vstv %s2719_s1 }
  0xb0   : > { %4783 = sst [smem:[#allocation41_spill]] %s2721_s2  ;;  %s2735_s4 = sld [smem:[#allocation8 + $0x1f]]  ;;  %v2930_v28 = vmul.f32 %v359_v18, %v2671_v0 }
  0xb1   : > { %4784 = sst [smem:[#allocation42_spill]] %s2723_s3  ;;  %s2737_s27 = sld [smem:[#allocation8 + $0x20]] }
  0xb2   : > { %s2739_s19 = sld [smem:[#allocation8 + $0x21]]  ;;  %s2741_s7 = sld [smem:[#allocation8 + $0x22]]  ;;  %v371_v22 = vstv %s2725_s17 }
  0xb3   : > { %4785 = sst [smem:[#allocation43_spill]] %s2727_s16  ;;  %s2745_s3 = sld [smem:[#allocation8 + $0x27]]  ;;  %v2940_v32 = vmul.f32 %v371_v22, %v2673_v1 }
  0xb4   : > { %4786 = sst [smem:[#allocation44_spill]] %s2729_s28  ;;  %s2743_s5 = sld [smem:[#allocation8 + $0x23]] }
  0xb5   : > { %4787 = sst [smem:[#allocation45_spill]] %s2731_s15  ;;  %s2747_s2 = sld [smem:[#allocation8 + $0x2e]] }
  0xb6   : > { %4788 = sst [smem:[#allocation46_spill]] %s2733_s18  ;;  %s2749_s16 = sld [smem:[#allocation8 + $0x28]] }
  0xb7   : > { %4789 = sst [smem:[#allocation47_spill]] %s2735_s4  ;;  %s2751_s28 = sld [smem:[#allocation8 + $0x29]] }
  0xb8   : > { %4790 = sst [smem:[#allocation48_spill]] %s2737_s27  ;;  %s2753_s15 = sld [smem:[#allocation8 + $0x2a]] }
  0xb9   : > { %4791 = sst [smem:[#allocation49_spill]] %s2739_s19  ;;  %s2755_s18 = sld [smem:[#allocation8 + $0x2b]] }
  0xba   : > { %4792 = sst [smem:[#allocation50_spill]] %s2741_s7  ;;  %s2757_s4 = sld [smem:[#allocation8 + $0x2c]] }
  0xbb   : > { %4793 = sst [smem:[#allocation51_spill]] %s2743_s5  ;;  %s2759_s27 = sld [smem:[#allocation8 + $0x2d]] }
  0xbc   : > { %4794 = sst [smem:[#allocation52_spill]] %s2745_s3  ;;  %s2761_s19 = sld [smem:[#allocation8 + $0x31]] }
  0xbd   : > { %4795 = sst [smem:[#allocation53_spill]] %s2747_s2  ;;  %s2763_s7 = sld [smem:[#allocation8 + $0x38]] }
  0xbe   : > { %4796 = sst [smem:[#allocation54_spill]] %s2749_s16  ;;  %s2765_s5 = sld [smem:[#allocation8 + $0x32]] }
  0xbf   : > { %4797 = sst [smem:[#allocation55_spill]] %s2751_s28  ;;  %s2767_s3 = sld [smem:[#allocation8 + $0x33]] }
  0xc0   : > { %4798 = sst [smem:[#allocation56_spill]] %s2753_s15  ;;  %s2769_s2 = sld [smem:[#allocation8 + $0x34]] }
  0xc1   : > { %4799 = sst [smem:[#allocation57_spill]] %s2755_s18  ;;  %s2771_s16 = sld [smem:[#allocation8 + $0x35]] }
  0xc2   : > { %4800 = sst [smem:[#allocation58_spill]] %s2757_s4  ;;  %s2773_s28 = sld [smem:[#allocation8 + $0x36]] }
  0xc3   : > { %4801 = sst [smem:[#allocation59_spill]] %s2759_s27  ;;  %s2775_s15 = sld [smem:[#allocation8 + $0x37]] }
  0xc4   : > { %4802 = sst [smem:[#allocation60_spill]] %s2761_s19  ;;  %s2777_s18 = sld [smem:[#allocation8 + $0x3b]] }
  0xc5   : > { %4803 = sst [smem:[#allocation61_spill]] %s2763_s7  ;;  %s2779_s4 = sld [smem:[#allocation8 + $0x42]] }
  0xc6   : > { %4804 = sst [smem:[#allocation62_spill]] %s2765_s5  ;;  %s2781_s27 = sld [smem:[#allocation8 + $0x3c]] }
  0xc7   : > { %4805 = sst [smem:[#allocation63_spill]] %s2767_s3  ;;  %s2783_s19 = sld [smem:[#allocation8 + $0x3d]] }
  0xc8   : > { %4806 = sst [smem:[#allocation64_spill]] %s2769_s2  ;;  %s2785_s7 = sld [smem:[#allocation8 + $0x3e]] }
  0xc9   : > { %4807 = sst [smem:[#allocation65_spill]] %s2771_s16  ;;  %s2787_s5 = sld [smem:[#allocation8 + $0x3f]] }
  0xca   : > { %4808 = sst [smem:[#allocation66_spill]] %s2773_s28  ;;  %s2789_s3 = sld [smem:[#allocation8 + $0x40]] }
  0xcb   : > { %4809 = sst [smem:[#allocation67_spill]] %s2775_s15  ;;  %s2791_s2 = sld [smem:[#allocation8 + $0x41]] }
  0xcc   : > { %4810 = sst [smem:[#allocation68_spill]] %s2777_s18  ;;  %s2793_s16 = sld [smem:[#allocation8 + $0x45]] }
  0xcd   : > { %4811 = sst [smem:[#allocation69_spill]] %s2779_s4  ;;  %s2795_s28 = sld [smem:[#allocation8 + $0x4c]] }
  0xce   : > { %4812 = sst [smem:[#allocation70_spill]] %s2781_s27  ;;  %s2799_s18 = sld [smem:[#allocation8 + $0x47]] }
  0xcf   : > { %4813 = sst [smem:[#allocation71_spill]] %s2783_s19  ;;  %s2797_s15 = sld [smem:[#allocation8 + $0x46]] }
  0xd0   : > { %4814 = sst [smem:[#allocation72_spill]] %s2785_s7  ;;  %s2803_s27 = sld [smem:[#allocation8 + $0x49]] }
  0xd1   : > { %4815 = sst [smem:[#allocation73_spill]] %s2787_s5  ;;  %s2801_s4 = sld [smem:[#allocation8 + $0x48]] }
  0xd2   : > { %4816 = sst [smem:[#allocation74_spill]] %s2789_s3  ;;  %s2807_s7 = sld [smem:[#allocation8 + $0x4b]] }
  0xd3   : > { %4817 = sst [smem:[#allocation75_spill]] %s2791_s2  ;;  %s2805_s19 = sld [smem:[#allocation8 + $0x4a]] }
  0xd4   : > { %4818 = sst [smem:[#allocation76_spill]] %s2793_s16  ;;  %s2809_s5 = sld [smem:[#allocation8 + $0x4f]] }
  0xd5   : > { %4819 = sst [smem:[#allocation77_spill]] %s2795_s28  ;;  %s2811_s3 = sld [smem:[#allocation8 + $0x56]] }
  0xd6   : > { %4820 = sst [smem:[#allocation78_spill]] %s2797_s15  ;;  %s2813_s2 = sld [smem:[#allocation8 + $0x50]] }
  0xd7   : > { %4821 = sst [smem:[#allocation79_spill]] %s2799_s18  ;;  %s2815_s16 = sld [smem:[#allocation8 + $0x51]] }
  0xd8   : > { %4822 = sst [smem:[#allocation80_spill]] %s2801_s4  ;;  %s2817_s28 = sld [smem:[#allocation8 + $0x52]] }
  0xd9   : > { %4823 = sst [smem:[#allocation81_spill]] %s2803_s27  ;;  %s2819_s15 = sld [smem:[#allocation8 + $0x53]] }
  0xda   : > { %4824 = sst [smem:[#allocation82_spill]] %s2805_s19  ;;  %s2821_s18 = sld [smem:[#allocation8 + $0x54]] }
  0xdb   : > { %4825 = sst [smem:[#allocation83_spill]] %s2807_s7  ;;  %s2823_s4 = sld [smem:[#allocation8 + $0x55]] }
  0xdc   : > { %4826 = sst [smem:[#allocation84_spill]] %s2809_s5  ;;  %s2825_s27 = sld [smem:[#allocation8 + $0x59]] }
  0xdd   : > { %4827 = sst [smem:[#allocation85_spill]] %s2811_s3  ;;  %s2827_s19 = sld [smem:[#allocation8 + $0x60]]  ;;  %v593_v3 = vstv %s2815_s16 }
  0xde   : > { %4828 = sst [smem:[#allocation86_spill]] %s2813_s2  ;;  %s2829_s7 = sld [smem:[#allocation8 + $0x5a]] }
  0xdf   : > { %4829 = sst [smem:[#allocation87_spill]] %s2817_s28  ;;  %s2831_s5 = sld [smem:[#allocation8 + $0x5b]] }
  0xe0   : > { %4830 = sst [smem:[#allocation88_spill]] %s2819_s15  ;;  %s2833_s3 = sld [smem:[#allocation8 + $0x5c]] }
  0xe1   : > { %4831 = sst [smem:[#allocation89_spill]] %s2821_s18  ;;  %s2835_s2 = sld [smem:[#allocation8 + $0x5d]] }
  0xe2   : > { %4832 = sst [smem:[#allocation90_spill]] %s2823_s4  ;;  %s2837_s28 = sld [smem:[#allocation8 + $0x5e]] }
  0xe3   : > { %4833 = sst [smem:[#allocation91_spill]] %s2825_s27  ;;  %s2839_s15 = sld [smem:[#allocation8 + $0x5f]] }
  0xe4   : > { %4834 = sst [smem:[#allocation92_spill]] %s2827_s19  ;;  %s2841_s18 = sld [smem:[#allocation8 + $0x63]] }
  0xe5   : > { %4835 = sst [smem:[#allocation93_spill]] %s2829_s7  ;;  %s2843_s4 = sld [smem:[#allocation8 + $0x6a]] }
  0xe6   : > { %4836 = sst [smem:[#allocation94_spill]] %s2831_s5  ;;  %s2845_s27 = sld [smem:[#allocation8 + $0x64]] }
  0xe7   : > { %4837 = sst [smem:[#allocation95_spill]] %s2833_s3  ;;  %s2847_s19 = sld [smem:[#allocation8 + $0x65]] }
  0xe8   : > { %4838 = sst [smem:[#allocation96_spill]] %s2835_s2  ;;  %s2849_s7 = sld [smem:[#allocation8 + $0x66]] }
  0xe9   : > { %4839 = sst [smem:[#allocation97_spill]] %s2839_s15  ;;  %s2851_s3 = sld [smem:[#allocation8 + $0x67]] }
  0xea   : > { %4840 = sst [smem:[#allocation98_spill]] %s2841_s18  ;;  %s2853_s5 = sld [smem:[#allocation8 + $0x68]] }
  0xeb   : > { %4841 = sst [smem:[#allocation99_spill]] %s2843_s4  ;;  %s2855_s2 = sld [smem:[#allocation8 + $0x69]] }
  0xec   : > { %4842 = sst [smem:[#allocation100_spill]] %s2845_s27  ;;  %s2857_s15 = sld [smem:[#allocation8 + $0x6d]] }
  0xed   : > { %s2859_s4 = sld [smem:[#allocation8 + $0x74]]  ;;  %s2861_s27 = sld [smem:[#allocation8 + $0x6e]]  ;;  %v671_v25 = vstv %s2847_s19 }
  0xee   : > { %4843 = sst [smem:[#allocation101_spill]] %s2849_s7  ;;  %s2864_s18 = sld [smem:[#allocation8 + $0x6f]] }
  0xef   : > { %4844 = sst [smem:[#allocation102_spill]] %s2851_s3  ;;  %s2866_s7 = sld [smem:[#allocation8 + $0x70]] }
  0xf0   : > { %s2869_s3 = sld [smem:[#allocation8 + $0x71]]  ;;  %s2878_s30 = sld [smem:[#allocation8 + $0x77]] }
  0xf1   : > { %4845 = sst [smem:[#allocation103_spill]] %s2855_s2  ;;  %s2871_s2 = sld [smem:[#allocation8 + $0x72]] }
  0xf2   : > { %4846 = sst [smem:[#allocation104_spill]] %s2857_s15  ;;  %s2886_s10 = sld [smem:[#allocation8 + $0x7e]] }
  0xf3   : > { %4847 = sst [smem:[#allocation105_spill]] %s2859_s4  ;;  %s2876_s4 = sld [smem:[#allocation8 + $0x73]] }
  0xf4   : > { %4848 = sst [smem:[#allocation106_spill]] %s2861_s27  ;;  %s2896_s21 = sld [smem:[#allocation8 + $0x79]]  ;;  %v710_v18 = vstv %s2864_s18 }
  0xf5   : > { %4849 = sst [smem:[#allocation107_spill]] %s2866_s7  ;;  %s2898_s24 = sld [smem:[#allocation8 + $0x7a]] }
  0xf6   : > { %4850 = sst [smem:[#allocation108_spill]] %s2869_s3  ;;  %s2888_s3 = sld [smem:[#allocation8 + $0x78]] }
  0xf7   : > { %4853 = sst [smem:[#allocation111_spill]] %s2878_s30  ;;  %s2904_s22 = sld [smem:[#allocation8 + $0x7b]]  ;;  %v722_v55 = vstv %s2871_s2 }
  0xf8   : > { %4854 = sst [smem:[#allocation112_spill]] %s2886_s10  ;;  %s2906_s8 = sld [smem:[#allocation8 + $0x7c]] }
  0xf9   : > { %4852 = sst [smem:[#allocation110_spill]] %s2876_s4  ;;  %s4859_s11 = sld [smem:[#allocation47_spill]] }
  0xfa   : > { %s2916_s14 = sld [smem:[#allocation8 + $0x81]]  ;;  %s4864_s1 = sld [smem:[#allocation50_spill]]  ;;  %v749_v10 = vstv %s2896_s21 }
  0xfb   : > { %4856 = sst [smem:[#allocation114_spill]] %s2898_s24  ;;  %s2914_s24 = sld [smem:[#allocation8 + $0x7d]] }
  0xfc   : > { %4855 = sst [smem:[#allocation113_spill]] %s2888_s3  ;;  %s2926_s29 = sld [smem:[#allocation8 + $0x82]] }
  0xfd   : > { %4857 = sst [smem:[#allocation115_spill]] %s2904_s22  ;;  %s2924_s10 = sld [smem:[#allocation8 + $0x88]] }
  0xfe   : > { %s4870_s17 = sld [smem:[#allocation55_spill]]  ;;  %s2936_s12 = sld [smem:[#allocation8 + $0x84]]  ;;  %v761_v4 = vstv %s2906_s8 }
  0xff   : > { %v398_v30 = vstv %s4859_s11  ;;  %s4875_s0 = sld [smem:[#allocation58_spill]]  ;;  %s2944_s9 = sld [smem:[#allocation8 + $0x85]] }
 0x100   : > { %4863 = sst [smem:[#allocation116_spill]] %s2916_s14  ;;  %v410_v34 = vstv %s4864_s1  ;;  %s2946_s3 = sld [smem:[#allocation8 + $0x86]]  ;;  %v2957_v39 = vmul.f32 %v398_v30, %v2671_v0  ;;  %v683_v30 = vstv %s2853_s5 }
 0x101   : > { %4861 = sst [smem:[#allocation47_spill]] %s2914_s24  ;;  %s2934_s24 = sld [smem:[#allocation8 + $0x83]]  ;;  %v2967_v43 = vmul.f32 %v410_v34, %v2673_v1 }
 0x102   : > { %4869 = sst [smem:[#allocation117_spill]] %s2926_s29  ;;  %s4885_s20 = sld [smem:[#allocation63_spill]] }
 0x103   : > { %4867 = sst [smem:[#allocation50_spill]] %s2924_s10  ;;  %s2964_s22 = sld [smem:[#allocation8 + $0x8c]] }
 0x104   : > { %4874 = sst [smem:[#allocation118_spill]] %s2936_s12  ;;  %v437_v38 = vstv %s4870_s17  ;;  %s2952_s12 = sld [smem:[#allocation8 + $0x87]] }
 0x105   : > { %4877 = sst [smem:[#allocation58_spill]] %s2944_s9  ;;  %v449_v42 = vstv %s4875_s0  ;;  %s2974_s25 = sld [smem:[#allocation8 + $0x8e]]  ;;  %v2978_v48 = vmul.f32 %v437_v38, %v2671_v0  ;;  %v3074_v38 = vmul.f32 %v593_v3, %v2671_v0 }
 0x106   : > { %4879 = sst [smem:[#allocation119_spill]] %s2946_s3  ;;  %s2962_s9 = sld [smem:[#allocation8 + $0x92]]  ;;  %v2988_v52 = vmul.f32 %v449_v42, %v2673_v1 }
 0x107   : > { %4872 = sst [smem:[#allocation55_spill]] %s2934_s24  ;;  %s2954_s24 = sld [smem:[#allocation8 + $0x8b]] }
 0x108   : > { %s4890_s17 = sld [smem:[#allocation66_spill]]  ;;  %s4896_s0 = sld [smem:[#allocation71_spill]]  ;;  %v476_v50 = vstv %s4885_s20 }
 0x109   : > { %4889 = sst [smem:[#allocation122_spill]] %s2964_s22  ;;  %s2982_s22 = sld [smem:[#allocation8 + $0x8f]]  ;;  %v3005_v59 = vmul.f32 %v476_v50, %v2671_v0 }
 0x10a   : > { %4882 = sst [smem:[#allocation120_spill]] %s2952_s12  ;;  %s2972_s12 = sld [smem:[#allocation8 + $0x8d]] }
 0x10b   : > { %4895 = sst [smem:[#allocation123_spill]] %s2974_s25  ;;  %s2984_s29 = sld [smem:[#allocation8 + $0x90]] }
 0x10c   : > { %4887 = sst [smem:[#allocation63_spill]] %s2962_s9  ;;  %s4901_s11 = sld [smem:[#allocation74_spill]] }
 0x10d   : > { %4884 = sst [smem:[#allocation121_spill]] %s2954_s24  ;;  %s2992_s26 = sld [smem:[#allocation8 + $0x91]] }
 0x10e   : > { %v488_v54 = vstv %s4890_s17  ;;  %s2994_s3 = sld [smem:[#allocation8 + $0x95]]  ;;  %v515_v58 = vstv %s4896_s0  ;;  %s4911_s13 = sld [smem:[#allocation79_spill]]  ;;  %v263_v17 = vpop.permute.xlu0 %262 }
 0x10f   : > { %4898 = sst [smem:[#allocation71_spill]] %s2982_s22  ;;  %s3000_s22 = sld [smem:[#allocation8 + $0x9c]]  ;;  %v3015_v63 = vmul.f32 %v488_v54, %v2673_v1  ;;  %v3026_v14 = vmul.f32 %v515_v58, %v2671_v0  ;;  %v644_v58 = vstv %s2837_s28  ;;  %v3496_v16 = vsel %vm260_vm0, 0.0, %v263_v17 }
 0x110   : > { %4893 = sst [smem:[#allocation66_spill]] %s2972_s12  ;;  %s3012_s24 = sld [smem:[#allocation8 + $0x98]]  ;;  %v3111_v3 = vmul.f32 %v644_v58, %v2673_v1  ;;  %v3170_v58 = vmul.f32 %v749_v10, %v2671_v0 }
 0x111   : > { %4900 = sst [smem:[#allocation124_spill]] %s2984_s29  ;;  %s3002_s29 = sld [smem:[#allocation8 + $0x96]] }
 0x112   : > { %v527_v62 = vstv %s4901_s11  ;;  %s4915_s0 = sld [smem:[#allocation82_spill]]  ;;  %s3032_s12 = sld [smem:[#allocation8 + $0x9f]] }
 0x113   : > { %4903 = sst [smem:[#allocation74_spill]] %s2992_s26  ;;  %s4925_s20 = sld [smem:[#allocation89_spill]]  ;;  %v3036_v34 = vmul.f32 %v527_v62, %v2673_v1 }
 0x114   : > { %4905 = sst [smem:[#allocation125_spill]] %s2994_s3  ;;  %s3010_s3 = sld [smem:[#allocation8 + $0x97]]  ;;  %v554_v22 = vstv %s4911_s13 }
 0x115   : > { %4908 = sst [smem:[#allocation126_spill]] %s3000_s22  ;;  %s3022_s10 = sld [smem:[#allocation8 + $0x9a]]  ;;  %v3053_v62 = vmul.f32 %v554_v22, %v2671_v0  ;;  %v3132_v22 = vmul.f32 %v683_v30, %v2673_v1  ;;  %v3149_v30 = vmul.f32 %v710_v18, %v2671_v0 }
 0x116   : > { %4914 = sst [smem:[#allocation79_spill]] %s3012_s24  ;;  %s3030_s24 = sld [smem:[#allocation8 + $0x9b]] }
 0x117   : > { %4910 = sst [smem:[#allocation127_spill]] %s3002_s29  ;;  %s3020_s29 = sld [smem:[#allocation8 + $0x99]] }
 0x118   : > { %4924 = sst [smem:[#allocation130_spill]] %s3032_s12  ;;  %v566_v42 = vstv %s4915_s0  ;;  %s3040_s23 = sld [smem:[#allocation8 + $0xa6]] }
 0x119   : > { %s3042_s26 = sld [smem:[#allocation8 + $0xa0]]  ;;  %s3048_s12 = sld [smem:[#allocation8 + $0xa1]]  ;;  %v605_v45 = vstv %s4925_s20  ;;  %v3063_v50 = vmul.f32 %v566_v42, %v2673_v1  ;;  %v3122_v42 = vmul.f32 %v671_v25, %v2671_v0  ;;  %v3159_v25 = vmul.f32 %v722_v55, %v2673_v1 }
 0x11a   : > { %s4934_s6 = sld [smem:[#allocation94_spill]]  ;;  %s3060_s22 = sld [smem:[#allocation8 + $0xa4]]  ;;  %v3084_v54 = vmul.f32 %v605_v45, %v2673_v1  ;;  %v866_v49 = vstv %s3010_s3 }
 0x11b   : > { %4920 = sst [smem:[#allocation128_spill]] %s3022_s10  ;;  %s3070_s25 = sld [smem:[#allocation8 + $0xa9]] }
 0x11c   : > { %4922 = sst [smem:[#allocation129_spill]] %s3030_s24  ;;  %s3050_s24 = sld [smem:[#allocation8 + $0xa2]] }
 0x11d   : > { %4918 = sst [smem:[#allocation82_spill]] %s3020_s29  ;;  %s3088_s1 = sld [smem:[#allocation8 + $0xab]] }
 0x11e   : > { %4927 = sst [smem:[#allocation89_spill]] %s3040_s23  ;;  %s3058_s23 = sld [smem:[#allocation8 + $0xa3]] }
 0x11f   : > { %4929 = sst [smem:[#allocation131_spill]] %s3042_s26  ;;  %s3106_s14 = sld [smem:[#allocation8 + $0xaf]]  ;;  %v905_v44 = vstv %s3048_s12 }
 0x120   : > { %v632_v2 = vstv %s4934_s6  ;;  %s3080_s10 = sld [smem:[#allocation8 + $0xaa]]  ;;  %s3108_s9 = sld [smem:[#allocation8 + $0xb3]]  ;;  %v917_v47 = vstv %s3060_s22 }
 0x121   : > { %4942 = sst [smem:[#allocation134_spill]] %s3070_s25  ;;  %v3101_v45 = vmul.f32 %v632_v2, %v2671_v0  ;;  %s3116_s19 = sld [smem:[#allocation8 + $0xba]]  ;;  %v3180_v2 = vmul.f32 %v761_v4, %v2673_v1 }
 0x122   : > { %4933 = sst [smem:[#allocation132_spill]] %s3050_s24  ;;  %s3068_s24 = sld [smem:[#allocation8 + $0xa5]] }
 0x123   : > { %s3118_s29 = sld [smem:[#allocation8 + $0xb4]]  ;;  %s3126_s5 = sld [smem:[#allocation8 + $0xb5]]  ;;  %v944_v40 = vstv %s3088_s1 }
 0x124   : > { %4936 = sst [smem:[#allocation94_spill]] %s3058_s23  ;;  %s3078_s23 = sld [smem:[#allocation8 + $0xb0]] }
 0x125   : > { %4955 = sst [smem:[#allocation139_spill]] %s3106_s14  ;;  %s3128_s25 = sld [smem:[#allocation8 + $0xb6]] }
 0x126   : > { %4946 = sst [smem:[#allocation136_spill]] %s3080_s10  ;;  %s3098_s10 = sld [smem:[#allocation8 + $0xae]] }
 0x127   : > { %4957 = sst [smem:[#allocation140_spill]] %s3108_s9  ;;  %s3136_s17 = sld [smem:[#allocation8 + $0xb7]] }
 0x128   : > { %4940 = sst [smem:[#allocation133_spill]] %s3068_s24  ;;  %s3138_s6 = sld [smem:[#allocation8 + $0xb8]] }
 0x129   : > { %s3090_s24 = sld [smem:[#allocation8 + $0xac]]  ;;  %4960 = sst [smem:[#allocation142_spill]] %s3118_s29  ;;  %v983_v24 = vstv %s3126_s5 }
 0x12a   : > { %4944 = sst [smem:[#allocation135_spill]] %s3078_s23  ;;  %s3096_s23 = sld [smem:[#allocation8 + $0xad]] }
 0x12b   : > { %4958 = sst [smem:[#allocation141_spill]] %s3116_s19  ;;  %s3144_s20 = sld [smem:[#allocation8 + $0xb9]] }
 0x12c   : > { %4962 = sst [smem:[#allocation143_spill]] %s3128_s25  ;;  %s3146_s25 = sld [smem:[#allocation8 + $0xbd]]  ;;  %v956_v33 = vstv %s3098_s10 }
 0x12d   : > { %4963 = sst [smem:[#allocation144_spill]] %s3136_s17  ;;  %s3154_s17 = sld [smem:[#allocation8 + $0xc4]] }
 0x12e   : > { %s4969_s16 = sld [smem:[#allocation55_spill]]  ;;  %s3156_s27 = sld [smem:[#allocation8 + $0xbe]]  ;;  %v995_v29 = vstv %s3138_s6 }
 0x12f   : > { %4949 = sst [smem:[#allocation137_spill]] %s3090_s24  ;;  %s4974_s21 = sld [smem:[#allocation119_spill]]  ;;  %v3324_v18 = vmul.f32 %v995_v29, %v2673_v1 }
 0x130   : > { %4952 = sst [smem:[#allocation138_spill]] %s3096_s23  ;;  %s3166_s13 = sld [smem:[#allocation8 + $0xc0]] }
 0x131   : > { %4966 = sst [smem:[#allocation145_spill]] %s3144_s20  ;;  %s3164_s20 = sld [smem:[#allocation8 + $0xbf]]  ;;  %5043 = vst [vmem:[#allocation169_spill] sm:$0xff] %v3324_v18 }
 0x132   : > { %4968 = sst [smem:[#allocation146_spill]] %s3146_s25  ;;  %s4980_s8 = sld [smem:[#allocation66_spill]] }
 0x133   : > { %4971 = sst [smem:[#allocation55_spill]] %s3154_s17  ;;  %s3176_s30 = sld [smem:[#allocation8 + $0xc2]] }
 0x134   : > { %4973 = sst [smem:[#allocation147_spill]] %s3156_s27  ;;  %v788_v57 = vstv %s4969_s16  ;;  %s3174_s27 = sld [smem:[#allocation8 + $0xc1]] }
 0x135   : > { %s4985_s18 = sld [smem:[#allocation124_spill]]  ;;  %v800_v61 = vstv %s4974_s21  ;;  %s3186_s19 = sld [smem:[#allocation8 + $0xc7]]  ;;  %v3197_v4 = vmul.f32 %v788_v57, %v2671_v0  ;;  %v3276_v57 = vmul.f32 %v917_v47, %v2673_v1  ;;  %v3293_v47 = vmul.f32 %v944_v40, %v2671_v0 }
 0x136   : > { %4979 = sst [smem:[#allocation148_spill]] %s3166_s13  ;;  %s3202_s15 = sld [smem:[#allocation8 + $0xc9]]  ;;  %v3207_v10 = vmul.f32 %v800_v61, %v2673_v1  ;;  %v3266_v61 = vmul.f32 %v905_v44, %v2671_v0  ;;  %v3303_v44 = vmul.f32 %v956_v33, %v2673_v1 }
 0x137   : > { %4977 = sst [smem:[#allocation119_spill]] %s3164_s20  ;;  %s3184_s0 = sld [smem:[#allocation8 + $0xc3]]  ;;  %5024 = vst [vmem:[#allocation164_spill] sm:$0xff] %v3276_v57 }
 0x138   : > { %v827_v60 = vstv %s4980_s8  ;;  %s3204_s25 = sld [smem:[#allocation8 + $0xca]]  ;;  %s4998_s8 = sld [smem:[#allocation128_spill]]  ;;  %5034 = vst [vmem:[#allocation167_spill] sm:$0xff] %v3303_v44 }
 0x139   : > { %4984 = sst [smem:[#allocation149_spill]] %s3176_s30  ;;  %s3194_s30 = sld [smem:[#allocation8 + $0xc8]]  ;;  %v3218_v55 = vmul.f32 %v827_v60, %v2671_v0 }
 0x13a   : > { %4982 = sst [smem:[#allocation66_spill]] %s3174_s27  ;;  %s3192_s27 = sld [smem:[#allocation8 + $0xce]] }
 0x13b   : > { %4989 = sst [smem:[#allocation150_spill]] %s3186_s19  ;;  %v839_v53 = vstv %s4985_s18  ;;  %s3214_s4 = sld [smem:[#allocation8 + $0xcc]] }
 0x13c   : > { %s3224_s20 = sld [smem:[#allocation8 + $0xd1]]  ;;  %v3228_v15 = vmul.f32 %v839_v53, %v2673_v1  ;;  %s3232_s28 = sld [smem:[#allocation8 + $0xd8]]  ;;  %v3245_v53 = vmul.f32 %v866_v49, %v2671_v0  ;;  %v1061_v51 = vstv %s3202_s15 }
 0x13d   : > { %4987 = sst [smem:[#allocation124_spill]] %s3184_s0  ;;  %s3234_s19 = sld [smem:[#allocation8 + $0xd2]]  ;;  %v3362_v33 = vmul.f32 %v1061_v51, %v2671_v0 }
 0x13e   : > { %4997 = sst [smem:[#allocation153_spill]] %s3204_s25  ;;  %s3222_s25 = sld [smem:[#allocation8 + $0xcd]]  ;;  %v878_v56 = vstv %s4998_s8 }
 0x13f   : > { %4994 = sst [smem:[#allocation152_spill]] %s3194_s30  ;;  %s3212_s30 = sld [smem:[#allocation8 + $0xcb]]  ;;  %v3255_v60 = vmul.f32 %v878_v56, %v2673_v1  ;;  %v3314_v56 = vmul.f32 %v983_v24, %v2671_v0  ;;  %5053 = vst [vmem:[#allocation173_spill] sm:$0xff] %v3362_v33 }
 0x140   : > { %4992 = sst [smem:[#allocation151_spill]] %s3192_s27  ;;  %s3240_s2 = sld [smem:[#allocation8 + $0xd3]] }
 0x141   : > { %s3250_s11 = sld [smem:[#allocation8 + $0xd5]]  ;;  %s3252_s27 = sld [smem:[#allocation8 + $0xd6]]  ;;  %v1073_v9 = vstv %s3214_s4 }
 0x142   : > { %5006 = sst [smem:[#allocation155_spill]] %s3224_s20  ;;  %s3242_s20 = sld [smem:[#allocation8 + $0xd4]]  ;;  %v3372_v35 = vmul.f32 %v1073_v9, %v2673_v1 }
 0x143   : > { %5008 = sst [smem:[#allocation156_spill]] %s3232_s28  ;;  %s3270_s22 = sld [smem:[#allocation8 + $0xe2]] }
 0x144   : > { %5004 = sst [smem:[#allocation154_spill]] %s3222_s25  ;;  %s3262_s13 = sld [smem:[#allocation8 + $0xdb]]  ;;  %5055 = vst [vmem:[#allocation174_spill] sm:$0xff] %v3372_v35 }
 0x145   : > { %5001 = sst [smem:[#allocation128_spill]] %s3212_s30  ;;  %s3272_s30 = sld [smem:[#allocation8 + $0xdc]] }
 0x146   : > { %5010 = sst [smem:[#allocation157_spill]] %s3234_s19  ;;  %s3280_s3 = sld [smem:[#allocation8 + $0xdd]]  ;;  %v1100_v27 = vstv %s3240_s2 }
 0x147   : > { %5015 = sst [smem:[#allocation159_spill]] %s3250_s11  ;;  %s3288_s21 = sld [smem:[#allocation8 + $0xdf]]  ;;  %v1112_v37 = vstv %s3252_s27  ;;  %v3389_v9 = vmul.f32 %v1100_v27, %v2671_v0 }
 0x148   : > { %5013 = sst [smem:[#allocation158_spill]] %s3242_s20  ;;  %s3260_s20 = sld [smem:[#allocation8 + $0xd7]]  ;;  %v3399_v51 = vmul.f32 %v1112_v37, %v2673_v1 }
 0x149   : > { %5022 = sst [smem:[#allocation162_spill]] %s3270_s22  ;;  %s3282_s16 = sld [smem:[#allocation8 + $0xde]]  ;;  %5059 = vst [vmem:[#allocation176_spill] sm:$0xff] %v3389_v9 }
 0x14a   : > { %5021 = sst [smem:[#allocation161_spill]] %s3262_s13  ;;  %s5029_s7 = sld [smem:[#allocation119_spill]]  ;;  %5062 = vst [vmem:[#allocation177_spill] sm:$0xff] %v3399_v51 }
 0x14b   : > { %5023 = sst [smem:[#allocation163_spill]] %s3272_s30  ;;  %s3290_s26 = sld [smem:[#allocation8 + $0xe0]] }
 0x14c   : > { %s3300_s17 = sld [smem:[#allocation8 + $0xe5]]  ;;  %s5033_s5 = sld [smem:[#allocation149_spill]]  ;;  %v1139_v46 = vstv %s3280_s3 }
 0x14d   : > { %5027 = sst [smem:[#allocation166_spill]] %s3288_s21  ;;  %s5036_s21 = sld [smem:[#allocation147_spill]] }
 0x14e   : > { %5019 = sst [smem:[#allocation160_spill]] %s3260_s20  ;;  %s3308_s22 = sld [smem:[#allocation8 + $0xec]] }
 0x14f   : > { %5025 = sst [smem:[#allocation165_spill]] %s3282_s16  ;;  %s3298_s16 = sld [smem:[#allocation8 + $0xe1]] }
 0x150   : > { %s3310_s23 = sld [smem:[#allocation8 + $0xe6]]  ;;  %v1022_v13 = vstv %s5029_s7  ;;  %s3320_s9 = sld [smem:[#allocation8 + $0xe8]] }
 0x151   : > { %s3328_s1 = sld [smem:[#allocation8 + $0xe9]]  ;;  %v3341_v29 = vmul.f32 %v1022_v13, %v2671_v0  ;;  %s3346_s12 = sld [smem:[#allocation8 + $0xf6]]  ;;  %v1151_v41 = vstv %s3290_s26 }
 0x152   : > { %5032 = sst [smem:[#allocation119_spill]] %s3300_s17  ;;  %s3318_s17 = sld [smem:[#allocation8 + $0xe7]]  ;;  %v1034_v20 = vstv %s5033_s5  ;;  %v3421_v49 = vmul.f32 %v1151_v41, %v2673_v1 }
 0x153   : > { %5049 = vst [vmem:[#allocation171_spill] sm:$0xff] %v3341_v29  ;;  %s3348_s18 = sld [smem:[#allocation8 + $0xf0]]  ;;  %v3351_v24 = vmul.f32 %v1034_v20, %v2673_v1  ;;  %s3356_s24 = sld [smem:[#allocation8 + $0xf1]]  ;;  %v3411_v20 = vmul.f32 %v1139_v46, %v2671_v0 }
 0x154   : > { %5037 = sst [smem:[#allocation149_spill]] %s3308_s22  ;;  %s3330_s22 = sld [smem:[#allocation8 + $0xea]]  ;;  %5072 = vst [vmem:[#allocation180_spill] sm:$0xff] %v3421_v49 }
 0x155   : > { %5051 = vst [vmem:[#allocation172_spill] sm:$0xff] %v3351_v24  ;;  %s3358_s14 = sld [smem:[#allocation8 + $0xf2]]  ;;  %s3366_s6 = sld [smem:[#allocation8 + $0xf3]]  ;;  %5069 = vst [vmem:[#allocation179_spill] sm:$0xff] %v3411_v20 }
 0x156   : > { %5039 = sst [smem:[#allocation147_spill]] %s3310_s23  ;;  %s3338_s23 = sld [smem:[#allocation8 + $0xef]] }
 0x157   : > { %5042 = sst [smem:[#allocation168_spill]] %s3320_s9  ;;  %s3336_s9 = sld [smem:[#allocation8 + $0xeb]] }
 0x158   : > { %s3368_s29 = sld [smem:[#allocation8 + $0xf4]]  ;;  %s3376_s0 = sld [smem:[#allocation8 + $0xf5]]  ;;  %v1178_v40 = vstv %s3318_s17 }
 0x159   : > { %s3378_s8 = sld [smem:[#allocation8 + $0x100]]  ;;  %s3384_s10 = sld [smem:[#allocation8 + $0xfa]]  ;;  %v3438_v41 = vmul.f32 %v1178_v40, %v2671_v0  ;;  %v1217_v13 = vstv %s3356_s24 }
 0x15a   : > { %s3386_s5 = sld [smem:[#allocation8 + $0xfb]]  ;;  %s3394_s25 = sld [smem:[#allocation8 + $0xfc]]  ;;  %v1190_v7 = vstv %s3330_s22 }
 0x15b   : > { %s5058_s7 = sld [smem:[#allocation165_spill]]  ;;  %s3396_s15 = sld [smem:[#allocation8 + $0xfe]]  ;;  %5075 = vst [vmem:[#allocation183_spill] sm:$0xff] %v3438_v41  ;;  %v3447_v46 = vmul.f32 %v1190_v7, %v2673_v1  ;;  %v3463_v7 = vmul.f32 %v1217_v13, %v2671_v0 }
 0x15c   : > { %5048 = sst [smem:[#allocation170_spill]] %s3338_s23  ;;  %s3404_s28 = sld [smem:[#allocation8 + $0xfd]] }
 0x15d   : > { %s5065_s19 = sld [smem:[#allocation147_spill]]  ;;  %s3406_s4 = sld [smem:[#allocation8 + $0xff]]  ;;  %5077 = vst [vmem:[#allocation185_spill] sm:$0xff] %v3447_v46  ;;  %5079 = vst [vmem:[#allocation187_spill] sm:$0xff] %v3463_v7  ;;  %v266_v7 = vpop.permute.xlu0 %265 }
 0x15e   : > { %5056 = sst [smem:[#allocation175_spill]] %s3376_s0  ;;  %s5067_s26 = sld [smem:[#allocation149_spill]]  ;;  %v1229_v31 = vstv %s3368_s29 }
 0x15f   : > { %s5068_s11 = sld [smem:[#allocation168_spill]]  ;;  %s3415_s20 = sld [smem:[#allocation8 + $0x10a]]  ;;  %v3467_v36 = vmul.f32 %v1229_v31, %v2673_v1 }
 0x160   : > { %5061 = sst [smem:[#allocation165_spill]] %s3394_s25  ;;  %s3417_s13 = sld [smem:[#allocation8 + $0x104]]  ;;  %v1256_v26 = vstv %s3386_s5 }
 0x161   : > { %s3425_s2 = sld [smem:[#allocation8 + $0x105]]  ;;  %s3427_s30 = sld [smem:[#allocation8 + $0x106]]  ;;  %v1268_v21 = vstv %s3396_s15  ;;  %5080 = vst [vmem:[#allocation188_spill] sm:$0xff] %v3467_v36  ;;  %v3475_v6 = vmul.f32 %v1256_v26, %v2671_v0  ;;  %v269_v26 = vpop.permute.xlu1 %268 }
 0x162   : > { %5064 = sst [smem:[#allocation178_spill]] %s3404_s28  ;;  %s3433_s17 = sld [smem:[#allocation8 + $0x107]]  ;;  %v3479_v13 = vmul.f32 %v1268_v21, %v2673_v1  ;;  %v3500_v27 = vsel %vm260_vm0, 0.0, %v269_v26 }
 0x163   : > { %5066 = sst [smem:[#allocation147_spill]] %s3406_s4  ;;  %s3435_s27 = sld [smem:[#allocation8 + $0x108]]  ;;  %5081 = vst [vmem:[#allocation189_spill] sm:$0xff] %v3475_v6 }
 0x164   : > { %s3443_s22 = sld [smem:[#allocation8 + $0x109]]  ;;  %s3452_s3 = sld [smem:[#allocation8 + $0x114]]  ;;  %5082 = vst [vmem:[#allocation190_spill] sm:$0xff] %v3479_v13 }
 0x165   : > { %5070 = sst [smem:[#allocation149_spill]] %s3415_s20  ;;  %s3454_s24 = sld [smem:[#allocation8 + $0x10e]]  ;;  %v272_v49 = vpop.permute.xlu1 %271 }
 0x166   : > { %5071 = sst [smem:[#allocation168_spill]] %s3417_s13  ;;  %s3460_s29 = sld [smem:[#allocation8 + $0x10f]] }
 0x167   : > { %5073 = sst [smem:[#allocation181_spill]] %s3427_s30  ;;  %v1295_v11 = vstv %s3425_s2  ;;  %s5083_s5 = sld [smem:[#allocation28_spill]] }
 0x168   : > { %5074 = sst [smem:[#allocation182_spill]] %s3433_s17  ;;  %s5084_s15 = sld [smem:[#allocation30_spill]]  ;;  %v3487_v46 = vmul.f32 %v1295_v11, %v2671_v0 }
 0x169   : > { %v1307_v37 = vstv %s3435_s27  ;;  %s5085_s23 = sld [smem:[#allocation34_spill]]  ;;  %s5086_s0 = sld [smem:[#allocation36_spill]] }
 0x16a   : > { %5076 = sst [smem:[#allocation184_spill]] %s3443_s22  ;;  %s5087_s2 = sld [smem:[#allocation40_spill]]  ;;  %5090 = vst [vmem:[#allocation191_spill] sm:$0xff] %v3487_v46  ;;  %v3491_v13 = vmul.f32 %v1307_v37, %v2673_v1 }
 0x16b   : > { %5078 = sst [smem:[#allocation186_spill]] %s3452_s3  ;;  %s5088_s25 = sld [smem:[#allocation42_spill]] }
 0x16c   : > { %s5089_s28 = sld [smem:[#allocation46_spill]]  ;;  %5091 = vst [vmem:[#allocation192_spill] sm:$0xff] %v3491_v13  ;;  %s5092_s27 = sld [smem:[#allocation27_spill]] }
 0x16d   : > { %s5093_s4 = sld [smem:[#allocation33_spill]]  ;;  %s5095_s30 = sld [smem:[#allocation54_spill]]  ;;  %v5096_v11 = vstv %s5083_s5 }
 0x16e   : > { %s5094_s20 = sld [smem:[#allocation49_spill]]  ;;  %v277_v21 = vmul.f32 %v5096_v11, %v3496_v16  ;;  %v5097_v1 = vstv %s5084_s15  ;;  %s5098_s17 = sld [smem:[#allocation39_spill]] }
 0x16f   : > { %v290_v37 = vmul.f32 %v5097_v1, %v3500_v27  ;;  %v5099_v31 = vstv %s5085_s23  ;;  %s5100_s22 = sld [smem:[#allocation45_spill]]  ;;  %v5101_v46 = vstv %s5086_s0  ;;  %s5105_s5 = sld [smem:[#allocation57_spill]] }
 0x170   : > { %v316_v17 = vmul.f32 %v5099_v31, %v3496_v16  ;;  %s5102_s13 = sld [smem:[#allocation29_spill]]  ;;  %v329_v26 = vmul.f32 %v5101_v46, %v3500_v27  ;;  %v5103_v36 = vstv %s5087_s2  ;;  %s5107_s15 = sld [smem:[#allocation31_spill]] }
 0x171   : > { %v355_v40 = vmul.f32 %v5103_v36, %v3496_v16  ;;  %v5104_v0 = vstv %s5088_s25  ;;  %s5108_s3 = sld [smem:[#allocation35_spill]]  ;;  %s5110_s23 = sld [smem:[#allocation41_spill]] }
 0x172   : > { %v368_v11 = vmul.f32 %v5104_v0, %v3500_v27  ;;  %v5106_v6 = vstv %s5089_s28  ;;  %v5109_v31 = vstv %s5092_s27  ;;  %s5113_s0 = sld [smem:[#allocation37_spill]]  ;;  %s5115_s25 = sld [smem:[#allocation48_spill]]  ;;  %v3538_v0 = vsel %vm261_vm1, 0.0, %v266_v7 }
 0x173   : > { %v394_v1 = vmul.f32 %v5106_v6, %v3496_v16  ;;  %v279_v13 = vadd.f32 %v5109_v31, %v277_v21  ;;  %v5111_v41 = vstv %s5093_s4  ;;  %v5114_v20 = vstv %s5095_s30  ;;  %s5118_s28 = sld [smem:[#allocation43_spill]]  ;;  %s5124_s4 = sld [smem:[#allocation56_spill]] }
 0x174   : > { %v318_v51 = vadd.f32 %v5111_v41, %v316_v17  ;;  %v5112_v46 = vstv %s5094_s20  ;;  %v433_v35 = vmul.f32 %v5114_v20, %v3496_v16  ;;  %v3542_v6 = vsel %vm261_vm1, 0.0, %v272_v49  ;;  %s5119_s20 = sld [smem:[#allocation53_spill]]  ;;  %s5122_s30 = sld [smem:[#allocation51_spill]] }
 0x175   : > { %v407_v36 = vmul.f32 %v5112_v46, %v3500_v27  ;;  %v5116_v9 = vstv %s5098_s17  ;;  %v5117_v31 = vstv %s5100_s22  ;;  %v283_v17 = vadd.f32 %v2882_v8, %v279_v13  ;;  %s5130_s17 = sld [smem:[#allocation59_spill]]  ;;  %s5131_s22 = sld [smem:[#allocation64_spill]] }
 0x176   : > { %v357_v21 = vadd.f32 %v5116_v9, %v355_v40  ;;  %v396_v41 = vadd.f32 %v5117_v31, %v394_v1  ;;  %v5120_v46 = vstv %s5102_s13  ;;  %v322_v24 = vadd.f32 %v2909_v19, %v318_v51  ;;  %s5127_s13 = sld [smem:[#allocation62_spill]]  ;;  %s5137_s2 = sld [smem:[#allocation65_spill]] }
 0x177   : > { %v286_v20 = vmul.f32 %v5120_v46, %v3538_v0  ;;  %v5121_v7 = vstv %s5105_s5  ;;  %v5123_v49 = vstv %s5107_s15  ;;  %v5125_v9 = vstv %s5108_s3  ;;  %s5134_s3 = sld [smem:[#allocation61_spill]]  ;;  %s5138_s27 = sld [smem:[#allocation70_spill]] }
 0x178   : > { %v446_v33 = vmul.f32 %v5121_v7, %v3500_v27  ;;  %v298_v5 = vmul.f32 %v5123_v49, %v3542_v6  ;;  %v325_v40 = vmul.f32 %v5125_v9, %v3538_v0  ;;  %v361_v1 = vadd.f32 %v2930_v28, %v357_v21  ;;  %s5142_s5 = sld [smem:[#allocation69_spill]]  ;;  %s5143_s15 = sld [smem:[#allocation72_spill]] }
 0x179   : > { %v5126_v8 = vstv %s5110_s23  ;;  %v287_v31 = vadd.f32 %v286_v20, %v283_v17  ;;  %v5128_v19 = vstv %s5113_s0  ;;  %v400_v46 = vadd.f32 %v2957_v39, %v396_v41  ;;  %s5145_s23 = sld [smem:[#allocation32_spill]]  ;;  %s5148_s0 = sld [smem:[#allocation73_spill]] }
 0x17a   : > { %v364_v13 = vmul.f32 %v5126_v8, %v3538_v0  ;;  %v337_v51 = vmul.f32 %v5128_v19, %v3542_v6  ;;  %v5129_v7 = vstv %s5115_s25  ;;  %v326_v49 = vadd.f32 %v325_v40, %v322_v24  ;;  %s5149_s25 = sld [smem:[#allocation38_spill]] }
 0x17b   : > { %v403_v18 = vmul.f32 %v5129_v7, %v3538_v0  ;;  %v5132_v9 = vstv %s5118_s28  ;;  %v5133_v21 = vstv %s5119_s20  ;;  %v291_v8 = vadd.f32 %v290_v37, %v287_v31  ;;  %s5150_s28 = sld [smem:[#allocation67_spill]]  ;;  %s5151_s20 = sld [smem:[#allocation44_spill]] }
 0x17c   : > { %v365_v29 = vadd.f32 %v364_v13, %v361_v1  ;;  %v376_v28 = vmul.f32 %v5132_v9, %v3542_v6  ;;  %v435_v44 = vadd.f32 %v5133_v21, %v433_v35  ;;  %v5135_v20 = vstv %s5122_s30  ;;  %s5153_s30 = sld [smem:[#allocation52_spill]] }
 0x17d   : > { %v404_v17 = vadd.f32 %v403_v18, %v400_v46  ;;  %v415_v19 = vmul.f32 %v5135_v20, %v3542_v6  ;;  %v5136_v39 = vstv %s5124_s4  ;;  %v330_v7 = vadd.f32 %v329_v26, %v326_v49  ;;  %s5155_s4 = sld [smem:[#allocation78_spill]] }
 0x17e   : > { %v442_v41 = vmul.f32 %v5136_v39, %v3538_v0  ;;  %v369_v57 = vadd.f32 %v368_v11, %v365_v29  ;;  %v439_v24 = vadd.f32 %v2978_v48, %v435_v44  ;;  %v5139_v40 = vstv %s5127_s13  ;;  %s5157_s13 = sld [smem:[#allocation75_spill]] }
 0x17f   : > { %v472_v1 = vmul.f32 %v5139_v40, %v3496_v16  ;;  %v295_v35 = vadd.f32 %v2892_v12, %v291_v8  ;;  %v408_v13 = vadd.f32 %v407_v36, %v404_v17  ;;  %v5140_v18 = vstv %s5130_s17  ;;  %s5158_s17 = sld [smem:[#allocation77_spill]] }
 0x180   : > { %v454_v37 = vmul.f32 %v5140_v18, %v3542_v6  ;;  %v5141_v31 = vstv %s5131_s22  ;;  %v334_v9 = vadd.f32 %v2919_v23, %v330_v7  ;;  %v373_v29 = vadd.f32 %v2940_v32, %v369_v57  ;;  %s5160_s22 = sld [smem:[#allocation80_spill]] }
 0x181   : > { %v481_v46 = vmul.f32 %v5141_v31, %v3538_v0  ;;  %v443_v26 = vadd.f32 %v442_v41, %v439_v24  ;;  %v5144_v48 = vstv %s5134_s3  ;;  %v299_v11 = vadd.f32 %v298_v5, %v295_v35  ;;  %s5162_s3 = sld [smem:[#allocation81_spill]] }
 0x182   : > { %v474_v44 = vadd.f32 %v5144_v48, %v472_v1  ;;  %v412_v12 = vadd.f32 %v2967_v43, %v408_v13  ;;  %v5146_v36 = vstv %s5137_s2  ;;  %v5147_v21 = vstv %s5138_s27  ;;  %s5164_s2 = sld [smem:[#allocation83_spill]]  ;;  %s5166_s27 = sld [smem:[#allocation86_spill]] }
 0x183   : > { %v485_v49 = vmul.f32 %v5146_v36, %v3500_v27  ;;  %v511_v8 = vmul.f32 %v5147_v21, %v3496_v16  ;;  %v338_v17 = vadd.f32 %v337_v51, %v334_v9  ;;  %v377_v20 = vadd.f32 %v376_v28, %v373_v29 }
 0x184   : > { %v447_v23 = vadd.f32 %v446_v33, %v443_v26  ;;  %v478_v32 = vadd.f32 %v3005_v59, %v474_v44  ;;  %v3607_v57 = vmax.f32 %v299_v11, 0.0  ;;  %v416_v5 = vadd.f32 %v415_v19, %v412_v12 }
 0x185   : > { %v5152_v39 = vstv %s5142_s5  ;;  %v5154_v41 = vstv %s5143_s15  ;;  %v3614_v24 = vmax.f32 %v338_v17, 0.0  ;;  %v3616_v51 = vmax.f32 %v377_v20, 0.0  ;;  %s5168_s5 = sld [smem:[#allocation60_spill]]  ;;  %s5170_s15 = sld [smem:[#allocation87_spill]] }
 0x186   : > { %v513_v43 = vadd.f32 %v5152_v39, %v511_v8  ;;  %v520_v7 = vmul.f32 %v5154_v41, %v3538_v0  ;;  %v451_v33 = vadd.f32 %v2988_v52, %v447_v23  ;;  %v482_v28 = vadd.f32 %v481_v46, %v478_v32 }
 0x187   : > { %v5156_v59 = vstv %s5145_s23  ;;  %v3622_v1 = vmax.f32 %v416_v5, 0.0  ;;  %v5159_v35 = vstv %s5148_s0  ;;  %v5161_v18 = vstv %s5149_s25  ;;  %s5172_s23 = sld [smem:[#allocation85_spill]]  ;;  %s5173_s0 = sld [smem:[#allocation88_spill]] }
 0x188   : > { %v311_v40 = vmul.f32 %v5156_v59, %v3607_v57  ;;  %v517_v19 = vadd.f32 %v3026_v14, %v513_v43  ;;  %v524_v13 = vmul.f32 %v5159_v35, %v3500_v27  ;;  %v350_v31 = vmul.f32 %v5161_v18, %v3614_v24  ;;  %s5177_s25 = sld [smem:[#allocation90_spill]] }
 0x189   : > { %v455_v9 = vadd.f32 %v454_v37, %v451_v33  ;;  %v486_v52 = vadd.f32 %v485_v49, %v482_v28  ;;  %v5163_v46 = vstv %s5150_s28  ;;  %v5165_v26 = vstv %s5151_s20  ;;  %s5178_s28 = sld [smem:[#allocation93_spill]]  ;;  %s5180_s20 = sld [smem:[#allocation68_spill]] }
 0x18a   : > { %v493_v29 = vmul.f32 %v5163_v46, %v3542_v6  ;;  %v389_v48 = vmul.f32 %v5165_v26, %v3616_v51  ;;  %v5167_v14 = vstv %s5153_s30  ;;  %v521_v11 = vadd.f32 %v520_v7, %v517_v19  ;;  %s5183_s30 = sld [smem:[#allocation95_spill]] }
 0x18b   : > { %v428_v44 = vmul.f32 %v5167_v14, %v3622_v1  ;;  %v5169_v12 = vstv %s5155_s4  ;;  %v351_v21 = vadd.f32 %v350_v31, %v311_v40  ;;  %v3643_v37 = vmax.f32 %v455_v9, 0.0  ;;  %s5185_s4 = sld [smem:[#allocation92_spill]] }
 0x18c   : > { %v550_v36 = vmul.f32 %v5169_v12, %v3496_v16  ;;  %v490_v49 = vadd.f32 %v3015_v63, %v486_v52  ;;  %v5171_v8 = vstv %s5157_s13  ;;  %v525_v20 = vadd.f32 %v524_v13, %v521_v11  ;;  %s5186_s13 = sld [smem:[#allocation96_spill]] }
 0x18d   : > { %v532_v17 = vmul.f32 %v5171_v8, %v3542_v6  ;;  %v5174_v23 = vstv %s5158_s17  ;;  %v5175_v5 = vstv %s5160_s22  ;;  %v5176_v43 = vstv %s5162_s3  ;;  %s5189_s17 = sld [smem:[#allocation97_spill]]  ;;  %s5190_s22 = sld [smem:[#allocation100_spill]] }
 0x18e   : > { %v552_v32 = vadd.f32 %v5174_v23, %v550_v36  ;;  %v559_v39 = vmul.f32 %v5175_v5, %v3538_v0  ;;  %v563_v41 = vmul.f32 %v5176_v43, %v3500_v27  ;;  %v390_v7 = vadd.f32 %v389_v48, %v351_v21  ;;  %s5191_s3 = sld [smem:[#allocation76_spill]] }
 0x18f   : > { %v494_v33 = vadd.f32 %v493_v29, %v490_v49  ;;  %v5179_v63 = vstv %s5164_s2  ;;  %v5181_v59 = vstv %s5166_s27  ;;  %v5182_v19 = vstv %s5168_s5  ;;  %s5194_s2 = sld [smem:[#allocation101_spill]]  ;;  %s5196_s27 = sld [smem:[#allocation99_spill]] }
 0x190   : > { %v571_v28 = vmul.f32 %v5179_v63, %v3542_v6  ;;  %v589_v40 = vmul.f32 %v5181_v59, %v3496_v16  ;;  %v467_v35 = vmul.f32 %v5182_v19, %v3643_v37  ;;  %v529_v13 = vadd.f32 %v3036_v34, %v525_v20  ;;  %s5198_s5 = sld [smem:[#allocation102_spill]] }
 0x191   : > { %v556_v18 = vadd.f32 %v3053_v62, %v552_v32  ;;  %v5184_v31 = vstv %s5170_s15  ;;  %v429_v52 = vadd.f32 %v428_v44, %v390_v7  ;;  %v3671_v46 = vmax.f32 %v494_v33, 0.0  ;;  %s5199_s15 = sld [smem:[#allocation106_spill]] }
 0x192   : > { %v598_v9 = vmul.f32 %v5184_v31, %v3538_v0  ;;  %v5187_v29 = vstv %s5172_s23  ;;  %v5188_v48 = vstv %s5173_s0  ;;  %v533_v11 = vadd.f32 %v532_v17, %v529_v13  ;;  %s5202_s23 = sld [smem:[#allocation103_spill]]  ;;  %s5205_s0 = sld [smem:[#allocation105_spill]] }
 0x193   : > { %v591_v26 = vadd.f32 %v5187_v29, %v589_v40  ;;  %v602_v14 = vmul.f32 %v5188_v48, %v3500_v27  ;;  %v560_v34 = vadd.f32 %v559_v39, %v556_v18  ;;  %v5192_v62 = vstv %s5177_s25  ;;  %s5207_s25 = sld [smem:[#allocation107_spill]] }
 0x194   : > { %v610_v12 = vmul.f32 %v5192_v62, %v3542_v6  ;;  %v5193_v36 = vstv %s5178_s28  ;;  %v468_v44 = vadd.f32 %v467_v35, %v429_v52  ;;  %v5195_v49 = vstv %s5180_s20  ;;  %s5209_s28 = sld [smem:[#allocation108_spill]]  ;;  %s5210_s20 = sld [smem:[#allocation113_spill]] }
 0x195   : > { %v628_v21 = vmul.f32 %v5193_v36, %v3496_v16  ;;  %v506_v8 = vmul.f32 %v5195_v49, %v3671_v46  ;;  %v595_v20 = vadd.f32 %v3074_v38, %v591_v26  ;;  %v5197_v23 = vstv %s5183_s30  ;;  %s5214_s30 = sld [smem:[#allocation110_spill]] }
 0x196   : > { %v637_v17 = vmul.f32 %v5197_v23, %v3538_v0  ;;  %v3691_v32 = vmax.f32 %v533_v11, 0.0  ;;  %v564_v5 = vadd.f32 %v563_v41, %v560_v34  ;;  %v5200_v39 = vstv %s5185_s4  ;;  %s5215_s4 = sld [smem:[#allocation84_spill]] }
 0x197   : > { %v630_v43 = vadd.f32 %v5200_v39, %v628_v21  ;;  %v5201_v7 = vstv %s5186_s13  ;;  %v507_v63 = vadd.f32 %v506_v8, %v468_v44  ;;  %v599_v59 = vadd.f32 %v598_v9, %v595_v20  ;;  %s5217_s13 = sld [smem:[#allocation112_spill]] }
 0x198   : > { %v641_v33 = vmul.f32 %v5201_v7, %v3500_v27  ;;  %v5203_v40 = vstv %s5189_s17  ;;  %v5204_v38 = vstv %s5190_s22  ;;  %v5206_v13 = vstv %s5191_s3  ;;  %s5218_s17 = sld [smem:[#allocation114_spill]]  ;;  %s5221_s22 = sld [smem:[#allocation115_spill]] }
 0x199   : > { %v649_v19 = vmul.f32 %v5203_v40, %v3542_v6  ;;  %v667_v35 = vmul.f32 %v5204_v38, %v3496_v16  ;;  %v545_v18 = vmul.f32 %v5206_v13, %v3691_v32  ;;  %v568_v41 = vadd.f32 %v3063_v50, %v564_v5  ;;  %s5224_s3 = sld [smem:[#allocation117_spill]] }
 0x19a   : > { %v634_v31 = vadd.f32 %v3101_v45, %v630_v43  ;;  %v5208_v52 = vstv %s5194_s2  ;;  %v603_v9 = vadd.f32 %v602_v14, %v599_v59  ;;  %v5211_v26 = vstv %s5196_s27  ;;  %s5225_s2 = sld [smem:[#allocation91_spill]]  ;;  %s3742_s27 = sld [smem:[#allocation8 + $0x110]] }
 0x19b   : > { %v676_v29 = vmul.f32 %v5208_v52, %v3538_v0  ;;  %v669_v48 = vadd.f32 %v5211_v26, %v667_v35  ;;  %v5212_v11 = vstv %s5198_s5  ;;  %v5213_v62 = vstv %s5199_s15  ;;  %s5228_s5 = sld [smem:[#allocation47_spill]]  ;;  %s5231_s15 = sld [smem:[#allocation50_spill]] }
 0x19c   : > { %v680_v34 = vmul.f32 %v5212_v11, %v3500_v27  ;;  %v706_v36 = vmul.f32 %v5213_v62, %v3496_v16  ;;  %v546_v21 = vadd.f32 %v545_v18, %v507_v63  ;;  %v572_v44 = vadd.f32 %v571_v28, %v568_v41 }
 0x19d   : > { %v638_v50 = vadd.f32 %v637_v17, %v634_v31  ;;  %v5216_v45 = vstv %s5202_s23  ;;  %v607_v8 = vadd.f32 %v3084_v54, %v603_v9  ;;  %v673_v14 = vadd.f32 %v3122_v42, %v669_v48  ;;  %s5232_s23 = sld [smem:[#allocation118_spill]] }
 0x19e   : > { %v688_v49 = vmul.f32 %v5216_v45, %v3542_v6  ;;  %v5219_v20 = vstv %s5205_s0  ;;  %v5220_v5 = vstv %s5207_s25  ;;  %v3730_v43 = vmax.f32 %v572_v44, 0.0  ;;  %s5234_s0 = sld [smem:[#allocation58_spill]] }
 0x19f   : > { %v708_v23 = vadd.f32 %v5219_v20, %v706_v36  ;;  %v715_v39 = vmul.f32 %v5220_v5, %v3538_v0  ;;  %v642_v28 = vadd.f32 %v641_v33, %v638_v50  ;;  %v5222_v17 = vstv %s5209_s28  ;;  %s5235_s25 = sld [smem:[#allocation98_spill]]  ;;  %s5238_s28 = sld [smem:[#allocation122_spill]] }
 0x1a0   : > { %v719_v7 = vmul.f32 %v5222_v17, %v3500_v27  ;;  %v5223_v63 = vstv %s5210_s20  ;;  %v611_v40 = vadd.f32 %v610_v12, %v607_v8  ;;  %v677_v54 = vadd.f32 %v676_v29, %v673_v14  ;;  %s5240_s20 = sld [smem:[#allocation123_spill]] }
 0x1a1   : > { %v745_v59 = vmul.f32 %v5223_v63, %v3496_v16  ;;  %v712_v42 = vadd.f32 %v3149_v30, %v708_v23  ;;  %v5226_v38 = vstv %s5214_s30  ;;  %v5227_v13 = vstv %s5215_s4  ;;  %s5243_s30 = sld [smem:[#allocation63_spill]]  ;;  %s5244_s4 = sld [smem:[#allocation104_spill]] }
 0x1a2   : > { %v727_v35 = vmul.f32 %v5226_v38, %v3542_v6  ;;  %v584_v33 = vmul.f32 %v5227_v13, %v3730_v43  ;;  %v646_v18 = vadd.f32 %v3111_v3, %v642_v28  ;;  %v5229_v41 = vstv %s5217_s13  ;;  %s5246_s13 = sld [smem:[#allocation120_spill]] }
 0x1a3   : > { %v747_v31 = vadd.f32 %v5229_v41, %v745_v59  ;;  %v5230_v12 = vstv %s5218_s17  ;;  %v3753_v29 = vmax.f32 %v611_v40, 0.0  ;;  %v681_v30 = vadd.f32 %v680_v34, %v677_v54  ;;  %s5248_s17 = sld [smem:[#allocation127_spill]] }
 0x1a4   : > { %v754_v52 = vmul.f32 %v5230_v12, %v3538_v0  ;;  %v716_v9 = vadd.f32 %v715_v39, %v712_v42  ;;  %v5233_v26 = vstv %s5221_s22  ;;  %v585_v11 = vadd.f32 %v584_v33, %v546_v21  ;;  %s5250_s22 = sld [smem:[#allocation71_spill]] }
 0x1a5   : > { %v758_v48 = vmul.f32 %v5233_v26, %v3500_v27  ;;  %v650_v62 = vadd.f32 %v649_v19, %v646_v18  ;;  %v751_v3 = vadd.f32 %v3170_v58, %v747_v31  ;;  %v5236_v36 = vstv %s5224_s3  ;;  %s5252_s3 = sld [smem:[#allocation111_spill]] }
 0x1a6   : > { %v784_v44 = vmul.f32 %v5236_v36, %v3496_v16  ;;  %v5237_v50 = vstv %s5225_s2  ;;  %v685_v8 = vadd.f32 %v3132_v22, %v681_v30  ;;  %v720_v34 = vadd.f32 %v719_v7, %v716_v9  ;;  %s5253_s2 = sld [smem:[#allocation126_spill]] }
 0x1a7   : > { %v623_v45 = vmul.f32 %v5237_v50, %v3753_v29  ;;  %v5239_v14 = vstv %s5228_s5  ;;  %v3769_v21 = vmax.f32 %v650_v62, 0.0  ;;  %v755_v19 = vadd.f32 %v754_v52, %v751_v3  ;;  %s5254_s5 = sld [smem:[#allocation79_spill]] }
 0x1a8   : > { %v766_v20 = vmul.f32 %v5239_v14, %v3542_v6  ;;  %v5241_v23 = vstv %s5231_s15  ;;  %v5242_v5 = vstv %s5232_s23  ;;  %v689_v17 = vadd.f32 %v688_v49, %v685_v8  ;;  %s5257_s15 = sld [smem:[#allocation74_spill]] }
 0x1a9   : > { %v786_v58 = vadd.f32 %v5241_v23, %v784_v44  ;;  %v793_v39 = vmul.f32 %v5242_v5, %v3538_v0  ;;  %v624_v28 = vadd.f32 %v623_v45, %v585_v11  ;;  %v724_v22 = vadd.f32 %v3159_v25, %v720_v34  ;;  %s5260_s23 = sld [smem:[#allocation82_spill]] }
 0x1aa   : > { %v5245_v7 = vstv %s5234_s0  ;;  %v5247_v59 = vstv %s5235_s25  ;;  %v759_v54 = vadd.f32 %v758_v48, %v755_v19  ;;  %v5249_v38 = vstv %s5238_s28  ;;  %s5261_s0 = sld [smem:[#allocation131_spill]]  ;;  %s5262_s25 = sld [smem:[#allocation116_spill]] }
 0x1ab   : > { %v797_v63 = vmul.f32 %v5245_v7, %v3500_v27  ;;  %v662_v40 = vmul.f32 %v5247_v59, %v3769_v21  ;;  %v790_v42 = vadd.f32 %v3197_v4, %v786_v58  ;;  %v823_v13 = vmul.f32 %v5249_v38, %v3496_v16  ;;  %s5264_s28 = sld [smem:[#allocation129_spill]] }
 0x1ac   : > { %v3787_v33 = vmax.f32 %v689_v17, 0.0  ;;  %v728_v49 = vadd.f32 %v727_v35, %v724_v22  ;;  %v5251_v25 = vstv %s5240_s20  ;;  %v1338_v41 = vstv %s3742_s27  ;;  %s5267_s20 = sld [smem:[#allocation89_spill]]  ;;  %s4110_s27 = sld [smem:[#allocation8 + $0x10d]] }
 0x1ad   : > { %v832_v18 = vmul.f32 %v5251_v25, %v3538_v0  ;;  %v663_v31 = vadd.f32 %v662_v40, %v624_v28  ;;  %v763_v12 = vadd.f32 %v3180_v2, %v759_v54  ;;  %v794_v52 = vadd.f32 %v793_v39, %v790_v42 }
 0x1ae   : > { %v5255_v30 = vstv %s5243_s30  ;;  %v5256_v9 = vstv %s5244_s4  ;;  %v3799_v48 = vmax.f32 %v728_v49, 0.0  ;;  %v5258_v35 = vstv %s5246_s13  ;;  %s5269_s30 = sld [smem:[#allocation132_spill]]  ;;  %s5270_s4 = sld [smem:[#allocation136_spill]] }
 0x1af   : > { %v825_v4 = vadd.f32 %v5255_v30, %v823_v13  ;;  %v701_v26 = vmul.f32 %v5256_v9, %v3787_v33  ;;  %v805_v11 = vmul.f32 %v5258_v35, %v3542_v6  ;;  %v5259_v62 = vstv %s5248_s17  ;;  %s5272_s13 = sld [smem:[#allocation94_spill]]  ;;  %s5273_s17 = sld [smem:[#allocation26_spill]] }
 0x1b0   : > { %v862_v3 = vmul.f32 %v5259_v62, %v3496_v16  ;;  %v767_v36 = vadd.f32 %v766_v20, %v763_v12  ;;  %v798_v2 = vadd.f32 %v797_v63, %v794_v52  ;;  %v5263_v50 = vstv %s5250_s22  ;;  %s5277_s22 = sld [smem:[#allocation135_spill]] }
 0x1b1   : > { %v829_v44 = vadd.f32 %v3218_v55, %v825_v4  ;;  %v836_v45 = vmul.f32 %v5263_v50, %v3500_v27  ;;  %v702_v8 = vadd.f32 %v701_v26, %v663_v31  ;;  %v5265_v34 = vstv %s5252_s3  ;;  %s5278_s3 = sld [smem:[#allocation137_spill]] }
 0x1b2   : > { %v740_v14 = vmul.f32 %v5265_v34, %v3799_v48  ;;  %v5266_v19 = vstv %s5253_s2  ;;  %v5268_v58 = vstv %s5254_s5  ;;  %v3819_v20 = vmax.f32 %v767_v36, 0.0  ;;  %s5280_s2 = sld [smem:[#allocation121_spill]]  ;;  %s5283_s5 = sld [smem:[#allocation133_spill]] }
 0x1b3   : > { %v864_v23 = vadd.f32 %v5266_v19, %v862_v3  ;;  %v871_v5 = vmul.f32 %v5268_v58, %v3538_v0  ;;  %v802_v55 = vadd.f32 %v3207_v10, %v798_v2  ;;  %v833_v39 = vadd.f32 %v832_v18, %v829_v44 }
 0x1b4   : > { %v5271_v28 = vstv %s5257_s15  ;;  %v741_v22 = vadd.f32 %v740_v14, %v702_v8  ;;  %v5274_v63 = vstv %s5260_s23  ;;  %v5275_v40 = vstv %s5261_s0  ;;  %s5285_s15 = sld [smem:[#allocation142_spill]]  ;;  %s5287_s23 = sld [smem:[#allocation138_spill]] }
 0x1b5   : > { %v844_v17 = vmul.f32 %v5271_v28, %v3542_v6  ;;  %v868_v7 = vadd.f32 %v3245_v53, %v864_v23  ;;  %v875_v59 = vmul.f32 %v5274_v63, %v3500_v27  ;;  %v901_v54 = vmul.f32 %v5275_v40, %v3496_v16  ;;  %v2230_v3 = vld [vmem:[%s5273_s17 + $0x4] ss:$8 sps:$4 sm:$0xff]   ;;  %v2232_v36 = vld [vmem:[%s5273_s17] ss:$8 sps:$4 sm:$0xff]   ;;  %s5290_s0 = sld [smem:[#allocation141_spill]] }
 0x1b6   : > { %v5276_v42 = vstv %s5262_s25  ;;  %v806_v10 = vadd.f32 %v805_v11, %v802_v55  ;;  %v837_v13 = vadd.f32 %v836_v45, %v833_v39  ;;  %v5279_v49 = vstv %s5264_s28  ;;  %s5291_s25 = sld [smem:[#allocation143_spill]]  ;;  %v2233_v14 = vld [vmem:[%s5273_s17 + $0x14] ss:$8 sps:$4 sm:$0xff]   ;;  %1630 = vmatprep.subr.bf16.mxu0 %v2230_v3  ;;  %s5295_s28 = sld [smem:[#allocation139_spill]] }
 0x1b7   : > { %v779_v38 = vmul.f32 %v5276_v42, %v3819_v20  ;;  %v883_v25 = vmul.f32 %v5279_v49, %v3542_v6  ;;  %v872_v53 = vadd.f32 %v871_v5, %v868_v7  ;;  %v5281_v18 = vstv %s5267_s20  ;;  %s5296_s20 = sld [smem:[#allocation125_spill]]  ;;  %1631 = vmatpush1.bf16.msra.mxu0 %v2232_v36 }
 0x1b8   : > { %v903_v31 = vadd.f32 %v5281_v18, %v901_v54  ;;  %v5282_v12 = vstv %s5269_s30  ;;  %v5284_v30 = vstv %s5270_s4  ;;  %v3846_v26 = vmax.f32 %v806_v10, 0.0  ;;  %s5298_s30 = sld [smem:[#allocation144_spill]]  ;;  %s5300_s4 = sld [smem:[#allocation145_spill]]  ;;  %1632 = vmatprep.subr.bf16.mxu0 %v2233_v14  ;;  %v2236_v10 = vld [vmem:[%s5273_s17 + $0x24] ss:$8 sps:$4 sm:$0xff]  }
 0x1b9   : > { %v910_v52 = vmul.f32 %v5282_v12, %v3538_v0  ;;  %v940_v4 = vmul.f32 %v5284_v30, %v3496_v16  ;;  %v780_v9 = vadd.f32 %v779_v38, %v741_v22  ;;  %v841_v35 = vadd.f32 %v3228_v15, %v837_v13 }
 0x1ba   : > { %v5286_v11 = vstv %s5272_s13  ;;  %v876_v2 = vadd.f32 %v875_v59, %v872_v53  ;;  %v907_v44 = vadd.f32 %v3266_v61, %v903_v31  ;;  %v5288_v50 = vstv %s5277_s22  ;;  %s5302_s13 = sld [smem:[#allocation55_spill]]  ;;  %s5303_s22 = sld [smem:[#allocation148_spill]] }
 0x1bb   : > { %v914_v62 = vmul.f32 %v5286_v11, %v3500_v27  ;;  %v942_v45 = vadd.f32 %v5288_v50, %v940_v4  ;;  %v5289_v8 = vstv %s5278_s3  ;;  %v5292_v15 = vstv %s5280_s2  ;;  %s5306_s3 = sld [smem:[#allocation130_spill]]  ;;  %s5309_s2 = sld [smem:[#allocation152_spill]]  ;;  %v5310_v11 = vld [vmem:[#allocation164_spill] sm:$0xff] }
 0x1bc   : > { %v949_v34 = vmul.f32 %v5289_v8, %v3538_v0  ;;  %v818_v19 = vmul.f32 %v5292_v15, %v3846_v26  ;;  %v845_v23 = vadd.f32 %v844_v17, %v841_v35  ;;  %v5293_v58 = vstv %s5283_s5  ;;  %v2235_v17 = vld [vmem:[%s5273_s17 + $0x10] ss:$8 sps:$4 sm:$0xff]   ;;  %s5312_s5 = sld [smem:[#allocation66_spill]]  ;;  %v2239_v15 = vld [vmem:[%s5273_s17 + $0x34] ss:$8 sps:$4 sm:$0xff]  }
 0x1bd   : > { %v922_v5 = vmul.f32 %v5293_v58, %v3542_v6  ;;  %v5294_v55 = vstv %s5285_s15  ;;  %v880_v61 = vadd.f32 %v3255_v60, %v876_v2  ;;  %v911_v28 = vadd.f32 %v910_v52, %v907_v44  ;;  %s5313_s15 = sld [smem:[#allocation153_spill]]  ;;  %1633 = vmatpush1.bf16.msra.mxu0 %v2235_v17  ;;  %v2238_v44 = vld [vmem:[%s5273_s17 + $0x20] ss:$8 sps:$4 sm:$0xff]  }
 0x1be   : > { %v979_v39 = vmul.f32 %v5294_v55, %v3496_v16  ;;  %v946_v22 = vadd.f32 %v3293_v47, %v942_v45  ;;  %v5297_v7 = vstv %s5287_s23  ;;  %v819_v59 = vadd.f32 %v818_v19, %v780_v9  ;;  %s5315_s23 = sld [smem:[#allocation151_spill]]  ;;  %1634 = vmatprep.subr.bf16.mxu0 %v2236_v10  ;;  %v5319_v55 = vld [vmem:[#allocation167_spill] sm:$0xff] }
 0x1bf   : > { %v953_v63 = vmul.f32 %v5297_v7, %v3500_v27  ;;  %v3876_v40 = vmax.f32 %v845_v23, 0.0  ;;  %v5299_v54 = vstv %s5290_s0  ;;  %v5301_v38 = vstv %s5291_s25  ;;  %s5320_s0 = sld [smem:[#allocation157_spill]]  ;;  %v5322_v7 = vld [vmem:[#allocation171_spill] sm:$0xff]  ;;  %s5323_s25 = sld [smem:[#allocation134_spill]] }
 0x1c0   : > { %v981_v42 = vadd.f32 %v5299_v54, %v979_v39  ;;  %v988_v60 = vmul.f32 %v5301_v38, %v3538_v0  ;;  %v884_v47 = vadd.f32 %v883_v25, %v880_v61  ;;  %v915_v13 = vadd.f32 %v914_v62, %v911_v28 }
 0x1c1   : > { %v950_v49 = vadd.f32 %v949_v34, %v946_v22  ;;  %v5304_v53 = vstv %s5295_s28  ;;  %v5305_v31 = vstv %s5296_s20  ;;  %v5307_v30 = vstv %s5298_s30  ;;  %s5326_s28 = sld [smem:[#allocation128_spill]]  ;;  %s5328_s20 = sld [smem:[#allocation156_spill]]  ;;  %1635 = vmatpush1.bf16.msra.mxu0 %v2238_v44 }
 0x1c2   : > { %v961_v18 = vmul.f32 %v5304_v53, %v3542_v6  ;;  %v857_v12 = vmul.f32 %v5305_v31, %v3876_v40  ;;  %v985_v52 = vadd.f32 %v3314_v56, %v981_v42  ;;  %v992_v4 = vmul.f32 %v5307_v30, %v3500_v27  ;;  %s5329_s30 = sld [smem:[#allocation158_spill]]  ;;  %1636 = vmatprep.subr.bf16.mxu0 %v2239_v15 }
 0x1c3   : > { %v5308_v9 = vstv %s5036_s21  ;;  %v3897_v35 = vmax.f32 %v884_v47, 0.0  ;;  %v919_v62 = vadd.f32 %v5310_v11, %v915_v13  ;;  %v954_v3 = vadd.f32 %v953_v63, %v950_v49  ;;  %s5318_s21 = sld [smem:[#allocation124_spill]]  ;;  %v2241_v13 = vld [vmem:[%s5273_s17 + $0x30] ss:$8 sps:$4 sm:$0xff]   ;;  %v5330_v49 = vld [vmem:[#allocation169_spill] sm:$0xff] }
 0x1c4   : > { %v1018_v25 = vmul.f32 %v5308_v9, %v3496_v16  ;;  %v5311_v36 = vstv %s5300_s4  ;;  %v858_v56 = vadd.f32 %v857_v12, %v819_v59  ;;  %v989_v50 = vadd.f32 %v988_v60, %v985_v52  ;;  %s5331_s4 = sld [smem:[#allocation140_spill]] }
 0x1c5   : > { %v1000_v2 = vmul.f32 %v5311_v36, %v3542_v6  ;;  %v5314_v45 = vstv %s5302_s13  ;;  %v5316_v34 = vstv %s5303_s22  ;;  %v5317_v19 = vstv %s5306_s3  ;;  %s5333_s13 = sld [smem:[#allocation159_spill]]  ;;  %s5337_s22 = sld [smem:[#allocation163_spill]]  ;;  %1637 = vmatpush1.bf16.msra.mxu0 %v2241_v13 }
 0x1c6   : > { %v1020_v8 = vadd.f32 %v5314_v45, %v1018_v25  ;;  %v1027_v14 = vmul.f32 %v5316_v34, %v3538_v0  ;;  %v896_v23 = vmul.f32 %v5317_v19, %v3897_v35  ;;  %v923_v58 = vadd.f32 %v922_v5, %v919_v62  ;;  %v5336_v62 = vld [vmem:[#allocation173_spill] sm:$0xff]  ;;  %s5341_s3 = sld [smem:[#allocation154_spill]] }
 0x1c7   : > { %v958_v39 = vadd.f32 %v5319_v55, %v954_v3  ;;  %v5321_v61 = vstv %s5309_s2  ;;  %v993_v22 = vadd.f32 %v992_v4, %v989_v50  ;;  %v5324_v17 = vstv %s5312_s5  ;;  %s5343_s2 = sld [smem:[#allocation146_spill]] }
 0x1c8   : > { %v1057_v28 = vmul.f32 %v5321_v61, %v3496_v16  ;;  %v1024_v63 = vadd.f32 %v5322_v7, %v1020_v8  ;;  %v1031_v59 = vmul.f32 %v5324_v17, %v3500_v27  ;;  %v5325_v54 = vstv %s5313_s15  ;;  %s5345_s5 = sld [smem:[#allocation162_spill]]  ;;  %s5346_s15 = sld [smem:[#allocation160_spill]]  ;;  %v5349_v7 = vld [vmem:[#allocation176_spill] sm:$0xff] }
 0x1c9   : > { %v1066_v42 = vmul.f32 %v5325_v54, %v3538_v0  ;;  %v897_v38 = vadd.f32 %v896_v23, %v858_v56  ;;  %v3924_v5 = vmax.f32 %v923_v58, 0.0  ;;  %v962_v60 = vadd.f32 %v961_v18, %v958_v39  ;;  %v2242_v18 = vld [vmem:[%s5273_s17 + $0x44] ss:$8 sps:$4 sm:$0xff]   ;;  %v2245_v54 = vld [vmem:[%s5273_s17 + $0x54] ss:$8 sps:$4 sm:$0xff]  }
 0x1ca   : > { %v5327_v10 = vstv %s5315_s23  ;;  %v997_v53 = vadd.f32 %v5330_v49, %v993_v22  ;;  %v1028_v31 = vadd.f32 %v1027_v14, %v1024_v63  ;;  %v5332_v12 = vstv %s5318_s21  ;;  %s5348_s23 = sld [smem:[#allocation166_spill]]  ;;  %1638 = vmatprep.subr.bf16.mxu0 %v2242_v18  ;;  %v5355_v18 = vld [vmem:[#allocation174_spill] sm:$0xff]  ;;  %s5356_s21 = sld [smem:[#allocation150_spill]] }
 0x1cb   : > { %v1059_v47 = vadd.f32 %v5327_v10, %v1057_v28  ;;  %v1039_v52 = vmul.f32 %v5332_v12, %v3542_v6  ;;  %v5334_v30 = vstv %s5320_s0  ;;  %v5335_v9 = vstv %s5323_s25  ;;  %v5347_v28 = vld [vmem:[#allocation172_spill] sm:$0xff]  ;;  %s4063_s0 = sld [smem:[#allocation8 + $0x113]]  ;;  %s4070_s25 = sld [smem:[#allocation8 + $0x11e]] }
 0x1cc   : > { %v1096_v4 = vmul.f32 %v5334_v30, %v3496_v16  ;;  %v935_v25 = vmul.f32 %v5335_v9, %v3924_v5  ;;  %v3940_v11 = vmax.f32 %v962_v60, 0.0  ;;  %v5338_v36 = vstv %s5326_s28  ;;  %s5398_s28 = sld [smem:[#allocation186_spill]] }
 0x1cd   : > { %v1063_v3 = vadd.f32 %v5336_v62, %v1059_v47  ;;  %v1070_v44 = vmul.f32 %v5338_v36, %v3500_v27  ;;  %v1001_v56 = vadd.f32 %v1000_v2, %v997_v53  ;;  %v1032_v50 = vadd.f32 %v1031_v59, %v1028_v31  ;;  %v2244_v2 = vld [vmem:[%s5273_s17 + $0x40] ss:$8 sps:$4 sm:$0xff]  }
 0x1ce   : > { %v5339_v45 = vstv %s5328_s20  ;;  %v5340_v34 = vstv %s5329_s30  ;;  %v936_v15 = vadd.f32 %v935_v25, %v897_v38  ;;  %v5342_v19 = vstv %s5331_s4  ;;  %1639 = vmatpush1.bf16.msra.mxu0 %v2244_v2  ;;  %s4072_s20 = sld [smem:[#allocation8 + $0x118]]  ;;  %s5402_s30 = sld [smem:[#allocation170_spill]] }
 0x1cf   : > { %v1098_v8 = vadd.f32 %v5339_v45, %v1096_v4  ;;  %v1105_v14 = vmul.f32 %v5340_v34, %v3538_v0  ;;  %v974_v23 = vmul.f32 %v5342_v19, %v3940_v11  ;;  %v1067_v58 = vadd.f32 %v1066_v42, %v1063_v3  ;;  %v5360_v34 = vld [vmem:[#allocation179_spill] sm:$0xff]  ;;  %1640 = vmatprep.subr.bf16.mxu0 %v2245_v54  ;;  %s5404_s4 = sld [smem:[#allocation147_spill]] }
 0x1d0   : > { %v5344_v55 = vstv %s5333_s13  ;;  %v3958_v61 = vmax.f32 %v1001_v56, 0.0  ;;  %v1036_v22 = vadd.f32 %v5347_v28, %v1032_v50  ;;  %v5350_v17 = vstv %s5337_s22  ;;  %s4086_s13 = sld [smem:[#allocation8 + $0x119]]  ;;  %s4094_s22 = sld [smem:[#allocation8 + $0x11a]] }
 0x1d1   : > { %v1109_v39 = vmul.f32 %v5344_v55, %v3500_v27  ;;  %v1102_v63 = vadd.f32 %v5349_v7, %v1098_v8  ;;  %v1135_v59 = vmul.f32 %v5350_v17, %v3496_v16  ;;  %v975_v42 = vadd.f32 %v974_v23, %v936_v15 }
 0x1d2   : > { %v1071_v38 = vadd.f32 %v1070_v44, %v1067_v58  ;;  %v5351_v60 = vstv %s5341_s3  ;;  %v5352_v47 = vstv %s5058_s7  ;;  %v5353_v49 = vstv %s5343_s2  ;;  %s4046_s7 = sld [smem:[#allocation8 + $0x112]]  ;;  %s4101_s3 = sld [smem:[#allocation8 + $0x11b]] }
 0x1d3   : > { %v1078_v10 = vmul.f32 %v5351_v60, %v3542_v6  ;;  %v1144_v13 = vmul.f32 %v5352_v47, %v3538_v0  ;;  %v1013_v53 = vmul.f32 %v5353_v49, %v3958_v61  ;;  %v1040_v31 = vadd.f32 %v1039_v52, %v1036_v22  ;;  %v2247_v52 = vld [vmem:[%s5273_s17 + $0x50] ss:$8 sps:$4 sm:$0xff]   ;;  %s4112_s2 = sld [smem:[#allocation8 + $0x11c]] }
 0x1d4   : > { %v1106_v12 = vadd.f32 %v1105_v14, %v1102_v63  ;;  %v5354_v30 = vstv %s5345_s5  ;;  %v1075_v9 = vadd.f32 %v5355_v18, %v1071_v38  ;;  %v5357_v25 = vstv %s5346_s15  ;;  %v5366_v63 = vld [vmem:[#allocation177_spill] sm:$0xff]  ;;  %v5368_v38 = vld [vmem:[#allocation183_spill] sm:$0xff]  ;;  %1641 = vmatpush1.bf16.msra.mxu0 %v2247_v52  ;;  %s4118_s5 = sld [smem:[#allocation8 + $0x117]]  ;;  %s4124_s15 = sld [smem:[#allocation8 + $0x11d]] }
 0x1d5   : > { %v1137_v4 = vadd.f32 %v5354_v30, %v1135_v59  ;;  %v1117_v62 = vmul.f32 %v5357_v25, %v3542_v6  ;;  %v5358_v3 = vstv %s5348_s23  ;;  %v5359_v44 = vstv %s5065_s19  ;;  %s5363_s19 = sld [smem:[#allocation155_spill]] }
 0x1d6   : > { %v1148_v36 = vmul.f32 %v5358_v3, %v3500_v27  ;;  %v1174_v56 = vmul.f32 %v5359_v44, %v3496_v16  ;;  %v1014_v50 = vadd.f32 %v1013_v53, %v975_v42  ;;  %v3988_v45 = vmax.f32 %v1040_v31, 0.0  ;;  %s4126_s23 = sld [smem:[#allocation8 + $0x122]] }
 0x1d7   : > { %v1110_v8 = vadd.f32 %v1109_v39, %v1106_v12  ;;  %v1141_v14 = vadd.f32 %v5360_v34, %v1137_v4  ;;  %v1079_v15 = vadd.f32 %v1078_v10, %v1075_v9  ;;  %v5361_v19 = vstv %s3298_s16  ;;  %s5372_s16 = sld [smem:[#allocation161_spill]] }
 0x1d8   : > { %v1156_v23 = vmul.f32 %v5361_v19, %v3542_v6  ;;  %v5362_v58 = vstv %s5067_s26  ;;  %v5364_v2 = vstv %s5068_s11  ;;  %v5365_v22 = vstv %s5356_s21  ;;  %s5371_s11 = sld [smem:[#allocation165_spill]]  ;;  %s4049_s26 = sld [smem:[#allocation8 + $0xf9]] }
 0x1d9   : > { %v1176_v55 = vadd.f32 %v5362_v58, %v1174_v56  ;;  %v1183_v28 = vmul.f32 %v5364_v2, %v3538_v0  ;;  %v1052_v7 = vmul.f32 %v5365_v22, %v3988_v45  ;;  %v1114_v39 = vadd.f32 %v5366_v63, %v1110_v8  ;;  %s4132_s21 = sld [smem:[#allocation8 + $0x128]] }
 0x1da   : > { %v1145_v17 = vadd.f32 %v1144_v13, %v1141_v14  ;;  %v5367_v59 = vstv %s3348_s18  ;;  %v4006_v42 = vmax.f32 %v1079_v15, 0.0  ;;  %v5369_v10 = vstv %s3328_s1  ;;  %s5375_s18 = sld [smem:[#allocation175_spill]]  ;;  %s4033_s1 = sld [smem:[#allocation8 + $0x111]] }
 0x1db   : > { %v1213_v54 = vmul.f32 %v5367_v59, %v3496_v16  ;;  %v1180_v60 = vadd.f32 %v5368_v38, %v1176_v55  ;;  %v1187_v47 = vmul.f32 %v5369_v10, %v3500_v27  ;;  %v5370_v49 = vstv %s3358_s14  ;;  %s5380_s14 = sld [smem:[#allocation178_spill]]  ;;  %v5390_v38 = vld [vmem:[#allocation185_spill] sm:$0xff]  ;;  %v5392_v10 = vld [vmem:[#allocation189_spill] sm:$0xff] }
 0x1dc   : > { %v1222_v53 = vmul.f32 %v5370_v49, %v3538_v0  ;;  %v1053_v31 = vadd.f32 %v1052_v7, %v1014_v50  ;;  %v1118_v12 = vadd.f32 %v1117_v62, %v1114_v39  ;;  %v1149_v13 = vadd.f32 %v1148_v36, %v1145_v17  ;;  %v5378_v50 = vld [vmem:[#allocation180_spill] sm:$0xff]  ;;  %v5379_v62 = vld [vmem:[#allocation187_spill] sm:$0xff] }
 0x1dd   : > { %v5373_v30 = vstv %s3346_s12  ;;  %v5374_v18 = vstv %s5363_s19  ;;  %v1184_v25 = vadd.f32 %v1183_v28, %v1180_v60  ;;  %v5376_v3 = vstv %s3336_s9  ;;  %s5382_s12 = sld [smem:[#allocation168_spill]]  ;;  %s5384_s9 = sld [smem:[#allocation181_spill]] }
 0x1de   : > { %v1215_v4 = vadd.f32 %v5373_v30, %v1213_v54  ;;  %v1091_v9 = vmul.f32 %v5374_v18, %v4006_v42  ;;  %v1195_v44 = vmul.f32 %v5376_v3, %v3542_v6  ;;  %v5377_v56 = vstv %s3384_s10  ;;  %s5387_s10 = sld [smem:[#allocation149_spill]]  ;;  %s4134_s19 = sld [smem:[#allocation8 + $0x123]] }
 0x1df   : > { %v1252_v8 = vmul.f32 %v5377_v56, %v3496_v16  ;;  %v4026_v52 = vmax.f32 %v1118_v12, 0.0  ;;  %v1153_v34 = vadd.f32 %v5378_v50, %v1149_v13  ;;  %v5381_v14 = vstv %s3366_s6  ;;  %s5389_s6 = sld [smem:[#allocation182_spill]] }
 0x1e0   : > { %v1219_v36 = vadd.f32 %v5379_v62, %v1215_v4  ;;  %v1226_v15 = vmul.f32 %v5381_v14, %v3500_v27  ;;  %v1092_v19 = vadd.f32 %v1091_v9, %v1053_v31  ;;  %v1188_v58 = vadd.f32 %v1187_v47, %v1184_v25 }
 0x1e1   : > { %v5383_v55 = vstv %s3378_s8  ;;  %v5385_v28 = vstv %s5371_s11  ;;  %v5386_v7 = vstv %s5372_s16  ;;  %v1157_v39 = vadd.f32 %v1156_v23, %v1153_v34  ;;  %s5391_s8 = sld [smem:[#allocation119_spill]]  ;;  %s4139_s11 = sld [smem:[#allocation8 + $0x124]] }
 0x1e2   : > { %v1254_v2 = vadd.f32 %v5383_v55, %v1252_v8  ;;  %v1261_v22 = vmul.f32 %v5385_v28, %v3538_v0  ;;  %v1130_v63 = vmul.f32 %v5386_v7, %v4026_v52  ;;  %v1223_v17 = vadd.f32 %v1222_v53, %v1219_v36  ;;  %v5400_v36 = vld [vmem:[#allocation188_spill] sm:$0xff]  ;;  %s4141_s16 = sld [smem:[#allocation8 + $0x125]] }
 0x1e3   : > { %v5388_v59 = vstv %s5375_s18  ;;  %v1192_v60 = vadd.f32 %v5390_v38, %v1188_v58  ;;  %v5393_v49 = vstv %s5380_s14  ;;  %v5394_v23 = vstv %s5382_s12  ;;  %s4149_s18 = sld [smem:[#allocation8 + $0x126]]  ;;  %s4153_s14 = sld [smem:[#allocation8 + $0x127]] }
 0x1e4   : > { %v1234_v54 = vmul.f32 %v5388_v59, %v3542_v6  ;;  %v1258_v47 = vadd.f32 %v5392_v10, %v1254_v2  ;;  %v1265_v31 = vmul.f32 %v5393_v49, %v3500_v27  ;;  %v1291_v53 = vmul.f32 %v5394_v23, %v3496_v16  ;;  %v5409_v49 = vld [vmem:[#allocation190_spill] sm:$0xff]  ;;  %s4160_s12 = sld [smem:[#allocation8 + $0x132]] }
 0x1e5   : > { %v1131_v12 = vadd.f32 %v1130_v63, %v1092_v19  ;;  %v4058_v13 = vmax.f32 %v1157_v39, 0.0  ;;  %v1227_v30 = vadd.f32 %v1226_v15, %v1223_v17  ;;  %v5395_v4 = vstv %s5384_s9  ;;  %v4081_v19 = vld [vmem:[#allocation2] sm:$0xff]  ;;  %s4166_s9 = sld [smem:[#allocation8 + $0x121]] }
 0x1e6   : > { %v1300_v18 = vmul.f32 %v5395_v4, %v3538_v0  ;;  %v1196_v9 = vadd.f32 %v1195_v44, %v1192_v60  ;;  %v1262_v25 = vadd.f32 %v1261_v22, %v1258_v47  ;;  %v5396_v3 = vstv %s5387_s10  ;;  %v5405_v22 = vld [vmem:[#allocation191_spill] sm:$0xff]  ;;  %s4168_s10 = sld [smem:[#allocation8 + $0x12d]] }
 0x1e7   : > { %v1293_v56 = vadd.f32 %v5396_v3, %v1291_v53  ;;  %v5397_v8 = vstv %s5389_s6  ;;  %v5399_v34 = vstv %s5391_s8  ;;  %v1231_v14 = vadd.f32 %v5400_v36, %v1227_v30  ;;  %s4174_s6 = sld [smem:[#allocation8 + $0x12e]]  ;;  %s4185_s8 = sld [smem:[#allocation8 + $0x130]] }
 0x1e8   : > { %v1304_v50 = vmul.f32 %v5397_v8, %v3500_v27  ;;  %v1169_v62 = vmul.f32 %v5399_v34, %v4058_v13  ;;  %v5401_v15 = vstv %s3454_s24  ;;  %v5403_v58 = vstv %s3460_s29  ;;  %s4096_s24 = sld [smem:[#allocation8 + $0x103]]  ;;  %v4128_v34 = vld [vmem:[#allocation6] sm:$0xff] }
 0x1e9   : > { %v1330_v44 = vmul.f32 %v5401_v15, %v3496_v16  ;;  %v1335_v55 = vmul.f32 %v4081_v19, %v5403_v58  ;;  %v4088_v2 = vmax.f32 %v1196_v9, 0.0  ;;  %v1266_v28 = vadd.f32 %v1265_v31, %v1262_v25  ;;  %s5407_s29 = sld [smem:[#allocation184_spill]] }
 0x1ea   : > { %v1297_v7 = vadd.f32 %v5405_v22, %v1293_v56  ;;  %v1339_v63 = vmul.f32 %v1338_v41, %v3538_v0  ;;  %v1170_v39 = vadd.f32 %v1169_v62, %v1131_v12  ;;  %v1235_v17 = vadd.f32 %v1234_v54, %v1231_v14  ;;  %v5412_v14 = vld [vmem:[#allocation192_spill] sm:$0xff] }
 0x1eb   : > { %v5406_v59 = vstv %s5398_s28  ;;  %v1342_v60 = vstv %s4033_s1  ;;  %v5408_v10 = vstv %s5402_s30  ;;  %v1270_v31 = vadd.f32 %v5409_v49, %v1266_v28  ;;  %s4162_s1 = sld [smem:[#allocation8 + $0x12c]]  ;;  %s4198_s28 = sld [smem:[#allocation8 + $0x137]] }
 0x1ec   : > { %v1332_v38 = vadd.f32 %v5406_v59, %v1330_v44  ;;  %v1208_v47 = vmul.f32 %v5408_v10, %v4088_v2  ;;  %v5410_v41 = vstv %s5404_s4  ;;  %v1301_v53 = vadd.f32 %v1300_v18, %v1297_v7  ;;  %s4207_s30 = sld [smem:[#allocation8 + $0x12b]]  ;;  %s4211_s4 = sld [smem:[#allocation8 + $0x139]] }
 0x1ed   : > { %v1273_v23 = vmul.f32 %v5410_v41, %v3542_v6  ;;  %v4114_v54 = vmax.f32 %v1235_v17, 0.0  ;;  %v1343_v30 = vmul.f32 %v1342_v60, %v3500_v27  ;;  %v1346_v4 = vstv %s4046_s7  ;;  %s4176_s7 = sld [smem:[#allocation8 + $0x12f]] }
 0x1ee   : > { %v1336_v12 = vadd.f32 %v1335_v55, %v1332_v38  ;;  %v1246_v9 = vstv %s4049_s26  ;;  %v1305_v25 = vadd.f32 %v1304_v50, %v1301_v53  ;;  %v1209_v56 = vadd.f32 %v1208_v47, %v1170_v39  ;;  %s4187_s26 = sld [smem:[#allocation8 + $0x131]] }
 0x1ef   : > { %v5411_v3 = vstv %s5407_s29  ;;  %v1347_v62 = vmul.f32 %v4128_v34, %v1346_v4  ;;  %v1350_v36 = vstv %s4063_s0  ;;  %v1274_v50 = vadd.f32 %v1273_v23, %v1270_v31  ;;  %s4191_s0 = sld [smem:[#allocation8 + $0x13c]]  ;;  %s4231_s29 = sld [smem:[#allocation8 + $0x11]] }
 0x1f0   : > { %v1312_v18 = vmul.f32 %v5411_v3, %v3542_v6  ;;  %v1340_v8 = vadd.f32 %v1339_v63, %v1336_v12  ;;  %v1309_v15 = vadd.f32 %v5412_v14, %v1305_v25  ;;  %v1368_v44 = vstv %s4072_s20  ;;  %s4200_s20 = sld [smem:[#allocation8 + $0x138]] }
 0x1f1   : > { %v1370_v58 = vstv %s4070_s25  ;;  %v1247_v55 = vmul.f32 %v1246_v9, %v4114_v54  ;;  %v1369_v22 = vmul.f32 %v1368_v44, %v3496_v16  ;;  %v1373_v7 = vstv %s4086_s13  ;;  %s4193_s25 = sld [smem:[#allocation8 + $0x136]]  ;;  %s4219_s13 = sld [smem:[#allocation8 + $0x13a]] }
 0x1f2   : > { %v1344_v28 = vadd.f32 %v1343_v30, %v1340_v8  ;;  %v1313_v63 = vadd.f32 %v1312_v18, %v1309_v15  ;;  %v1351_v39 = vmul.f32 %v1350_v36, %v3542_v6  ;;  %v1374_v17 = vmul.f32 %v4081_v19, %v1373_v7 }
 0x1f3   : > { %v1377_v59 = vstv %s4094_s22  ;;  %v1371_v60 = vadd.f32 %v1370_v58, %v1369_v22  ;;  %v1381_v47 = vstv %s4101_s3  ;;  %v4155_v49 = vmax.f32 %v1274_v50, 0.0  ;;  %s4221_s22 = sld [smem:[#allocation8 + $0x7]]  ;;  %s4233_s3 = sld [smem:[#allocation8 + $0x1b]] }
 0x1f4   : > { %v1348_v38 = vadd.f32 %v1347_v62, %v1344_v28  ;;  %v1378_v10 = vmul.f32 %v1377_v59, %v3538_v0  ;;  %v1285_v31 = vstv %s4096_s24  ;;  %v1324_v41 = vstv %s4110_s27  ;;  %s4225_s24 = sld [smem:[#allocation8 + $0x13b]]  ;;  %s4241_s27 = sld [smem:[#allocation8 + $0x25]] }
 0x1f5   : > { %v1385_v23 = vstv %s4112_s2  ;;  %v1248_v53 = vadd.f32 %v1247_v55, %v1209_v56  ;;  %v1363_v12 = vstv %s4118_s5  ;;  %v1375_v30 = vadd.f32 %v1374_v17, %v1371_v60  ;;  %s4246_s2 = sld [smem:[#allocation8 + $0x135]]  ;;  %s4250_s5 = sld [smem:[#allocation8 + $0x2f]] }
 0x1f6   : > { %v1382_v4 = vmul.f32 %v1381_v47, %v3500_v27  ;;  %v4170_v9 = vmax.f32 %v1313_v63, 0.0  ;;  %v1352_v25 = vadd.f32 %v1351_v39, %v1348_v38  ;;  %v1389_v3 = vstv %s4124_s15  ;;  %s4259_s15 = sld [smem:[#allocation8 + $0x39]] }
 0x1f7   : > { %v1407_v18 = vstv %s4126_s23  ;;  %v1379_v56 = vadd.f32 %v1378_v10, %v1375_v30  ;;  %v1386_v8 = vmul.f32 %v4128_v34, %v1385_v23  ;;  %v1409_v36 = vstv %s4132_s21  ;;  %s4263_s23 = sld [smem:[#allocation8 + $0x13f]]  ;;  %s4268_s21 = sld [smem:[#allocation8 + $0x43]] }
 0x1f8   : > { %v1408_v62 = vmul.f32 %v1407_v18, %v3496_v16  ;;  %v1286_v50 = vmul.f32 %v1285_v31, %v4155_v49  ;;  %v1412_v14 = vstv %s4134_s19  ;;  %v1416_v15 = vstv %s4139_s11  ;;  %s4275_s19 = sld [smem:[#allocation8 + $0x4d]]  ;;  %s4282_s11 = sld [smem:[#allocation8 + $0x57]] }
 0x1f9   : > { %v1420_v44 = vstv %s4141_s16  ;;  %v1383_v58 = vadd.f32 %v1382_v4, %v1379_v56  ;;  %v1390_v55 = vmul.f32 %v1389_v3, %v3542_v6  ;;  %v1413_v22 = vmul.f32 %v4081_v19, %v1412_v14  ;;  %s4286_s16 = sld [smem:[#allocation8 + $0x61]] }
 0x1fa   : > { %v1410_v28 = vadd.f32 %v1409_v36, %v1408_v62  ;;  %v1287_v7 = vadd.f32 %v1286_v50, %v1248_v53  ;;  %v1325_v63 = vmul.f32 %v1324_v41, %v4170_v9  ;;  %v1417_v39 = vmul.f32 %v1416_v15, %v3538_v0 }
 0x1fb   : > { %v1424_v17 = vstv %s4149_s18  ;;  %v4202_v59 = vmax.f32 %v1352_v25, 0.0  ;;  %v1387_v38 = vadd.f32 %v1386_v8, %v1383_v58  ;;  %v1421_v10 = vmul.f32 %v1420_v44, %v3500_v27  ;;  %s4292_s18 = sld [smem:[#allocation8 + $0x6b]] }
 0x1fc   : > { %v1414_v60 = vadd.f32 %v1413_v22, %v1410_v28  ;;  %v1425_v47 = vmul.f32 %v4128_v34, %v1424_v17  ;;  %v1428_v31 = vstv %s4153_s14  ;;  %v1446_v41 = vstv %s4162_s1  ;;  %s4298_s14 = sld [smem:[#allocation8 + $0x75]]  ;;  %s1811_s1 = sld [smem:[#allocation8 + $0x8]] }
 0x1fd   : > { %v1448_v23 = vstv %s4160_s12  ;;  %v1391_v53 = vadd.f32 %v1390_v55, %v1387_v38  ;;  %v1447_v4 = vmul.f32 %v1446_v41, %v3496_v16  ;;  %v1451_v25 = vstv %s4168_s10  ;;  %s4302_s12 = sld [smem:[#allocation8 + $0x7f]]  ;;  %s4309_s10 = sld [smem:[#allocation8 + $0x89]] }
 0x1fe   : > { %v1418_v30 = vadd.f32 %v1417_v39, %v1414_v60  ;;  %v1402_v3 = vstv %s4166_s9  ;;  %v1452_v18 = vmul.f32 %v4081_v19, %v1451_v25  ;;  %v1455_v56 = vstv %s4174_s6  ;;  %s4305_s9 = sld [smem:[#allocation8 + $0x12]]  ;;  %s4311_s6 = sld [smem:[#allocation8 + $0x1c]] }
 0x1ff   : > { %v1459_v8 = vstv %s4176_s7  ;;  %v1429_v36 = vmul.f32 %v1428_v31, %v3542_v6  ;;  %v1449_v50 = vadd.f32 %v1448_v23, %v1447_v4  ;;  %v1456_v14 = vmul.f32 %v1455_v56, %v3538_v0  ;;  %s5413_s7 = smov 127  }
 0x200   : > { %v1422_v62 = vadd.f32 %v1421_v10, %v1418_v30  ;;  %v1326_v15 = vadd.f32 %v1325_v63, %v1287_v7  ;;  %v1364_v44 = vmul.f32 %v1363_v12, %v4202_v59  ;;  %v4228_v58 = vmax.f32 %v1391_v53, 0.0 }
 0x201   : > { %v1463_v55 = vstv %s4185_s8  ;;  %v1453_v22 = vadd.f32 %v1452_v18, %v1449_v50  ;;  %v1460_v39 = vmul.f32 %v1459_v8, %v3500_v27  ;;  %v1467_v17 = vstv %s4187_s26  ;;  %s4315_s8 = sld [smem:[#allocation8 + $0x26]]  ;;  %s4318_s26 = sld [smem:[#allocation8 + $0x93]] }
 0x202   : > { %v1426_v28 = vadd.f32 %v1425_v47, %v1422_v62  ;;  %v1485_v38 = vstv %s4193_s25  ;;  %v1487_v60 = vstv %s4191_s0  ;;  %v1490_v10 = vstv %s4198_s28  ;;  %s4321_s0 = sld [smem:[#allocation8 + $0x30]]  ;;  %s4324_s25 = sld [smem:[#allocation8 + $0x9d]] }
 0x203   : > { %v1494_v7 = vstv %s4200_s20  ;;  %v1457_v63 = vadd.f32 %v1456_v14, %v1453_v22  ;;  %v1464_v31 = vmul.f32 %v4128_v34, %v1463_v55  ;;  %v1486_v41 = vmul.f32 %v1485_v38, %v3496_v16  ;;  %s4327_s28 = sld [smem:[#allocation8 + $0x3a]]  ;;  %s4330_s20 = sld [smem:[#allocation8 + $0xa7]] }
 0x204   : > { %v1430_v12 = vadd.f32 %v1429_v36, %v1426_v28  ;;  %v1365_v47 = vadd.f32 %v1364_v44, %v1326_v15  ;;  %v1441_v23 = vstv %s4207_s30  ;;  %v1491_v53 = vmul.f32 %v4081_v19, %v1490_v10  ;;  %s4335_s30 = sld [smem:[#allocation8 + $0x44]] }
 0x205   : > { %v1498_v30 = vstv %s4211_s4  ;;  %v1461_v4 = vadd.f32 %v1460_v39, %v1457_v63  ;;  %v1468_v25 = vmul.f32 %v1467_v17, %v3542_v6  ;;  %v1488_v18 = vadd.f32 %v1487_v60, %v1486_v41  ;;  %s4338_s4 = sld [smem:[#allocation8 + $0xb1]] }
 0x206   : > { %v1495_v56 = vmul.f32 %v1494_v7, %v3538_v0  ;;  %v1403_v16 = vmul.f32 %v1402_v3, %v4228_v58  ;;  %v4255_v8 = vmax.f32 %v1430_v12, 0.0  ;;  %v1502_v62 = vstv %s4219_s13  ;;  %s4344_s13 = sld [smem:[#allocation8 + $0x4e]] }
 0x207   : > { %v302_v36 = vstv %s4221_s22  ;;  %v1465_v19 = vadd.f32 %v1464_v31, %v1461_v4  ;;  %v1492_v50 = vadd.f32 %v1491_v53, %v1488_v18  ;;  %v1499_v14 = vmul.f32 %v1498_v30, %v3500_v27  ;;  %s4347_s22 = sld [smem:[#allocation8 + $0xbb]] }
 0x208   : > { %v1506_v15 = vstv %s4225_s24  ;;  %v1404_v44 = vadd.f32 %v1403_v16, %v1365_v47  ;;  %v303_v55 = vmul.f32 %v302_v36, %v3607_v57  ;;  %v341_v0 = vstv %s4231_s29  ;;  %s4352_s24 = sld [smem:[#allocation8 + $0x58]]  ;;  %s4355_s29 = sld [smem:[#allocation8 + $0xc5]] }
 0x209   : > { %v380_v3 = vstv %s4233_s3  ;;  %v1469_v28 = vadd.f32 %v1468_v25, %v1465_v19  ;;  %v1496_v22 = vadd.f32 %v1495_v56, %v1492_v50  ;;  %v1503_v39 = vmul.f32 %v4128_v34, %v1502_v62  ;;  %s4360_s3 = sld [smem:[#allocation8 + $0x62]] }
 0x20a   : > { %v342_v17 = vmul.f32 %v341_v0, %v3614_v24  ;;  %v1442_v27 = vmul.f32 %v1441_v23, %v4255_v8  ;;  %v1507_v38 = vmul.f32 %v1506_v15, %v3542_v6  ;;  %v419_v60 = vstv %s4241_s27  ;;  %s4363_s27 = sld [smem:[#allocation8 + $0xcf]] }
 0x20b   : > { %v4277_v10 = vmax.f32 %v1469_v28, 0.0  ;;  %v1500_v7 = vadd.f32 %v1499_v14, %v1496_v22  ;;  %v381_v63 = vmul.f32 %v380_v3, %v3616_v51  ;;  %v1480_v31 = vstv %s4246_s2  ;;  %s4368_s2 = sld [smem:[#allocation8 + $0x6c]] }
 0x20c   : > { %v343_v12 = vadd.f32 %v342_v17, %v303_v55  ;;  %v458_v34 = vstv %s4250_s5  ;;  %v1443_v41 = vadd.f32 %v1442_v27, %v1404_v44  ;;  %v420_v6 = vmul.f32 %v419_v60, %v3622_v1  ;;  %s4371_s5 = sld [smem:[#allocation8 + $0xd9]] }
 0x20d   : > { %v1504_v47 = vadd.f32 %v1503_v39, %v1500_v7  ;;  %v497_v53 = vstv %s4259_s15  ;;  %v1481_v30 = vmul.f32 %v1480_v31, %v4277_v10  ;;  %v459_v18 = vmul.f32 %v458_v34, %v3643_v37  ;;  %s4376_s15 = sld [smem:[#allocation8 + $0x76]] }
 0x20e   : > { %v382_v23 = vadd.f32 %v381_v63, %v343_v12  ;;  %v1519_v56 = vstv %s4263_s23  ;;  %v536_v16 = vstv %s4268_s21  ;;  %v498_v50 = vmul.f32 %v497_v53, %v3671_v46  ;;  %s4379_s23 = sld [smem:[#allocation8 + $0xe3]]  ;;  %s4384_s21 = sld [smem:[#allocation8 + $0x80]] }
 0x20f   : > { %v1508_v4 = vadd.f32 %v1507_v38, %v1504_v47  ;;  %v1482_v62 = vadd.f32 %v1481_v30, %v1443_v41  ;;  %v575_v14 = vstv %s4275_s19  ;;  %v537_v55 = vmul.f32 %v536_v16, %v3691_v32  ;;  %s4387_s19 = sld [smem:[#allocation8 + $0xed]] }
 0x210   : > { %v421_v25 = vadd.f32 %v420_v6, %v382_v23  ;;  %v614_v0 = vstv %s4282_s11  ;;  %v576_v22 = vmul.f32 %v575_v14, %v3730_v43  ;;  %v653_v39 = vstv %s4286_s16  ;;  %s4392_s11 = sld [smem:[#allocation8 + $0x8a]]  ;;  %s4395_s16 = sld [smem:[#allocation8 + $0xf7]] }
 0x211   : > { %v4294_v36 = vmax.f32 %v1508_v4, 0.0  ;;  %v615_v27 = vmul.f32 %v614_v0, %v3753_v29  ;;  %v692_v38 = vstv %s4292_s18  ;;  %v654_v7 = vmul.f32 %v653_v39, %v3769_v21  ;;  %s4400_s18 = sld [smem:[#allocation8 + $0x94]] }
 0x212   : > { %v460_v19 = vadd.f32 %v459_v18, %v421_v25  ;;  %v731_v12 = vstv %s4298_s14  ;;  %v693_v31 = vmul.f32 %v692_v38, %v3787_v33  ;;  %v770_v34 = vstv %s4302_s12  ;;  %s4403_s14 = sld [smem:[#allocation8 + $0x101]]  ;;  %s4408_s12 = sld [smem:[#allocation8 + $0x9e]] }
 0x213   : > { %v1520_v15 = vmul.f32 %v1519_v56, %v4294_v36  ;;  %v306_v41 = vstv %s1811_s1  ;;  %v345_v47 = vstv %s4305_s9  ;;  %v732_v6 = vmul.f32 %v731_v12, %v3799_v48  ;;  %s4411_s1 = sld [smem:[#allocation8 + $0x10b]]  ;;  %s4416_s9 = sld [smem:[#allocation8 + $0xa8]] }
 0x214   : > { %v499_v44 = vadd.f32 %v498_v50, %v460_v19  ;;  %v307_v53 = vmul.f32 %v306_v41, %v3607_v57  ;;  %v809_v30 = vstv %s4309_s10  ;;  %v346_v4 = vmul.f32 %v345_v47, %v3614_v24  ;;  %s4419_s10 = sld [smem:[#allocation8 + $0x115]] }
 0x215   : > { %v1521_v3 = vadd.f32 %v1520_v15, %v1482_v62  ;;  %v384_v25 = vstv %s4311_s6  ;;  %v771_v56 = vmul.f32 %v770_v34, %v3819_v20  ;;  %v423_v16 = vstv %s4315_s8  ;;  %s4424_s6 = sld [smem:[#allocation8 + $0xb2]]  ;;  %s4432_s8 = sld [smem:[#allocation8 + $0xbc]] }
 0x216   : > { %v538_v28 = vadd.f32 %v537_v55, %v499_v44  ;;  %v848_v62 = vstv %s4318_s26  ;;  %v347_v57 = vadd.f32 %v346_v4, %v307_v53  ;;  %v385_v19 = vmul.f32 %v384_v25, %v3616_v51  ;;  %s4435_s26 = sld [smem:[#allocation8 + $0x129]] }
 0x217   : > { %1529 = vrot.lane.b32.xlu1 %v1521_v3, %s5413_s7  ;;  %v810_v14 = vmul.f32 %v809_v30, %v3846_v26  ;;  %v462_v15 = vstv %s4321_s0  ;;  %v887_v24 = vstv %s4324_s25  ;;  %v424_v55 = vmul.f32 %v423_v16, %v3622_v1  ;;  %s4427_s7 = sld [smem:[#allocation8 + $0x11f]]  ;;  %s4440_s0 = sld [smem:[#allocation8 + $0xc6]] }
 0x218   : > { %v577_v17 = vadd.f32 %v576_v22, %v538_v28  ;;  %v386_v44 = vadd.f32 %v385_v19, %v347_v57  ;;  %v849_v3 = vmul.f32 %v848_v62, %v3876_v40  ;;  %v501_v28 = vstv %s4327_s28  ;;  %s4443_s25 = sld [smem:[#allocation8 + $0x133]]  ;;  %s4448_s28 = sld [smem:[#allocation8 + $0xd0]] }
 0x219   : > { %v926_v51 = vstv %s4330_s20  ;;  %v463_v39 = vmul.f32 %v462_v15, %v3643_v37  ;;  %v540_v38 = vstv %s4335_s30  ;;  %v965_v1 = vstv %s4338_s4  ;;  %s4451_s20 = sld [smem:[#allocation8 + $0x13d]]  ;;  %s4456_s30 = sld [smem:[#allocation8 + $0xda]] }
 0x21a   : > { %v616_v60 = vadd.f32 %v615_v27, %v577_v17  ;;  %v425_v22 = vadd.f32 %v424_v55, %v386_v44  ;;  %v888_v27 = vmul.f32 %v887_v24, %v3897_v35  ;;  %v1004_v37 = vstv %s4347_s22  ;;  %s4462_s4 = sld [smem:[#allocation8 + $0xe4]]  ;;  %s4477_s22 = sld [smem:[#allocation8 + $0xf8]] }
 0x21b   : > { %v541_v41 = vmul.f32 %v540_v38, %v3691_v32  ;;  %v1005_v25 = vmul.f32 %v1004_v37, %v3958_v61  ;;  %v1082_v32 = vstv %s4363_s27  ;;  %v696_v19 = vstv %s4368_s2  ;;  %s2091_s27 = sld [smem:[#allocation8 + $0x120]]  ;;  %s2101_s2 = sld [smem:[#allocation8 + $0x12a]] }
 0x21c   : > { %v655_v63 = vadd.f32 %v654_v7, %v616_v60  ;;  %v464_v60 = vadd.f32 %v463_v39, %v425_v22  ;;  %v502_v7 = vmul.f32 %v501_v28, %v3671_v46  ;;  %v1043_v46 = vstv %s4355_s29  ;;  %s2071_s29 = sld [smem:[#allocation8 + $0x10c]] }
 0x21d   : > { %v1044_v57 = vmul.f32 %v1043_v46, %v3988_v45  ;;  %v1083_v24 = vmul.f32 %v1082_v32, %v4006_v42  ;;  %v735_v44 = vstv %s4376_s15  ;;  %v813_v38 = vstv %s4392_s11  ;;  %s2121_s15 = sld [smem:[#allocation8 + $0x13e]]  ;;  %s5418_s11 = sld [smem:[#allocation23_spill]] }
 0x21e   : > { %v694_v23 = vadd.f32 %v693_v31, %v655_v63  ;;  %v927_v63 = vmul.f32 %v926_v51, %v3924_v5  ;;  %v579_v31 = vstv %s4344_s13  ;;  %v503_v34 = vadd.f32 %v502_v7, %v464_v60  ;;  %s4466_s13 = sld [smem:[#allocation8 + $0xee]] }
 0x21f   : > { %v580_v30 = vmul.f32 %v579_v31, %v3730_v43  ;;  %v1121_v43 = vstv %s4371_s5  ;;  %v774_v51 = vstv %s4384_s21  ;;  %v736_v39 = vmul.f32 %v735_v44, %v3799_v48  ;;  %s2111_s5 = sld [smem:[#allocation8 + $0x134]]  ;;  %s5416_s21 = sld [smem:[#allocation20_spill]] }
 0x220   : > { %v733_v18 = vadd.f32 %v732_v6, %v694_v23  ;;  %v966_v23 = vmul.f32 %v965_v1, %v3940_v11  ;;  %v618_v6 = vstv %s4352_s24  ;;  %v542_v53 = vadd.f32 %v541_v41, %v503_v34  ;;  %s2061_s24 = sld [smem:[#allocation8 + $0x102]] }
 0x221   : > { %v619_v16 = vmul.f32 %v618_v6, %v3753_v29  ;;  %v1160_v29 = vstv %s4379_s23  ;;  %v1122_v28 = vmul.f32 %v1121_v43, %v4026_v52  ;;  %v775_v60 = vmul.f32 %v774_v51, %v3819_v20  ;;  %s5415_s23 = sld [smem:[#allocation25_spill]] }
 0x222   : > { %v772_v50 = vadd.f32 %v771_v56, %v733_v18  ;;  %v657_v18 = vstv %s4360_s3  ;;  %v581_v56 = vadd.f32 %v580_v30, %v542_v53  ;;  %v1277_v48 = vstv %s4403_s14  ;;  %s5414_s3 = smov 1  }
 0x223   : > { %v814_v37 = vmul.f32 %v813_v38, %v3846_v26  ;;  %v1316_v20 = vstv %s4411_s1  ;;  %v1278_v53 = vmul.f32 %v1277_v48, %v4155_v49  ;;  %v930_v30 = vstv %s4416_s9  ;;  %v2253_v38 = vld [vmem:[%s5273_s17 + $0x70] ss:$8 sps:$4 sm:$0xff]   ;;  %p5420_p7 = scmp.ne.s32.totalorder %s5418_s11, 0 }
 0x224   : > { %v811_v0 = vadd.f32 %v810_v14, %v772_v50  ;;  %v620_v50 = vadd.f32 %v619_v16, %v581_v56  ;;  %v658_v14 = vmul.f32 %v657_v18, %v3769_v21  ;;  %v1199_v21 = vstv %s4387_s19  ;;  %s2123_s19 = sld [smem:[#allocation8 + $0x140]] }
 0x225   : > { %v1355_v26 = vstv %s4419_s10  ;;  %v1317_v32 = vmul.f32 %v1316_v20, %v4170_v9  ;;  %v969_v56 = vstv %s4424_s6  ;;  %v1008_v43 = vstv %s4432_s8  ;;  %s5419_s10 = sld [smem:[#allocation197_spill]] }
 0x226   : > { %v850_v17 = vadd.f32 %v849_v3, %v811_v0  ;;  %v659_v55 = vadd.f32 %v658_v14, %v620_v50  ;;  %v697_v0 = vmul.f32 %v696_v19, %v3787_v33  ;;  %v1238_v33 = vstv %s4395_s16 }
 0x227   : > { %v1239_v41 = vmul.f32 %v1238_v33, %v4114_v54  ;;  %v1356_v19 = vmul.f32 %v1355_v26, %v4202_v59  ;;  %v970_v14 = vmul.f32 %v969_v56, %v3940_v11  ;;  %v1047_v44 = vstv %s4440_s0  ;;  %s1803_s16 = sshll.u32 %s5415_s23, 4 }
 0x228   : > { %v889_v12 = vadd.f32 %v888_v27, %v850_v17  ;;  %v698_v22 = vadd.f32 %v697_v0, %v659_v55  ;;  %v1161_v27 = vmul.f32 %v1160_v29, %v4058_v13  ;;  %v2248_v29 = vld [vmem:[%s5273_s17 + $0x64] ss:$8 sps:$4 sm:$0xff]   ;;  %v2251_v55 = vld [vmem:[%s5273_s17 + $0x74] ss:$8 sps:$4 sm:$0xff]   ;;  %v1472_v0 = vstv %s4443_s25 }
 0x229   : > { %v1086_v11 = vstv %s4448_s28  ;;  %1642 = vmatprep.subr.bf16.mxu0 %v2248_v29  ;;  %v1164_v48 = vstv %s4462_s4  ;;  %v1242_v20 = vstv %s4477_s22 }
 0x22a   : > { %v928_v47 = vadd.f32 %v927_v63, %v889_v12  ;;  %v737_v1 = vadd.f32 %v736_v39, %v698_v22  ;;  %v1200_v12 = vmul.f32 %v1199_v21, %v4088_v2  ;;  %v852_v63 = vstv %s4400_s18  ;;  %s252_s18 = scalar_lea.vmem [#allocation10], %s1803_s16 }
 0x22b   : > { %v853_v6 = vmul.f32 %v852_v63, %v3876_v40  ;;  %v1394_v40 = vstv %s4427_s7  ;;  %v2446_v22 = vmov 0   ;;  %v1511_v39 = vstv %s4451_s20  ;;  %s1688_s14 = sshll.u32 %s252_s18, 4  ;;  %s1674_s7 = scalar_lea.sflag [#allocation4], %s5415_s23  ;;  %s4507_s14 = int_to_ptr.vmem [resolvable:$true] %s1688_s14 }
 0x22c   : > { %v967_v4 = vadd.f32 %v966_v23, %v928_v47  ;;  %v776_v31 = vadd.f32 %v775_v60, %v737_v1  ;;  %v891_v47 = vstv %s4408_s12  ;;  %1662 = vmatprep.mubr.bf16.mxu0 %v2446_v22  ;;  %v1125_v1 = vstv %s4456_s30  ;;  %s2146_s12 = sshll.u32 %s5416_s21, 8  ;;  %s2357_s8 = scalar_lea.vmem %s4507_s14, 256 }
 0x22d   : > { %v1512_v63 = vmul.f32 %v1511_v39, %v4294_v36  ;;  %s4512_s6 = scalar_lea.hbm %s5419_s10, %s2146_s12  ;;  %p2358_p3 = scmp.ne.s32.totalorder %s4507_s14, %s2357_s8 }
 0x22e   : > { %v1006_v62 = vadd.f32 %v1005_v25, %v967_v4  ;;  %v815_v23 = vadd.f32 %v814_v37, %v776_v31  ;;  %v892_v25 = vmul.f32 %v891_v47, %v3897_v35  ;;  %v1433_v35 = vstv %s4435_s26  ;;  %s2447_s26 = smov [#allocation10]  }
 0x22f   : > { %v1434_v21 = vmul.f32 %v1433_v35, %v4255_v8  ;;  %v1165_v47 = vmul.f32 %v1164_v48, %v4058_v13  ;;  %p2359_p0 = pnand %p2358_p3, %p5420_p7  ;;  %s2361_s0 = sshll.u32 %s2447_s26, 4  ;;  %s2362_s0 = int_to_ptr.vmem [resolvable:$false] %s2361_s0 }
 0x230   : > { %v1045_v15 = vadd.f32 %v1044_v57, %v1006_v62  ;;  %v854_v4 = vadd.f32 %v853_v6, %v815_v23  ;;  %v931_v62 = vmul.f32 %v930_v30, %v3924_v5  ;;  %v2250_v5 = vld [vmem:[%s5273_s17 + $0x60] ss:$8 sps:$4 sm:$0xff]   ;;  %s2081_s17 = sld [smem:[#allocation8 + $0x116]]  ;;  %v1281_v6 = vstv %s2061_s24  ;;  %s2363_s25 = scalar_lea.vmem %s2362_s0, 512 }
 0x231   : > { %1643 = vmatpush1.bf16.msra.mxu0 %v2250_v5  ;;  %v1282_v26 = vmul.f32 %v1281_v6, %v4155_v49  ;;  %p2360_p9 = pneg %p2359_p0  ;;  %p2364_p1 = scmp.lt.s32.totalorder %s4507_s14, %s2362_s0 }
 0x232   : > { %v1084_v3 = vadd.f32 %v1083_v24, %v1045_v15  ;;  %v893_v16 = vadd.f32 %v892_v25, %v854_v4  ;;  %v1395_v24 = vmul.f32 %v1394_v40, %v4228_v58  ;;  %1644 = vmatprep.subr.bf16.mxu0 %v2251_v55  ;;  %p2365_p2 = scmp.lt.s32.totalorder %s2363_s25, %s2357_s8 }
 0x234   : > { %v1123_v17 = vadd.f32 %v1122_v28, %v1084_v3  ;;  %v932_v50 = vadd.f32 %v931_v62, %v893_v16  ;;  %v1009_v28 = vmul.f32 %v1008_v43, %v3958_v61  ;;  %v1473_v61 = vmul.f32 %v1472_v0, %v4277_v10  ;;  %p2366_p5 = por %p2365_p2, %p2364_p1 }
 0x235   : > { %1645 = vmatpush1.bf16.msra.mxu0 %v2253_v38  ;;  %v1476_v62 = vstv %s2111_s5 }
 0x236   : > { %v1162_v7 = vadd.f32 %v1161_v27, %v1123_v17  ;;  %v971_v3 = vadd.f32 %v970_v14, %v932_v50  ;;  %v1048_v27 = vmul.f32 %v1047_v44, %v3988_v45  ;;  %v1126_v45 = vmul.f32 %v1125_v1, %v4026_v52  ;;  %p2367_p10 = pnand %p2366_p5, %p2360_p9 }
 0x237   : > { %v1320_v52 = vstv %s2071_s29  ;;  %v1359_v4 = vstv %s2081_s17  ;;  %v1477_v49 = vmul.f32 %v1476_v62, %v4277_v10 }
 0x238   : > { %v1201_v34 = vadd.f32 %v1200_v12, %v1162_v7  ;;  %v1010_v17 = vadd.f32 %v1009_v28, %v971_v3  ;;  %v1087_v7 = vmul.f32 %v1086_v11, %v4006_v42  ;;  %v1321_v25 = vmul.f32 %v1320_v52, %v4170_v9 }
 0x239   : > { %v1360_v56 = vmul.f32 %v1359_v4, %v4202_v59  ;;  %v1526_v59 = vstv %s2123_s19 }
 0x23a   : > { %v1240_v46 = vadd.f32 %v1239_v41, %v1201_v34  ;;  %v1049_v60 = vadd.f32 %v1048_v27, %v1010_v17  ;;  %v1203_v34 = vstv %s4466_s13 }
 0x23b   : > { %v1204_v23 = vmul.f32 %v1203_v34, %v4088_v2  ;;  %v1437_v2 = vstv %s2101_s2 }
 0x23c   : > { %v1279_v18 = vadd.f32 %v1278_v53, %v1240_v46  ;;  %v1088_v31 = vadd.f32 %v1087_v7, %v1049_v60  ;;  %v1243_v53 = vmul.f32 %v1242_v20, %v4114_v54 }
 0x23e   : > { %v1318_v57 = vadd.f32 %v1317_v32, %v1279_v18  ;;  %v1127_v41 = vadd.f32 %v1126_v45, %v1088_v31  ;;  %v1398_v18 = vstv %s2091_s27 }
 0x23f   : > { %v1399_v16 = vmul.f32 %v1398_v18, %v4228_v58 }
 0x240   : > { %v1357_v15 = vadd.f32 %v1356_v19, %v1318_v57  ;;  %v1166_v42 = vadd.f32 %v1165_v47, %v1127_v41  ;;  %v1438_v57 = vmul.f32 %v1437_v2, %v4255_v8  ;;  %v1515_v19 = vstv %s2121_s15 }
 0x241   : > { %v1516_v9 = vmul.f32 %v1515_v19, %v4294_v36 }
 0x242   : > { %v1396_v51 = vadd.f32 %v1395_v24, %v1357_v15  ;;  %v1205_v46 = vadd.f32 %v1204_v23, %v1166_v42 }
 0x244   : > { %v1435_v33 = vadd.f32 %v1434_v21, %v1396_v51  ;;  %v1244_v30 = vadd.f32 %v1243_v53, %v1205_v46 }
 0x246   : > { %v1474_v12 = vadd.f32 %v1473_v61, %v1435_v33  ;;  %v1283_v13 = vadd.f32 %v1282_v26, %v1244_v30 }
 0x248   : > { %v1513_v37 = vadd.f32 %v1512_v63, %v1474_v12  ;;  %v1322_v32 = vadd.f32 %v1321_v25, %v1283_v13 }
 0x24a   : > { %1523 = vrot.lane.b32.xlu0 %v1513_v37, %s5414_s3  ;;  %v1361_v40 = vadd.f32 %v1360_v56, %v1322_v32 }
 0x24c   : > { %v1400_v54 = vadd.f32 %v1399_v16, %v1361_v40 }
 0x24e   : > { %v1439_v43 = vadd.f32 %v1438_v57, %v1400_v54 }
 0x250   : > { %v1478_v35 = vadd.f32 %v1477_v49, %v1439_v43 }
 0x252   : > { %v1517_v50 = vadd.f32 %v1516_v9, %v1478_v35 }
 0x289   : > { %v1530_v24 = vpop.permute.xlu1 %1529 }
 0x28a   : > { %v1531_v8 = vsel %vm261_vm1, 0.0, %v1530_v24 }
 0x2bc   : > { %v1524_v14 = vpop.permute.xlu0 %1523 }
 0x2bd   : > { %v1525_v58 = vsel %vm260_vm0, 0.0, %v1524_v14 }
 0x2be   : > { %v1527_v44 = vadd.f32 %v1526_v59, %v1525_v58 }
 0x2c0   : > { %v1528_v29 = vadd.f32 %v1527_v44, %v1517_v50 }
 0x2c2   : > { %v1532_v5 = vadd.f32 %v1531_v8, %v1528_v29 }
 0x2c4   : > { %v1533_v10 = vpack.c.bf16 %v1532_v5, %v1532_v5 }
 0x2c6   : > { %1663 = vmatmul.mubr.bf16.vlgmr.msra.gmra.mrb[0].mxu0 %v1533_v10 }
 0x399   : > { %v1664_v36 = vpop.f32.mrb[0].mxu0 }
 0x39a   : > { %1671 = vst [vmem:[%s252_s18] sm:$0xff] %v1664_v36  ;;  %v1666_v55 = vpop.f32.mrb[1].mxu0 }
 0x39b   : > { %1672 = vst [vmem:[%s252_s18 + $0x8] sm:$0xff] %v1666_v55  ;;  %v1668_v0 = vpop.f32.mrb[2].mxu0 }
 0x39c   : > { %v1669_v3 = vpop.f32.mrb[3].mxu0 }
 0x39d   : > { %2370 = shalt.err (!%p2367_p10)
}
 0x39e   : > { %s2371_s28 = scalar_lea.hbm %s4512_s6, 256  ;;  %s2375_s4 = scalar_lea.hbm %s5419_s10, 1024 }
 0x39f   : > { %p2372_p4 = scmp.ne.s32.totalorder %s4512_s6, %s2371_s28  ;;  %p2376_p12 = scmp.lt.u32.totalorder %s4512_s6, %s5419_s10 }
 0x3a0   : > { %p2377_p8 = scmp.lt.u32.totalorder %s2375_s4, %s2371_s28  ;;  %p2379_p3 = scmp.lt.u32.totalorder %s2371_s28, %s4512_s6 }
 0x3a1   : > { %p2373_p6 = pnand %p2372_p4, %p5420_p7 }
 0x3a2   : > { %p2378_p13 = por %p2377_p8, %p2376_p12 }
 0x3a3   : > { %p2374_p11 = pneg %p2373_p6 }
 0x3a4   : > { %p2380_p0 = por %p2379_p3, %p2378_p13 }
 0x3a6   : > { %p2381_p9 = pnand %p2380_p0, %p2374_p11 }
 0x3a8   : > { %2384 = shalt.err (!%p2381_p9)
}
 0x3a9   : > { %2161 = dma.vmem_to_hbm [thread:$0]  (%p5420_p7), %s4507_s14, 256, %s4512_s6, %s1674_s7  }
 0x3aa PF: > { %s5421_s24 = sld [smem:[#allocation19_spill]]  ;;  %s5422_s29 = sld [smem:[#allocation16_spill]] }
 0x3ab   : > { %s5423_s17 = sld [smem:[#allocation24_spill]] }
 0x3b0   : > { %p2188_p1 = scmp.ge.s32.totalorder %s5421_s24, 2  ;;  %s1700_s3 = sand.u32 1, %s5422_s29  }
 0x3b1   : > { %p5424_p2 = scmp.ne.s32.totalorder %s5423_s17, 0  ;;  %s1701_s27 = scalar_lea.sflag [#allocation4], %s1700_s3 }
 0x3b3   : > { %p2178_p5 = pnand %p2188_p1, %p5424_p2 }
 0x3b5   : > { %2418 = dma.done.wait (!%p2178_p5), %s1701_s27, 256  }
 0x3b6   : > { %2420 = vsyncadd (!%p2178_p5), %s1701_s27, 4294967040  ;;  %s5425_s18 = sld [smem:[#allocation21_spill]]  ;;  %s5426_s15 = sld [smem:[#allocation17_spill]] }
 0x3b7   : > { %s5427_s16 = sld [smem:[#allocation18_spill]]  ;;  %s5428_s17 = sld [smem:[#allocation22_spill]] }
 0x3bc   : > { %p17_p10 = scmp.ge.s32.totalorder %s5425_s18, 6  }
 0x3be   :  { %19 = sbr.rel (!%p17_p10) target bundleno = 12 (0xc), region = 93 }
 0x3c5   :  { %1706 = vsyncpa [#allocation3], 1 }
 0x3c6   :  { %1708 = vsyncpa [#allocation3 + $0x1], 1 }
 0x3c7   :  { %1709 = vsyncpa [#allocation7], 1 }
 0x3c8   :  { %1710 = vsyncpa [#allocation4], 1 }
 0x3c9   :  { %1712 = vsyncpa [#allocation4 + $0x1], 1 }
 0x3ca   :  { %1713 = vsyncpa [#allocation5], 1 }
 0x3cb   :  { %1715 = vsyncpa [#allocation5 + $0x1], 1 }

</bundles_post_ra>
